<compile_context>
chip_gen: v5e
topology: v5e:2x2
jax: 0.10.0
libtpu: 0.0.40
codegen_flags: <defaults>
</compile_context>

<pallas_src>
import jax
import jax.numpy as jnp
from jax.experimental import pallas as pl
from jax.experimental.pallas import tpu as pltpu

# ----------------------------- config ---------------------------------------
B, T = 2, 8                       # batch, sequence length
N_CAT, N_CONT = 2, 3              # categorical / continuous feature counts
VOCAB = [5, 7]                    # vocab sizes for the categorical features
EH = 16                           # encoder_hidden_dim
H = 32                            # hidden_dim
OUT = 4                           # output_dim
NUM_LAYERS = 3                    # LSTM layers
DIN = N_CAT * EH + N_CONT         # 35
DPAD = 128                        # lane-padded encoder input width


# ----------------------------- fused Pallas kernel ---------------------------

def fused_kernel(feats_ref, maskf_ref,
                 w1_ref, b1_ref, w2_ref, b2_ref,
                 wih_ref, whh_ref, bl_ref,
                 wa_ref, ba_ref, wo_ref, bo_ref,
                 emb_ref, out_ref, x_sc):
    bf16 = jnp.bfloat16
    f32 = jnp.float32

    # ---- event encoder MLP on the whole (T*B, DPAD) slab (2 MXU pushes total) ----
    feats = feats_ref[...]                                             # (T*B, DPAD) bf16, time-major
    h1 = jnp.dot(feats, w1_ref[...], preferred_element_type=f32) + b1_ref[...]
    h1 = jnp.maximum(h1, 0.0)                                          # ReLU
    emb_seq = jnp.dot(h1.astype(bf16), w2_ref[...],
                      preferred_element_type=f32) + b2_ref[...]        # (T*B, H)
    maskv = maskf_ref[...]                                             # (T*B, 1) f32
    x_slab = emb_seq * maskv                                           # event_emb * mask.unsqueeze(2)
    ms = [maskv[t * B:(t + 1) * B, :] for t in range(T)]               # per-t mask views (B, 1)

    # ---- stacked LSTM: layers & time fully unrolled, state stays in vregs ----
    ys = None
    for l in range(NUM_LAYERS):
        whh = whh_ref[l]                                               # (H, 4H) bf16
        # ONE batched input projection per layer (hoisted off the serial recurrence)
        xw_slab = jnp.dot(x_slab.astype(bf16), wih_ref[l],
                          preferred_element_type=f32) + bl_ref[l]      # (T*B, 4H)
        h = jnp.zeros((B, H), f32)
        c = jnp.zeros((B, H), f32)
        ys = []
        for t in range(T):
            gates = xw_slab[t * B:(t + 1) * B, :] + jnp.dot(
                h.astype(bf16), whh, preferred_element_type=f32)       # (B, 4H), order i,f,g,o
            sg = jax.nn.sigmoid(gates)                                 # one full-width EUP pass (i,f,o)
            i_g = sg[:, 0:H]
            f_g = sg[:, H:2 * H]
            o_g = sg[:, 3 * H:4 * H]
            g_g = jnp.tanh(gates[:, 2 * H:3 * H])
            c = f_g * c + i_g * g_g
            h = o_g * jnp.tanh(c)
            ys.append(h)
        if l < NUM_LAYERS - 1:
            # hand the layer output slab to the next layer via VMEM scratch
            for t in range(T):
                x_sc[t * B:(t + 1) * B, :] = ys[t]
            x_slab = x_sc[...]
        # TODO(synk): nn.LSTM inter-layer dropout omitted (inference / eval-mode semantics)

    # ---- attention pooling (masked softmax over time) + output head ----
    wa = wa_ref[...]                                                   # (1, H)
    sc = [jnp.sum(x * wa, axis=-1, keepdims=True) + ba_ref[...] for x in ys]   # each (B, 1)
    sc = [jnp.where(m > 0.0, s, -1e30) for s, m in zip(sc, ms)]        # masked_fill(mask==0, -inf)
    mmax = sc[0]
    for t in range(1, T):
        mmax = jnp.maximum(mmax, sc[t])
    denom = jnp.zeros((B, 1), f32)
    num = jnp.zeros((B, H), f32)
    for t in range(T):
        e = jnp.exp(sc[t] - mmax)
        denom = denom + e
        num = num + e * ys[t]
    pooled = num * pl.reciprocal(denom, approx=True)                   # (B, H)

    emb_ref[...] = pooled
    out_ref[...] = (jnp.dot(pooled.astype(bf16), wo_ref[...],
                            preferred_element_type=f32) + bo_ref[...])


# ----------------------------- wrapper ----------------------------------------

@jax.jit
def forward(params, cat_features, cont_features, attention_mask):
    # glue: embedding gather + concat + time-major flatten (pure JAX)
    e0 = jnp.take(params['emb0'], cat_features[:, :, 0], axis=0)
    e1 = jnp.take(params['emb1'], cat_features[:, :, 1], axis=0)
    feats = jnp.concatenate([e0, e1, cont_features], axis=-1)          # (B, T, DIN)
    feats_tm = feats.transpose(1, 0, 2).reshape(T * B, DIN).astype(jnp.float32)
    feats_tm = jnp.pad(feats_tm, ((0, 0), (0, DPAD - DIN)))            # lane-pad 35 -> 128
    feats_tm = feats_tm.astype(jnp.bfloat16)                           # MXU operand; halves DMA
    mask_tm = attention_mask.astype(jnp.float32).T.reshape(T * B, 1)   # (T*B, 1), row = t*B + b

    # weights: matmul operands pre-cast to bf16 (f32 accumulation in-kernel), biases stay f32
    w1p = jnp.pad(params['w1t'], ((0, DPAD - DIN), (0, 0))).astype(jnp.bfloat16)
    w2p = params['w2t'].astype(jnp.bfloat16)
    wih_all = jnp.stack([w for (w, _, _) in params['lstm']]).astype(jnp.bfloat16)  # (L, H, 4H)
    whh_all = jnp.stack([w for (_, w, _) in params['lstm']]).astype(jnp.bfloat16)  # (L, H, 4H)
    b_all = jnp.stack([b for (_, _, b) in params['lstm']])                         # (L, 1, 4H) f32
    wop = params['wot'].astype(jnp.bfloat16)

    emb, out = pl.pallas_call(
        fused_kernel,
        out_shape=(jax.ShapeDtypeStruct((B, H), jnp.float32),
                   jax.ShapeDtypeStruct((B, OUT), jnp.float32)),
        scratch_shapes=[pltpu.VMEM((T * B, H), jnp.float32)],
    )(feats_tm, mask_tm,
      w1p, params['b1'], w2p, params['b2'],
      wih_all, whh_all, b_all,
      params['wa'], params['ba'], wop, params['bo'])
    return emb, out


# ----------------------------- pure-JAX reference ----------------------------

def forward_ref(params, cat_features, cont_features, attention_mask):
    e0 = jnp.take(params['emb0'], cat_features[:, :, 0], axis=0)
    e1 = jnp.take(params['emb1'], cat_features[:, :, 1], axis=0)
    feats = jnp.concatenate([e0, e1, cont_features], axis=-1)
    h1 = jax.nn.relu(feats @ params['w1t'] + params['b1'][0])
    emb = h1 @ params['w2t'] + params['b2'][0]
    emb = emb * attention_mask[:, :, None].astype(jnp.float32)
    x = emb.transpose(1, 0, 2)                                         # (T, B, H)
    for (wih_t, whh_t, b) in params['lstm']:
        def step(carry, x_t, wih_t=wih_t, whh_t=whh_t, b=b):
            h, c = carry
            gates = x_t @ wih_t + h @ whh_t + b[0]
            i = jax.nn.sigmoid(gates[:, :H])
            f = jax.nn.sigmoid(gates[:, H:2 * H])
            g = jnp.tanh(gates[:, 2 * H:3 * H])
            o = jax.nn.sigmoid(gates[:, 3 * H:])
            c = f * c + i * g
            h = o * jnp.tanh(c)
            return (h, c), h
        (_, _), x = jax.lax.scan(step, (jnp.zeros((B, H)), jnp.zeros((B, H))), x)
    scores = jnp.sum(x * params['wa'][0][None, None, :], axis=-1) + params['ba'][0, 0]
    m = attention_mask.astype(jnp.float32).T
    scores = jnp.where(m > 0, scores, -1e30)
    w = jax.nn.softmax(scores, axis=0)
    pooled = jnp.sum(w[:, :, None] * x, axis=0)
    out = pooled @ params['wot'] + params['bo'][0]
    return pooled, out


# ----------------------------- params ----------------------------------------

def init_params(key):
    ks = jax.random.split(key, 16)
    s = 0.1
    p = {}
    p['emb0'] = jax.random.normal(ks[0], (VOCAB[0], EH), jnp.float32) * s
    p['emb1'] = jax.random.normal(ks[1], (VOCAB[1], EH), jnp.float32) * s
    p['w1t'] = jax.random.normal(ks[2], (DIN, EH), jnp.float32) * s
    p['b1'] = jax.random.normal(ks[3], (1, EH), jnp.float32) * s
    p['w2t'] = jax.random.normal(ks[4], (EH, H), jnp.float32) * s
    p['b2'] = jax.random.normal(ks[5], (1, H), jnp.float32) * s
    p['lstm'] = []
    for l in range(NUM_LAYERS):
        kk = jax.random.split(ks[6 + l], 3)
        wih_t = jax.random.normal(kk[0], (H, 4 * H), jnp.float32) * s   # W_ih^T
        whh_t = jax.random.normal(kk[1], (H, 4 * H), jnp.float32) * s   # W_hh^T
        b = jax.random.normal(kk[2], (1, 4 * H), jnp.float32) * s       # b_ih + b_hh (combined)
        p['lstm'].append((wih_t, whh_t, b))
    p['wa'] = jax.random.normal(ks[10], (1, H), jnp.float32) * s        # AttentionPooling Linear(H,1)
    p['ba'] = jax.random.normal(ks[11], (1, 1), jnp.float32) * s
    p['wot'] = jax.random.normal(ks[12], (H, OUT), jnp.float32) * s     # out Linear(H, OUT)^T
    p['bo'] = jax.random.normal(ks[13], (1, OUT), jnp.float32) * s
    return p


# ----------------------------- main -------------------------------------------

if __name__ == "__main__":
    key = jax.random.PRNGKey(0)
    kp, k1, k2 = jax.random.split(key, 3)
    params = init_params(kp)

    cat_features = jnp.stack(
        [jax.random.randint(k1, (B, T), 0, VOCAB[0]),
         jax.random.randint(jax.random.fold_in(k1, 1), (B, T), 0, VOCAB[1])], axis=-1
    ).astype(jnp.int32)                                              # (B, T, 2)
    cont_features = jax.random.normal(k2, (B, T, N_CONT), jnp.float32)
    lengths = jnp.array([T, 5])
    attention_mask = (jnp.arange(T)[None, :] < lengths[:, None]).astype(jnp.int32)  # (B, T)

    emb, out = forward(params, cat_features, cont_features, attention_mask)
    jax.block_until_ready((emb, out))

    emb_r, out_r = forward_ref(params, cat_features, cont_features, attention_mask)
    assert emb.shape == (B, H) and out.shape == (B, OUT)
    assert jnp.allclose(emb, emb_r, atol=2e-2, rtol=2e-2), "embedding mismatch"
    assert jnp.allclose(out, out_r, atol=2e-2, rtol=2e-2), "output mismatch"

    print("KERNEL_OK")
</pallas_src>

<mosaic_0001>
module attributes {stable_mosaic.version = 11 : i64} {
  func.func @fused_kernel(%arg0: memref<16x128xbf16, #tpu.memory_space<vmem>>, %arg1: memref<16x1xf32, #tpu.memory_space<vmem>>, %arg2: memref<128x16xbf16, #tpu.memory_space<vmem>>, %arg3: memref<1x16xf32, #tpu.memory_space<vmem>>, %arg4: memref<16x32xbf16, #tpu.memory_space<vmem>>, %arg5: memref<1x32xf32, #tpu.memory_space<vmem>>, %arg6: memref<3x32x128xbf16, #tpu.memory_space<vmem>>, %arg7: memref<3x32x128xbf16, #tpu.memory_space<vmem>>, %arg8: memref<3x1x128xf32, #tpu.memory_space<vmem>>, %arg9: memref<1x32xf32, #tpu.memory_space<vmem>>, %arg10: memref<1x1xf32, #tpu.memory_space<vmem>>, %arg11: memref<32x4xbf16, #tpu.memory_space<vmem>>, %arg12: memref<1x4xf32, #tpu.memory_space<vmem>>, %arg13: memref<2x32xf32, #tpu.memory_space<vmem>>, %arg14: memref<2x4xf32, #tpu.memory_space<vmem>>, %arg15: memref<16x32xf32, #tpu.memory_space<vmem>>) attributes {dimension_semantics = [], scalar_prefetch = 0 : i64, scratch_operands = 1 : i64, tpu.core_type = #tpu.core_type<tc>} {
    %c0 = arith.constant 0 : index
    %c0_0 = arith.constant 0 : index
    %0 = vector.load %arg0[%c0, %c0_0] : memref<16x128xbf16, #tpu.memory_space<vmem>>, vector<16x128xbf16>
    %c0_1 = arith.constant 0 : index
    %c0_2 = arith.constant 0 : index
    %1 = vector.load %arg2[%c0_1, %c0_2] : memref<128x16xbf16, #tpu.memory_space<vmem>>, vector<128x16xbf16>
    %cst = arith.constant dense<0.000000e+00> : vector<16x16xf32>
    %2 = tpu.matmul %0, %1, %cst {dimension_numbers = #tpu.dot_dimension_numbers<[1], [0], [0], [1], [0, 0, 1, 1], [], []>} : vector<16x128xbf16>, vector<128x16xbf16>, vector<16x16xf32> -> vector<16x16xf32>
    %c0_3 = arith.constant 0 : index
    %c0_4 = arith.constant 0 : index
    %3 = vector.load %arg3[%c0_3, %c0_4] : memref<1x16xf32, #tpu.memory_space<vmem>>, vector<1x16xf32>
    %4 = vector.broadcast %3 : vector<1x16xf32> to vector<16x16xf32>
    %5 = arith.addf %2, %4 : vector<16x16xf32>
    %cst_5 = arith.constant 0.000000e+00 : f32
    %6 = vector.broadcast %cst_5 : f32 to vector<16x16xf32>
    %7 = arith.maximumf %5, %6 : vector<16x16xf32>
    %8 = arith.truncf %7 : vector<16x16xf32> to vector<16x16xbf16>
    %c0_6 = arith.constant 0 : index
    %c0_7 = arith.constant 0 : index
    %9 = vector.load %arg4[%c0_6, %c0_7] : memref<16x32xbf16, #tpu.memory_space<vmem>>, vector<16x32xbf16>
    %cst_8 = arith.constant dense<0.000000e+00> : vector<16x32xf32>
    %10 = tpu.matmul %8, %9, %cst_8 {dimension_numbers = #tpu.dot_dimension_numbers<[1], [0], [0], [1], [0, 0, 1, 1], [], []>} : vector<16x16xbf16>, vector<16x32xbf16>, vector<16x32xf32> -> vector<16x32xf32>
    %c0_9 = arith.constant 0 : index
    %c0_10 = arith.constant 0 : index
    %11 = vector.load %arg5[%c0_9, %c0_10] : memref<1x32xf32, #tpu.memory_space<vmem>>, vector<1x32xf32>
    %12 = vector.broadcast %11 : vector<1x32xf32> to vector<16x32xf32>
    %13 = arith.addf %10, %12 : vector<16x32xf32>
    %c0_11 = arith.constant 0 : index
    %c0_12 = arith.constant 0 : index
    %14 = vector.load %arg1[%c0_11, %c0_12] : memref<16x1xf32, #tpu.memory_space<vmem>>, vector<16x1xf32>
    %15 = vector.broadcast %14 : vector<16x1xf32> to vector<16x32xf32>
    %16 = arith.mulf %13, %15 : vector<16x32xf32>
    %17 = vector.extract_strided_slice %14 {offsets = [0, 0], sizes = [2, 1], strides = [1, 1]} : vector<16x1xf32> to vector<2x1xf32>
    %18 = vector.extract_strided_slice %14 {offsets = [2, 0], sizes = [2, 1], strides = [1, 1]} : vector<16x1xf32> to vector<2x1xf32>
    %19 = vector.extract_strided_slice %14 {offsets = [4, 0], sizes = [2, 1], strides = [1, 1]} : vector<16x1xf32> to vector<2x1xf32>
    %20 = vector.extract_strided_slice %14 {offsets = [6, 0], sizes = [2, 1], strides = [1, 1]} : vector<16x1xf32> to vector<2x1xf32>
    %21 = vector.extract_strided_slice %14 {offsets = [8, 0], sizes = [2, 1], strides = [1, 1]} : vector<16x1xf32> to vector<2x1xf32>
    %22 = vector.extract_strided_slice %14 {offsets = [10, 0], sizes = [2, 1], strides = [1, 1]} : vector<16x1xf32> to vector<2x1xf32>
    %23 = vector.extract_strided_slice %14 {offsets = [12, 0], sizes = [2, 1], strides = [1, 1]} : vector<16x1xf32> to vector<2x1xf32>
    %24 = vector.extract_strided_slice %14 {offsets = [14, 0], sizes = [2, 1], strides = [1, 1]} : vector<16x1xf32> to vector<2x1xf32>
    %c0_13 = arith.constant 0 : index
    %c0_14 = arith.constant 0 : index
    %c0_15 = arith.constant 0 : index
    %25 = vector.load %arg7[%c0_13, %c0_14, %c0_15] : memref<3x32x128xbf16, #tpu.memory_space<vmem>>, vector<1x32x128xbf16>
    %26 = vector.shape_cast %25 : vector<1x32x128xbf16> to vector<32x128xbf16>
    %27 = arith.truncf %16 : vector<16x32xf32> to vector<16x32xbf16>
    %c0_16 = arith.constant 0 : index
    %c0_17 = arith.constant 0 : index
    %c0_18 = arith.constant 0 : index
    %28 = vector.load %arg6[%c0_16, %c0_17, %c0_18] : memref<3x32x128xbf16, #tpu.memory_space<vmem>>, vector<1x32x128xbf16>
    %29 = vector.shape_cast %28 : vector<1x32x128xbf16> to vector<32x128xbf16>
    %cst_19 = arith.constant dense<0.000000e+00> : vector<16x128xf32>
    %30 = tpu.matmul %27, %29, %cst_19 {dimension_numbers = #tpu.dot_dimension_numbers<[1], [0], [0], [1], [0, 0, 1, 1], [], []>} : vector<16x32xbf16>, vector<32x128xbf16>, vector<16x128xf32> -> vector<16x128xf32>
    %c0_20 = arith.constant 0 : index
    %c0_21 = arith.constant 0 : index
    %c0_22 = arith.constant 0 : index
    %31 = vector.load %arg8[%c0_20, %c0_21, %c0_22] : memref<3x1x128xf32, #tpu.memory_space<vmem>>, vector<1x1x128xf32>
    %32 = vector.shape_cast %31 : vector<1x1x128xf32> to vector<1x128xf32>
    %33 = vector.broadcast %32 : vector<1x128xf32> to vector<16x128xf32>
    %34 = arith.addf %30, %33 : vector<16x128xf32>
    %cst_23 = arith.constant 0.000000e+00 : f32
    %35 = vector.broadcast %cst_23 : f32 to vector<2x32xf32>
    %cst_24 = arith.constant 0.000000e+00 : f32
    %36 = vector.broadcast %cst_24 : f32 to vector<2x32xf32>
    %37 = vector.extract_strided_slice %34 {offsets = [0, 0], sizes = [2, 128], strides = [1, 1]} : vector<16x128xf32> to vector<2x128xf32>
    %38 = arith.truncf %35 : vector<2x32xf32> to vector<2x32xbf16>
    %cst_25 = arith.constant dense<0.000000e+00> : vector<2x128xf32>
    %39 = tpu.matmul %38, %26, %cst_25 {dimension_numbers = #tpu.dot_dimension_numbers<[1], [0], [0], [1], [0, 0, 1, 1], [], []>} : vector<2x32xbf16>, vector<32x128xbf16>, vector<2x128xf32> -> vector<2x128xf32>
    %40 = arith.addf %37, %39 : vector<2x128xf32>
    %41 = arith.negf %40 : vector<2x128xf32>
    %42 = math.exp %41 : vector<2x128xf32>
    %cst_26 = arith.constant 1.000000e+00 : f32
    %43 = vector.broadcast %cst_26 : f32 to vector<2x128xf32>
    %44 = arith.addf %43, %42 : vector<2x128xf32>
    %45 = arith.divf %43, %44 : vector<2x128xf32>
    %46 = vector.extract_strided_slice %45 {offsets = [0, 0], sizes = [2, 32], strides = [1, 1]} : vector<2x128xf32> to vector<2x32xf32>
    %47 = vector.extract_strided_slice %45 {offsets = [0, 32], sizes = [2, 32], strides = [1, 1]} : vector<2x128xf32> to vector<2x32xf32>
    %48 = vector.extract_strided_slice %45 {offsets = [0, 96], sizes = [2, 32], strides = [1, 1]} : vector<2x128xf32> to vector<2x32xf32>
    %49 = vector.extract_strided_slice %40 {offsets = [0, 64], sizes = [2, 32], strides = [1, 1]} : vector<2x128xf32> to vector<2x32xf32>
    %50 = math.tanh %49 : vector<2x32xf32>
    %51 = arith.mulf %47, %36 : vector<2x32xf32>
    %52 = arith.mulf %46, %50 : vector<2x32xf32>
    %53 = arith.addf %51, %52 : vector<2x32xf32>
    %54 = math.tanh %53 : vector<2x32xf32>
    %55 = arith.mulf %48, %54 : vector<2x32xf32>
    %56 = vector.extract_strided_slice %34 {offsets = [2, 0], sizes = [2, 128], strides = [1, 1]} : vector<16x128xf32> to vector<2x128xf32>
    %57 = arith.truncf %55 : vector<2x32xf32> to vector<2x32xbf16>
    %cst_27 = arith.constant dense<0.000000e+00> : vector<2x128xf32>
    %58 = tpu.matmul %57, %26, %cst_27 {dimension_numbers = #tpu.dot_dimension_numbers<[1], [0], [0], [1], [0, 0, 1, 1], [], []>} : vector<2x32xbf16>, vector<32x128xbf16>, vector<2x128xf32> -> vector<2x128xf32>
    %59 = arith.addf %56, %58 : vector<2x128xf32>
    %60 = arith.negf %59 : vector<2x128xf32>
    %61 = math.exp %60 : vector<2x128xf32>
    %cst_28 = arith.constant 1.000000e+00 : f32
    %62 = vector.broadcast %cst_28 : f32 to vector<2x128xf32>
    %63 = arith.addf %62, %61 : vector<2x128xf32>
    %64 = arith.divf %62, %63 : vector<2x128xf32>
    %65 = vector.extract_strided_slice %64 {offsets = [0, 0], sizes = [2, 32], strides = [1, 1]} : vector<2x128xf32> to vector<2x32xf32>
    %66 = vector.extract_strided_slice %64 {offsets = [0, 32], sizes = [2, 32], strides = [1, 1]} : vector<2x128xf32> to vector<2x32xf32>
    %67 = vector.extract_strided_slice %64 {offsets = [0, 96], sizes = [2, 32], strides = [1, 1]} : vector<2x128xf32> to vector<2x32xf32>
    %68 = vector.extract_strided_slice %59 {offsets = [0, 64], sizes = [2, 32], strides = [1, 1]} : vector<2x128xf32> to vector<2x32xf32>
    %69 = math.tanh %68 : vector<2x32xf32>
    %70 = arith.mulf %66, %53 : vector<2x32xf32>
    %71 = arith.mulf %65, %69 : vector<2x32xf32>
    %72 = arith.addf %70, %71 : vector<2x32xf32>
    %73 = math.tanh %72 : vector<2x32xf32>
    %74 = arith.mulf %67, %73 : vector<2x32xf32>
    %75 = vector.extract_strided_slice %34 {offsets = [4, 0], sizes = [2, 128], strides = [1, 1]} : vector<16x128xf32> to vector<2x128xf32>
    %76 = arith.truncf %74 : vector<2x32xf32> to vector<2x32xbf16>
    %cst_29 = arith.constant dense<0.000000e+00> : vector<2x128xf32>
    %77 = tpu.matmul %76, %26, %cst_29 {dimension_numbers = #tpu.dot_dimension_numbers<[1], [0], [0], [1], [0, 0, 1, 1], [], []>} : vector<2x32xbf16>, vector<32x128xbf16>, vector<2x128xf32> -> vector<2x128xf32>
    %78 = arith.addf %75, %77 : vector<2x128xf32>
    %79 = arith.negf %78 : vector<2x128xf32>
    %80 = math.exp %79 : vector<2x128xf32>
    %cst_30 = arith.constant 1.000000e+00 : f32
    %81 = vector.broadcast %cst_30 : f32 to vector<2x128xf32>
    %82 = arith.addf %81, %80 : vector<2x128xf32>
    %83 = arith.divf %81, %82 : vector<2x128xf32>
    %84 = vector.extract_strided_slice %83 {offsets = [0, 0], sizes = [2, 32], strides = [1, 1]} : vector<2x128xf32> to vector<2x32xf32>
    %85 = vector.extract_strided_slice %83 {offsets = [0, 32], sizes = [2, 32], strides = [1, 1]} : vector<2x128xf32> to vector<2x32xf32>
    %86 = vector.extract_strided_slice %83 {offsets = [0, 96], sizes = [2, 32], strides = [1, 1]} : vector<2x128xf32> to vector<2x32xf32>
    %87 = vector.extract_strided_slice %78 {offsets = [0, 64], sizes = [2, 32], strides = [1, 1]} : vector<2x128xf32> to vector<2x32xf32>
    %88 = math.tanh %87 : vector<2x32xf32>
    %89 = arith.mulf %85, %72 : vector<2x32xf32>
    %90 = arith.mulf %84, %88 : vector<2x32xf32>
    %91 = arith.addf %89, %90 : vector<2x32xf32>
    %92 = math.tanh %91 : vector<2x32xf32>
    %93 = arith.mulf %86, %92 : vector<2x32xf32>
    %94 = vector.extract_strided_slice %34 {offsets = [6, 0], sizes = [2, 128], strides = [1, 1]} : vector<16x128xf32> to vector<2x128xf32>
    %95 = arith.truncf %93 : vector<2x32xf32> to vector<2x32xbf16>
    %cst_31 = arith.constant dense<0.000000e+00> : vector<2x128xf32>
    %96 = tpu.matmul %95, %26, %cst_31 {dimension_numbers = #tpu.dot_dimension_numbers<[1], [0], [0], [1], [0, 0, 1, 1], [], []>} : vector<2x32xbf16>, vector<32x128xbf16>, vector<2x128xf32> -> vector<2x128xf32>
    %97 = arith.addf %94, %96 : vector<2x128xf32>
    %98 = arith.negf %97 : vector<2x128xf32>
    %99 = math.exp %98 : vector<2x128xf32>
    %cst_32 = arith.constant 1.000000e+00 : f32
    %100 = vector.broadcast %cst_32 : f32 to vector<2x128xf32>
    %101 = arith.addf %100, %99 : vector<2x128xf32>
    %102 = arith.divf %100, %101 : vector<2x128xf32>
    %103 = vector.extract_strided_slice %102 {offsets = [0, 0], sizes = [2, 32], strides = [1, 1]} : vector<2x128xf32> to vector<2x32xf32>
    %104 = vector.extract_strided_slice %102 {offsets = [0, 32], sizes = [2, 32], strides = [1, 1]} : vector<2x128xf32> to vector<2x32xf32>
    %105 = vector.extract_strided_slice %102 {offsets = [0, 96], sizes = [2, 32], strides = [1, 1]} : vector<2x128xf32> to vector<2x32xf32>
    %106 = vector.extract_strided_slice %97 {offsets = [0, 64], sizes = [2, 32], strides = [1, 1]} : vector<2x128xf32> to vector<2x32xf32>
    %107 = math.tanh %106 : vector<2x32xf32>
    %108 = arith.mulf %104, %91 : vector<2x32xf32>
    %109 = arith.mulf %103, %107 : vector<2x32xf32>
    %110 = arith.addf %108, %109 : vector<2x32xf32>
    %111 = math.tanh %110 : vector<2x32xf32>
    %112 = arith.mulf %105, %111 : vector<2x32xf32>
    %113 = vector.extract_strided_slice %34 {offsets = [8, 0], sizes = [2, 128], strides = [1, 1]} : vector<16x128xf32> to vector<2x128xf32>
    %114 = arith.truncf %112 : vector<2x32xf32> to vector<2x32xbf16>
    %cst_33 = arith.constant dense<0.000000e+00> : vector<2x128xf32>
    %115 = tpu.matmul %114, %26, %cst_33 {dimension_numbers = #tpu.dot_dimension_numbers<[1], [0], [0], [1], [0, 0, 1, 1], [], []>} : vector<2x32xbf16>, vector<32x128xbf16>, vector<2x128xf32> -> vector<2x128xf32>
    %116 = arith.addf %113, %115 : vector<2x128xf32>
    %117 = arith.negf %116 : vector<2x128xf32>
    %118 = math.exp %117 : vector<2x128xf32>
    %cst_34 = arith.constant 1.000000e+00 : f32
    %119 = vector.broadcast %cst_34 : f32 to vector<2x128xf32>
    %120 = arith.addf %119, %118 : vector<2x128xf32>
    %121 = arith.divf %119, %120 : vector<2x128xf32>
    %122 = vector.extract_strided_slice %121 {offsets = [0, 0], sizes = [2, 32], strides = [1, 1]} : vector<2x128xf32> to vector<2x32xf32>
    %123 = vector.extract_strided_slice %121 {offsets = [0, 32], sizes = [2, 32], strides = [1, 1]} : vector<2x128xf32> to vector<2x32xf32>
    %124 = vector.extract_strided_slice %121 {offsets = [0, 96], sizes = [2, 32], strides = [1, 1]} : vector<2x128xf32> to vector<2x32xf32>
    %125 = vector.extract_strided_slice %116 {offsets = [0, 64], sizes = [2, 32], strides = [1, 1]} : vector<2x128xf32> to vector<2x32xf32>
    %126 = math.tanh %125 : vector<2x32xf32>
    %127 = arith.mulf %123, %110 : vector<2x32xf32>
    %128 = arith.mulf %122, %126 : vector<2x32xf32>
    %129 = arith.addf %127, %128 : vector<2x32xf32>
    %130 = math.tanh %129 : vector<2x32xf32>
    %131 = arith.mulf %124, %130 : vector<2x32xf32>
    %132 = vector.extract_strided_slice %34 {offsets = [10, 0], sizes = [2, 128], strides = [1, 1]} : vector<16x128xf32> to vector<2x128xf32>
    %133 = arith.truncf %131 : vector<2x32xf32> to vector<2x32xbf16>
    %cst_35 = arith.constant dense<0.000000e+00> : vector<2x128xf32>
    %134 = tpu.matmul %133, %26, %cst_35 {dimension_numbers = #tpu.dot_dimension_numbers<[1], [0], [0], [1], [0, 0, 1, 1], [], []>} : vector<2x32xbf16>, vector<32x128xbf16>, vector<2x128xf32> -> vector<2x128xf32>
    %135 = arith.addf %132, %134 : vector<2x128xf32>
    %136 = arith.negf %135 : vector<2x128xf32>
    %137 = math.exp %136 : vector<2x128xf32>
    %cst_36 = arith.constant 1.000000e+00 : f32
    %138 = vector.broadcast %cst_36 : f32 to vector<2x128xf32>
    %139 = arith.addf %138, %137 : vector<2x128xf32>
    %140 = arith.divf %138, %139 : vector<2x128xf32>
    %141 = vector.extract_strided_slice %140 {offsets = [0, 0], sizes = [2, 32], strides = [1, 1]} : vector<2x128xf32> to vector<2x32xf32>
    %142 = vector.extract_strided_slice %140 {offsets = [0, 32], sizes = [2, 32], strides = [1, 1]} : vector<2x128xf32> to vector<2x32xf32>
    %143 = vector.extract_strided_slice %140 {offsets = [0, 96], sizes = [2, 32], strides = [1, 1]} : vector<2x128xf32> to vector<2x32xf32>
    %144 = vector.extract_strided_slice %135 {offsets = [0, 64], sizes = [2, 32], strides = [1, 1]} : vector<2x128xf32> to vector<2x32xf32>
    %145 = math.tanh %144 : vector<2x32xf32>
    %146 = arith.mulf %142, %129 : vector<2x32xf32>
    %147 = arith.mulf %141, %145 : vector<2x32xf32>
    %148 = arith.addf %146, %147 : vector<2x32xf32>
    %149 = math.tanh %148 : vector<2x32xf32>
    %150 = arith.mulf %143, %149 : vector<2x32xf32>
    %151 = vector.extract_strided_slice %34 {offsets = [12, 0], sizes = [2, 128], strides = [1, 1]} : vector<16x128xf32> to vector<2x128xf32>
    %152 = arith.truncf %150 : vector<2x32xf32> to vector<2x32xbf16>
    %cst_37 = arith.constant dense<0.000000e+00> : vector<2x128xf32>
    %153 = tpu.matmul %152, %26, %cst_37 {dimension_numbers = #tpu.dot_dimension_numbers<[1], [0], [0], [1], [0, 0, 1, 1], [], []>} : vector<2x32xbf16>, vector<32x128xbf16>, vector<2x128xf32> -> vector<2x128xf32>
    %154 = arith.addf %151, %153 : vector<2x128xf32>
    %155 = arith.negf %154 : vector<2x128xf32>
    %156 = math.exp %155 : vector<2x128xf32>
    %cst_38 = arith.constant 1.000000e+00 : f32
    %157 = vector.broadcast %cst_38 : f32 to vector<2x128xf32>
    %158 = arith.addf %157, %156 : vector<2x128xf32>
    %159 = arith.divf %157, %158 : vector<2x128xf32>
    %160 = vector.extract_strided_slice %159 {offsets = [0, 0], sizes = [2, 32], strides = [1, 1]} : vector<2x128xf32> to vector<2x32xf32>
    %161 = vector.extract_strided_slice %159 {offsets = [0, 32], sizes = [2, 32], strides = [1, 1]} : vector<2x128xf32> to vector<2x32xf32>
    %162 = vector.extract_strided_slice %159 {offsets = [0, 96], sizes = [2, 32], strides = [1, 1]} : vector<2x128xf32> to vector<2x32xf32>
    %163 = vector.extract_strided_slice %154 {offsets = [0, 64], sizes = [2, 32], strides = [1, 1]} : vector<2x128xf32> to vector<2x32xf32>
    %164 = math.tanh %163 : vector<2x32xf32>
    %165 = arith.mulf %161, %148 : vector<2x32xf32>
    %166 = arith.mulf %160, %164 : vector<2x32xf32>
    %167 = arith.addf %165, %166 : vector<2x32xf32>
    %168 = math.tanh %167 : vector<2x32xf32>
    %169 = arith.mulf %162, %168 : vector<2x32xf32>
    %170 = vector.extract_strided_slice %34 {offsets = [14, 0], sizes = [2, 128], strides = [1, 1]} : vector<16x128xf32> to vector<2x128xf32>
    %171 = arith.truncf %169 : vector<2x32xf32> to vector<2x32xbf16>
    %cst_39 = arith.constant dense<0.000000e+00> : vector<2x128xf32>
    %172 = tpu.matmul %171, %26, %cst_39 {dimension_numbers = #tpu.dot_dimension_numbers<[1], [0], [0], [1], [0, 0, 1, 1], [], []>} : vector<2x32xbf16>, vector<32x128xbf16>, vector<2x128xf32> -> vector<2x128xf32>
    %173 = arith.addf %170, %172 : vector<2x128xf32>
    %174 = arith.negf %173 : vector<2x128xf32>
    %175 = math.exp %174 : vector<2x128xf32>
    %cst_40 = arith.constant 1.000000e+00 : f32
    %176 = vector.broadcast %cst_40 : f32 to vector<2x128xf32>
    %177 = arith.addf %176, %175 : vector<2x128xf32>
    %178 = arith.divf %176, %177 : vector<2x128xf32>
    %179 = vector.extract_strided_slice %178 {offsets = [0, 0], sizes = [2, 32], strides = [1, 1]} : vector<2x128xf32> to vector<2x32xf32>
    %180 = vector.extract_strided_slice %178 {offsets = [0, 32], sizes = [2, 32], strides = [1, 1]} : vector<2x128xf32> to vector<2x32xf32>
    %181 = vector.extract_strided_slice %178 {offsets = [0, 96], sizes = [2, 32], strides = [1, 1]} : vector<2x128xf32> to vector<2x32xf32>
    %182 = vector.extract_strided_slice %173 {offsets = [0, 64], sizes = [2, 32], strides = [1, 1]} : vector<2x128xf32> to vector<2x32xf32>
    %183 = math.tanh %182 : vector<2x32xf32>
    %184 = arith.mulf %180, %167 : vector<2x32xf32>
    %185 = arith.mulf %179, %183 : vector<2x32xf32>
    %186 = arith.addf %184, %185 : vector<2x32xf32>
    %187 = math.tanh %186 : vector<2x32xf32>
    %188 = arith.mulf %181, %187 : vector<2x32xf32>
    %c0_41 = arith.constant 0 : index
    %c0_42 = arith.constant 0 : index
    %189 = vector.load %arg15[%c0_41, %c0_42] : memref<16x32xf32, #tpu.memory_space<vmem>>, vector<2x32xf32>
    tpu.vector_store %arg15[%c0_41, %c0_42], %55 {strides = array<i32>} : memref<16x32xf32, #tpu.memory_space<vmem>>, vector<2x32xf32>,
    %c2 = arith.constant 2 : index
    %c0_43 = arith.constant 0 : index
    %190 = vector.load %arg15[%c2, %c0_43] : memref<16x32xf32, #tpu.memory_space<vmem>>, vector<2x32xf32>
    tpu.vector_store %arg15[%c2, %c0_43], %74 {strides = array<i32>} : memref<16x32xf32, #tpu.memory_space<vmem>>, vector<2x32xf32>,
    %c4 = arith.constant 4 : index
    %c0_44 = arith.constant 0 : index
    %191 = vector.load %arg15[%c4, %c0_44] : memref<16x32xf32, #tpu.memory_space<vmem>>, vector<2x32xf32>
    tpu.vector_store %arg15[%c4, %c0_44], %93 {strides = array<i32>} : memref<16x32xf32, #tpu.memory_space<vmem>>, vector<2x32xf32>,
    %c6 = arith.constant 6 : index
    %c0_45 = arith.constant 0 : index
    %192 = vector.load %arg15[%c6, %c0_45] : memref<16x32xf32, #tpu.memory_space<vmem>>, vector<2x32xf32>
    tpu.vector_store %arg15[%c6, %c0_45], %112 {strides = array<i32>} : memref<16x32xf32, #tpu.memory_space<vmem>>, vector<2x32xf32>,
    %c8 = arith.constant 8 : index
    %c0_46 = arith.constant 0 : index
    %193 = vector.load %arg15[%c8, %c0_46] : memref<16x32xf32, #tpu.memory_space<vmem>>, vector<2x32xf32>
    tpu.vector_store %arg15[%c8, %c0_46], %131 {strides = array<i32>} : memref<16x32xf32, #tpu.memory_space<vmem>>, vector<2x32xf32>,
    %c10 = arith.constant 10 : index
    %c0_47 = arith.constant 0 : index
    %194 = vector.load %arg15[%c10, %c0_47] : memref<16x32xf32, #tpu.memory_space<vmem>>, vector<2x32xf32>
    tpu.vector_store %arg15[%c10, %c0_47], %150 {strides = array<i32>} : memref<16x32xf32, #tpu.memory_space<vmem>>, vector<2x32xf32>,
    %c12 = arith.constant 12 : index
    %c0_48 = arith.constant 0 : index
    %195 = vector.load %arg15[%c12, %c0_48] : memref<16x32xf32, #tpu.memory_space<vmem>>, vector<2x32xf32>
    tpu.vector_store %arg15[%c12, %c0_48], %169 {strides = array<i32>} : memref<16x32xf32, #tpu.memory_space<vmem>>, vector<2x32xf32>,
    %c14 = arith.constant 14 : index
    %c0_49 = arith.constant 0 : index
    %196 = vector.load %arg15[%c14, %c0_49] : memref<16x32xf32, #tpu.memory_space<vmem>>, vector<2x32xf32>
    tpu.vector_store %arg15[%c14, %c0_49], %188 {strides = array<i32>} : memref<16x32xf32, #tpu.memory_space<vmem>>, vector<2x32xf32>,
    %c0_50 = arith.constant 0 : index
    %c0_51 = arith.constant 0 : index
    %197 = vector.load %arg15[%c0_50, %c0_51] : memref<16x32xf32, #tpu.memory_space<vmem>>, vector<16x32xf32>
    %c1 = arith.constant 1 : index
    %c0_52 = arith.constant 0 : index
    %c0_53 = arith.constant 0 : index
    %198 = vector.load %arg7[%c1, %c0_52, %c0_53] : memref<3x32x128xbf16, #tpu.memory_space<vmem>>, vector<1x32x128xbf16>
    %199 = vector.shape_cast %198 : vector<1x32x128xbf16> to vector<32x128xbf16>
    %200 = arith.truncf %197 : vector<16x32xf32> to vector<16x32xbf16>
    %c1_54 = arith.constant 1 : index
    %c0_55 = arith.constant 0 : index
    %c0_56 = arith.constant 0 : index
    %201 = vector.load %arg6[%c1_54, %c0_55, %c0_56] : memref<3x32x128xbf16, #tpu.memory_space<vmem>>, vector<1x32x128xbf16>
    %202 = vector.shape_cast %201 : vector<1x32x128xbf16> to vector<32x128xbf16>
    %cst_57 = arith.constant dense<0.000000e+00> : vector<16x128xf32>
    %203 = tpu.matmul %200, %202, %cst_57 {dimension_numbers = #tpu.dot_dimension_numbers<[1], [0], [0], [1], [0, 0, 1, 1], [], []>} : vector<16x32xbf16>, vector<32x128xbf16>, vector<16x128xf32> -> vector<16x128xf32>
    %c1_58 = arith.constant 1 : index
    %c0_59 = arith.constant 0 : index
    %c0_60 = arith.constant 0 : index
    %204 = vector.load %arg8[%c1_58, %c0_59, %c0_60] : memref<3x1x128xf32, #tpu.memory_space<vmem>>, vector<1x1x128xf32>
    %205 = vector.shape_cast %204 : vector<1x1x128xf32> to vector<1x128xf32>
    %206 = vector.broadcast %205 : vector<1x128xf32> to vector<16x128xf32>
    %207 = arith.addf %203, %206 : vector<16x128xf32>
    %cst_61 = arith.constant 0.000000e+00 : f32
    %208 = vector.broadcast %cst_61 : f32 to vector<2x32xf32>
    %cst_62 = arith.constant 0.000000e+00 : f32
    %209 = vector.broadcast %cst_62 : f32 to vector<2x32xf32>
    %210 = vector.extract_strided_slice %207 {offsets = [0, 0], sizes = [2, 128], strides = [1, 1]} : vector<16x128xf32> to vector<2x128xf32>
    %211 = arith.truncf %208 : vector<2x32xf32> to vector<2x32xbf16>
    %cst_63 = arith.constant dense<0.000000e+00> : vector<2x128xf32>
    %212 = tpu.matmul %211, %199, %cst_63 {dimension_numbers = #tpu.dot_dimension_numbers<[1], [0], [0], [1], [0, 0, 1, 1], [], []>} : vector<2x32xbf16>, vector<32x128xbf16>, vector<2x128xf32> -> vector<2x128xf32>
    %213 = arith.addf %210, %212 : vector<2x128xf32>
    %214 = arith.negf %213 : vector<2x128xf32>
    %215 = math.exp %214 : vector<2x128xf32>
    %cst_64 = arith.constant 1.000000e+00 : f32
    %216 = vector.broadcast %cst_64 : f32 to vector<2x128xf32>
    %217 = arith.addf %216, %215 : vector<2x128xf32>
    %218 = arith.divf %216, %217 : vector<2x128xf32>
    %219 = vector.extract_strided_slice %218 {offsets = [0, 0], sizes = [2, 32], strides = [1, 1]} : vector<2x128xf32> to vector<2x32xf32>
    %220 = vector.extract_strided_slice %218 {offsets = [0, 32], sizes = [2, 32], strides = [1, 1]} : vector<2x128xf32> to vector<2x32xf32>
    %221 = vector.extract_strided_slice %218 {offsets = [0, 96], sizes = [2, 32], strides = [1, 1]} : vector<2x128xf32> to vector<2x32xf32>
    %222 = vector.extract_strided_slice %213 {offsets = [0, 64], sizes = [2, 32], strides = [1, 1]} : vector<2x128xf32> to vector<2x32xf32>
    %223 = math.tanh %222 : vector<2x32xf32>
    %224 = arith.mulf %220, %209 : vector<2x32xf32>
    %225 = arith.mulf %219, %223 : vector<2x32xf32>
    %226 = arith.addf %224, %225 : vector<2x32xf32>
    %227 = math.tanh %226 : vector<2x32xf32>
    %228 = arith.mulf %221, %227 : vector<2x32xf32>
    %229 = vector.extract_strided_slice %207 {offsets = [2, 0], sizes = [2, 128], strides = [1, 1]} : vector<16x128xf32> to vector<2x128xf32>
    %230 = arith.truncf %228 : vector<2x32xf32> to vector<2x32xbf16>
    %cst_65 = arith.constant dense<0.000000e+00> : vector<2x128xf32>
    %231 = tpu.matmul %230, %199, %cst_65 {dimension_numbers = #tpu.dot_dimension_numbers<[1], [0], [0], [1], [0, 0, 1, 1], [], []>} : vector<2x32xbf16>, vector<32x128xbf16>, vector<2x128xf32> -> vector<2x128xf32>
    %232 = arith.addf %229, %231 : vector<2x128xf32>
    %233 = arith.negf %232 : vector<2x128xf32>
    %234 = math.exp %233 : vector<2x128xf32>
    %cst_66 = arith.constant 1.000000e+00 : f32
    %235 = vector.broadcast %cst_66 : f32 to vector<2x128xf32>
    %236 = arith.addf %235, %234 : vector<2x128xf32>
    %237 = arith.divf %235, %236 : vector<2x128xf32>
    %238 = vector.extract_strided_slice %237 {offsets = [0, 0], sizes = [2, 32], strides = [1, 1]} : vector<2x128xf32> to vector<2x32xf32>
    %239 = vector.extract_strided_slice %237 {offsets = [0, 32], sizes = [2, 32], strides = [1, 1]} : vector<2x128xf32> to vector<2x32xf32>
    %240 = vector.extract_strided_slice %237 {offsets = [0, 96], sizes = [2, 32], strides = [1, 1]} : vector<2x128xf32> to vector<2x32xf32>
    %241 = vector.extract_strided_slice %232 {offsets = [0, 64], sizes = [2, 32], strides = [1, 1]} : vector<2x128xf32> to vector<2x32xf32>
    %242 = math.tanh %241 : vector<2x32xf32>
    %243 = arith.mulf %239, %226 : vector<2x32xf32>
    %244 = arith.mulf %238, %242 : vector<2x32xf32>
    %245 = arith.addf %243, %244 : vector<2x32xf32>
    %246 = math.tanh %245 : vector<2x32xf32>
    %247 = arith.mulf %240, %246 : vector<2x32xf32>
    %248 = vector.extract_strided_slice %207 {offsets = [4, 0], sizes = [2, 128], strides = [1, 1]} : vector<16x128xf32> to vector<2x128xf32>
    %249 = arith.truncf %247 : vector<2x32xf32> to vector<2x32xbf16>
    %cst_67 = arith.constant dense<0.000000e+00> : vector<2x128xf32>
    %250 = tpu.matmul %249, %199, %cst_67 {dimension_numbers = #tpu.dot_dimension_numbers<[1], [0], [0], [1], [0, 0, 1, 1], [], []>} : vector<2x32xbf16>, vector<32x128xbf16>, vector<2x128xf32> -> vector<2x128xf32>
    %251 = arith.addf %248, %250 : vector<2x128xf32>
    %252 = arith.negf %251 : vector<2x128xf32>
    %253 = math.exp %252 : vector<2x128xf32>
    %cst_68 = arith.constant 1.000000e+00 : f32
    %254 = vector.broadcast %cst_68 : f32 to vector<2x128xf32>
    %255 = arith.addf %254, %253 : vector<2x128xf32>
    %256 = arith.divf %254, %255 : vector<2x128xf32>
    %257 = vector.extract_strided_slice %256 {offsets = [0, 0], sizes = [2, 32], strides = [1, 1]} : vector<2x128xf32> to vector<2x32xf32>
    %258 = vector.extract_strided_slice %256 {offsets = [0, 32], sizes = [2, 32], strides = [1, 1]} : vector<2x128xf32> to vector<2x32xf32>
    %259 = vector.extract_strided_slice %256 {offsets = [0, 96], sizes = [2, 32], strides = [1, 1]} : vector<2x128xf32> to vector<2x32xf32>
    %260 = vector.extract_strided_slice %251 {offsets = [0, 64], sizes = [2, 32], strides = [1, 1]} : vector<2x128xf32> to vector<2x32xf32>
    %261 = math.tanh %260 : vector<2x32xf32>
    %262 = arith.mulf %258, %245 : vector<2x32xf32>
    %263 = arith.mulf %257, %261 : vector<2x32xf32>
    %264 = arith.addf %262, %263 : vector<2x32xf32>
    %265 = math.tanh %264 : vector<2x32xf32>
    %266 = arith.mulf %259, %265 : vector<2x32xf32>
    %267 = vector.extract_strided_slice %207 {offsets = [6, 0], sizes = [2, 128], strides = [1, 1]} : vector<16x128xf32> to vector<2x128xf32>
    %268 = arith.truncf %266 : vector<2x32xf32> to vector<2x32xbf16>
    %cst_69 = arith.constant dense<0.000000e+00> : vector<2x128xf32>
    %269 = tpu.matmul %268, %199, %cst_69 {dimension_numbers = #tpu.dot_dimension_numbers<[1], [0], [0], [1], [0, 0, 1, 1], [], []>} : vector<2x32xbf16>, vector<32x128xbf16>, vector<2x128xf32> -> vector<2x128xf32>
    %270 = arith.addf %267, %269 : vector<2x128xf32>
    %271 = arith.negf %270 : vector<2x128xf32>
    %272 = math.exp %271 : vector<2x128xf32>
    %cst_70 = arith.constant 1.000000e+00 : f32
    %273 = vector.broadcast %cst_70 : f32 to vector<2x128xf32>
    %274 = arith.addf %273, %272 : vector<2x128xf32>
    %275 = arith.divf %273, %274 : vector<2x128xf32>
    %276 = vector.extract_strided_slice %275 {offsets = [0, 0], sizes = [2, 32], strides = [1, 1]} : vector<2x128xf32> to vector<2x32xf32>
    %277 = vector.extract_strided_slice %275 {offsets = [0, 32], sizes = [2, 32], strides = [1, 1]} : vector<2x128xf32> to vector<2x32xf32>
    %278 = vector.extract_strided_slice %275 {offsets = [0, 96], sizes = [2, 32], strides = [1, 1]} : vector<2x128xf32> to vector<2x32xf32>
    %279 = vector.extract_strided_slice %270 {offsets = [0, 64], sizes = [2, 32], strides = [1, 1]} : vector<2x128xf32> to vector<2x32xf32>
    %280 = math.tanh %279 : vector<2x32xf32>
    %281 = arith.mulf %277, %264 : vector<2x32xf32>
    %282 = arith.mulf %276, %280 : vector<2x32xf32>
    %283 = arith.addf %281, %282 : vector<2x32xf32>
    %284 = math.tanh %283 : vector<2x32xf32>
    %285 = arith.mulf %278, %284 : vector<2x32xf32>
    %286 = vector.extract_strided_slice %207 {offsets = [8, 0], sizes = [2, 128], strides = [1, 1]} : vector<16x128xf32> to vector<2x128xf32>
    %287 = arith.truncf %285 : vector<2x32xf32> to vector<2x32xbf16>
    %cst_71 = arith.constant dense<0.000000e+00> : vector<2x128xf32>
    %288 = tpu.matmul %287, %199, %cst_71 {dimension_numbers = #tpu.dot_dimension_numbers<[1], [0], [0], [1], [0, 0, 1, 1], [], []>} : vector<2x32xbf16>, vector<32x128xbf16>, vector<2x128xf32> -> vector<2x128xf32>
    %289 = arith.addf %286, %288 : vector<2x128xf32>
    %290 = arith.negf %289 : vector<2x128xf32>
    %291 = math.exp %290 : vector<2x128xf32>
    %cst_72 = arith.constant 1.000000e+00 : f32
    %292 = vector.broadcast %cst_72 : f32 to vector<2x128xf32>
    %293 = arith.addf %292, %291 : vector<2x128xf32>
    %294 = arith.divf %292, %293 : vector<2x128xf32>
    %295 = vector.extract_strided_slice %294 {offsets = [0, 0], sizes = [2, 32], strides = [1, 1]} : vector<2x128xf32> to vector<2x32xf32>
    %296 = vector.extract_strided_slice %294 {offsets = [0, 32], sizes = [2, 32], strides = [1, 1]} : vector<2x128xf32> to vector<2x32xf32>
    %297 = vector.extract_strided_slice %294 {offsets = [0, 96], sizes = [2, 32], strides = [1, 1]} : vector<2x128xf32> to vector<2x32xf32>
    %298 = vector.extract_strided_slice %289 {offsets = [0, 64], sizes = [2, 32], strides = [1, 1]} : vector<2x128xf32> to vector<2x32xf32>
    %299 = math.tanh %298 : vector<2x32xf32>
    %300 = arith.mulf %296, %283 : vector<2x32xf32>
    %301 = arith.mulf %295, %299 : vector<2x32xf32>
    %302 = arith.addf %300, %301 : vector<2x32xf32>
    %303 = math.tanh %302 : vector<2x32xf32>
    %304 = arith.mulf %297, %303 : vector<2x32xf32>
    %305 = vector.extract_strided_slice %207 {offsets = [10, 0], sizes = [2, 128], strides = [1, 1]} : vector<16x128xf32> to vector<2x128xf32>
    %306 = arith.truncf %304 : vector<2x32xf32> to vector<2x32xbf16>
    %cst_73 = arith.constant dense<0.000000e+00> : vector<2x128xf32>
    %307 = tpu.matmul %306, %199, %cst_73 {dimension_numbers = #tpu.dot_dimension_numbers<[1], [0], [0], [1], [0, 0, 1, 1], [], []>} : vector<2x32xbf16>, vector<32x128xbf16>, vector<2x128xf32> -> vector<2x128xf32>
    %308 = arith.addf %305, %307 : vector<2x128xf32>
    %309 = arith.negf %308 : vector<2x128xf32>
    %310 = math.exp %309 : vector<2x128xf32>
    %cst_74 = arith.constant 1.000000e+00 : f32
    %311 = vector.broadcast %cst_74 : f32 to vector<2x128xf32>
    %312 = arith.addf %311, %310 : vector<2x128xf32>
    %313 = arith.divf %311, %312 : vector<2x128xf32>
    %314 = vector.extract_strided_slice %313 {offsets = [0, 0], sizes = [2, 32], strides = [1, 1]} : vector<2x128xf32> to vector<2x32xf32>
    %315 = vector.extract_strided_slice %313 {offsets = [0, 32], sizes = [2, 32], strides = [1, 1]} : vector<2x128xf32> to vector<2x32xf32>
    %316 = vector.extract_strided_slice %313 {offsets = [0, 96], sizes = [2, 32], strides = [1, 1]} : vector<2x128xf32> to vector<2x32xf32>
    %317 = vector.extract_strided_slice %308 {offsets = [0, 64], sizes = [2, 32], strides = [1, 1]} : vector<2x128xf32> to vector<2x32xf32>
    %318 = math.tanh %317 : vector<2x32xf32>
    %319 = arith.mulf %315, %302 : vector<2x32xf32>
    %320 = arith.mulf %314, %318 : vector<2x32xf32>
    %321 = arith.addf %319, %320 : vector<2x32xf32>
    %322 = math.tanh %321 : vector<2x32xf32>
    %323 = arith.mulf %316, %322 : vector<2x32xf32>
    %324 = vector.extract_strided_slice %207 {offsets = [12, 0], sizes = [2, 128], strides = [1, 1]} : vector<16x128xf32> to vector<2x128xf32>
    %325 = arith.truncf %323 : vector<2x32xf32> to vector<2x32xbf16>
    %cst_75 = arith.constant dense<0.000000e+00> : vector<2x128xf32>
    %326 = tpu.matmul %325, %199, %cst_75 {dimension_numbers = #tpu.dot_dimension_numbers<[1], [0], [0], [1], [0, 0, 1, 1], [], []>} : vector<2x32xbf16>, vector<32x128xbf16>, vector<2x128xf32> -> vector<2x128xf32>
    %327 = arith.addf %324, %326 : vector<2x128xf32>
    %328 = arith.negf %327 : vector<2x128xf32>
    %329 = math.exp %328 : vector<2x128xf32>
    %cst_76 = arith.constant 1.000000e+00 : f32
    %330 = vector.broadcast %cst_76 : f32 to vector<2x128xf32>
    %331 = arith.addf %330, %329 : vector<2x128xf32>
    %332 = arith.divf %330, %331 : vector<2x128xf32>
    %333 = vector.extract_strided_slice %332 {offsets = [0, 0], sizes = [2, 32], strides = [1, 1]} : vector<2x128xf32> to vector<2x32xf32>
    %334 = vector.extract_strided_slice %332 {offsets = [0, 32], sizes = [2, 32], strides = [1, 1]} : vector<2x128xf32> to vector<2x32xf32>
    %335 = vector.extract_strided_slice %332 {offsets = [0, 96], sizes = [2, 32], strides = [1, 1]} : vector<2x128xf32> to vector<2x32xf32>
    %336 = vector.extract_strided_slice %327 {offsets = [0, 64], sizes = [2, 32], strides = [1, 1]} : vector<2x128xf32> to vector<2x32xf32>
    %337 = math.tanh %336 : vector<2x32xf32>
    %338 = arith.mulf %334, %321 : vector<2x32xf32>
    %339 = arith.mulf %333, %337 : vector<2x32xf32>
    %340 = arith.addf %338, %339 : vector<2x32xf32>
    %341 = math.tanh %340 : vector<2x32xf32>
    %342 = arith.mulf %335, %341 : vector<2x32xf32>
    %343 = vector.extract_strided_slice %207 {offsets = [14, 0], sizes = [2, 128], strides = [1, 1]} : vector<16x128xf32> to vector<2x128xf32>
    %344 = arith.truncf %342 : vector<2x32xf32> to vector<2x32xbf16>
    %cst_77 = arith.constant dense<0.000000e+00> : vector<2x128xf32>
    %345 = tpu.matmul %344, %199, %cst_77 {dimension_numbers = #tpu.dot_dimension_numbers<[1], [0], [0], [1], [0, 0, 1, 1], [], []>} : vector<2x32xbf16>, vector<32x128xbf16>, vector<2x128xf32> -> vector<2x128xf32>
    %346 = arith.addf %343, %345 : vector<2x128xf32>
    %347 = arith.negf %346 : vector<2x128xf32>
    %348 = math.exp %347 : vector<2x128xf32>
    %cst_78 = arith.constant 1.000000e+00 : f32
    %349 = vector.broadcast %cst_78 : f32 to vector<2x128xf32>
    %350 = arith.addf %349, %348 : vector<2x128xf32>
    %351 = arith.divf %349, %350 : vector<2x128xf32>
    %352 = vector.extract_strided_slice %351 {offsets = [0, 0], sizes = [2, 32], strides = [1, 1]} : vector<2x128xf32> to vector<2x32xf32>
    %353 = vector.extract_strided_slice %351 {offsets = [0, 32], sizes = [2, 32], strides = [1, 1]} : vector<2x128xf32> to vector<2x32xf32>
    %354 = vector.extract_strided_slice %351 {offsets = [0, 96], sizes = [2, 32], strides = [1, 1]} : vector<2x128xf32> to vector<2x32xf32>
    %355 = vector.extract_strided_slice %346 {offsets = [0, 64], sizes = [2, 32], strides = [1, 1]} : vector<2x128xf32> to vector<2x32xf32>
    %356 = math.tanh %355 : vector<2x32xf32>
    %357 = arith.mulf %353, %340 : vector<2x32xf32>
    %358 = arith.mulf %352, %356 : vector<2x32xf32>
    %359 = arith.addf %357, %358 : vector<2x32xf32>
    %360 = math.tanh %359 : vector<2x32xf32>
    %361 = arith.mulf %354, %360 : vector<2x32xf32>
    %c0_79 = arith.constant 0 : index
    %c0_80 = arith.constant 0 : index
    %362 = vector.load %arg15[%c0_79, %c0_80] : memref<16x32xf32, #tpu.memory_space<vmem>>, vector<2x32xf32>
    tpu.vector_store %arg15[%c0_79, %c0_80], %228 {strides = array<i32>} : memref<16x32xf32, #tpu.memory_space<vmem>>, vector<2x32xf32>,
    %c2_81 = arith.constant 2 : index
    %c0_82 = arith.constant 0 : index
    %363 = vector.load %arg15[%c2_81, %c0_82] : memref<16x32xf32, #tpu.memory_space<vmem>>, vector<2x32xf32>
    tpu.vector_store %arg15[%c2_81, %c0_82], %247 {strides = array<i32>} : memref<16x32xf32, #tpu.memory_space<vmem>>, vector<2x32xf32>,
    %c4_83 = arith.constant 4 : index
    %c0_84 = arith.constant 0 : index
    %364 = vector.load %arg15[%c4_83, %c0_84] : memref<16x32xf32, #tpu.memory_space<vmem>>, vector<2x32xf32>
    tpu.vector_store %arg15[%c4_83, %c0_84], %266 {strides = array<i32>} : memref<16x32xf32, #tpu.memory_space<vmem>>, vector<2x32xf32>,
    %c6_85 = arith.constant 6 : index
    %c0_86 = arith.constant 0 : index
    %365 = vector.load %arg15[%c6_85, %c0_86] : memref<16x32xf32, #tpu.memory_space<vmem>>, vector<2x32xf32>
    tpu.vector_store %arg15[%c6_85, %c0_86], %285 {strides = array<i32>} : memref<16x32xf32, #tpu.memory_space<vmem>>, vector<2x32xf32>,
    %c8_87 = arith.constant 8 : index
    %c0_88 = arith.constant 0 : index
    %366 = vector.load %arg15[%c8_87, %c0_88] : memref<16x32xf32, #tpu.memory_space<vmem>>, vector<2x32xf32>
    tpu.vector_store %arg15[%c8_87, %c0_88], %304 {strides = array<i32>} : memref<16x32xf32, #tpu.memory_space<vmem>>, vector<2x32xf32>,
    %c10_89 = arith.constant 10 : index
    %c0_90 = arith.constant 0 : index
    %367 = vector.load %arg15[%c10_89, %c0_90] : memref<16x32xf32, #tpu.memory_space<vmem>>, vector<2x32xf32>
    tpu.vector_store %arg15[%c10_89, %c0_90], %323 {strides = array<i32>} : memref<16x32xf32, #tpu.memory_space<vmem>>, vector<2x32xf32>,
    %c12_91 = arith.constant 12 : index
    %c0_92 = arith.constant 0 : index
    %368 = vector.load %arg15[%c12_91, %c0_92] : memref<16x32xf32, #tpu.memory_space<vmem>>, vector<2x32xf32>
    tpu.vector_store %arg15[%c12_91, %c0_92], %342 {strides = array<i32>} : memref<16x32xf32, #tpu.memory_space<vmem>>, vector<2x32xf32>,
    %c14_93 = arith.constant 14 : index
    %c0_94 = arith.constant 0 : index
    %369 = vector.load %arg15[%c14_93, %c0_94] : memref<16x32xf32, #tpu.memory_space<vmem>>, vector<2x32xf32>
    tpu.vector_store %arg15[%c14_93, %c0_94], %361 {strides = array<i32>} : memref<16x32xf32, #tpu.memory_space<vmem>>, vector<2x32xf32>,
    %c0_95 = arith.constant 0 : index
    %c0_96 = arith.constant 0 : index
    %370 = vector.load %arg15[%c0_95, %c0_96] : memref<16x32xf32, #tpu.memory_space<vmem>>, vector<16x32xf32>
    %c2_97 = arith.constant 2 : index
    %c0_98 = arith.constant 0 : index
    %c0_99 = arith.constant 0 : index
    %371 = vector.load %arg7[%c2_97, %c0_98, %c0_99] : memref<3x32x128xbf16, #tpu.memory_space<vmem>>, vector<1x32x128xbf16>
    %372 = vector.shape_cast %371 : vector<1x32x128xbf16> to vector<32x128xbf16>
    %373 = arith.truncf %370 : vector<16x32xf32> to vector<16x32xbf16>
    %c2_100 = arith.constant 2 : index
    %c0_101 = arith.constant 0 : index
    %c0_102 = arith.constant 0 : index
    %374 = vector.load %arg6[%c2_100, %c0_101, %c0_102] : memref<3x32x128xbf16, #tpu.memory_space<vmem>>, vector<1x32x128xbf16>
    %375 = vector.shape_cast %374 : vector<1x32x128xbf16> to vector<32x128xbf16>
    %cst_103 = arith.constant dense<0.000000e+00> : vector<16x128xf32>
    %376 = tpu.matmul %373, %375, %cst_103 {dimension_numbers = #tpu.dot_dimension_numbers<[1], [0], [0], [1], [0, 0, 1, 1], [], []>} : vector<16x32xbf16>, vector<32x128xbf16>, vector<16x128xf32> -> vector<16x128xf32>
    %c2_104 = arith.constant 2 : index
    %c0_105 = arith.constant 0 : index
    %c0_106 = arith.constant 0 : index
    %377 = vector.load %arg8[%c2_104, %c0_105, %c0_106] : memref<3x1x128xf32, #tpu.memory_space<vmem>>, vector<1x1x128xf32>
    %378 = vector.shape_cast %377 : vector<1x1x128xf32> to vector<1x128xf32>
    %379 = vector.broadcast %378 : vector<1x128xf32> to vector<16x128xf32>
    %380 = arith.addf %376, %379 : vector<16x128xf32>
    %cst_107 = arith.constant 0.000000e+00 : f32
    %381 = vector.broadcast %cst_107 : f32 to vector<2x32xf32>
    %cst_108 = arith.constant 0.000000e+00 : f32
    %382 = vector.broadcast %cst_108 : f32 to vector<2x32xf32>
    %383 = vector.extract_strided_slice %380 {offsets = [0, 0], sizes = [2, 128], strides = [1, 1]} : vector<16x128xf32> to vector<2x128xf32>
    %384 = arith.truncf %381 : vector<2x32xf32> to vector<2x32xbf16>
    %cst_109 = arith.constant dense<0.000000e+00> : vector<2x128xf32>
    %385 = tpu.matmul %384, %372, %cst_109 {dimension_numbers = #tpu.dot_dimension_numbers<[1], [0], [0], [1], [0, 0, 1, 1], [], []>} : vector<2x32xbf16>, vector<32x128xbf16>, vector<2x128xf32> -> vector<2x128xf32>
    %386 = arith.addf %383, %385 : vector<2x128xf32>
    %387 = arith.negf %386 : vector<2x128xf32>
    %388 = math.exp %387 : vector<2x128xf32>
    %cst_110 = arith.constant 1.000000e+00 : f32
    %389 = vector.broadcast %cst_110 : f32 to vector<2x128xf32>
    %390 = arith.addf %389, %388 : vector<2x128xf32>
    %391 = arith.divf %389, %390 : vector<2x128xf32>
    %392 = vector.extract_strided_slice %391 {offsets = [0, 0], sizes = [2, 32], strides = [1, 1]} : vector<2x128xf32> to vector<2x32xf32>
    %393 = vector.extract_strided_slice %391 {offsets = [0, 32], sizes = [2, 32], strides = [1, 1]} : vector<2x128xf32> to vector<2x32xf32>
    %394 = vector.extract_strided_slice %391 {offsets = [0, 96], sizes = [2, 32], strides = [1, 1]} : vector<2x128xf32> to vector<2x32xf32>
    %395 = vector.extract_strided_slice %386 {offsets = [0, 64], sizes = [2, 32], strides = [1, 1]} : vector<2x128xf32> to vector<2x32xf32>
    %396 = math.tanh %395 : vector<2x32xf32>
    %397 = arith.mulf %393, %382 : vector<2x32xf32>
    %398 = arith.mulf %392, %396 : vector<2x32xf32>
    %399 = arith.addf %397, %398 : vector<2x32xf32>
    %400 = math.tanh %399 : vector<2x32xf32>
    %401 = arith.mulf %394, %400 : vector<2x32xf32>
    %402 = vector.extract_strided_slice %380 {offsets = [2, 0], sizes = [2, 128], strides = [1, 1]} : vector<16x128xf32> to vector<2x128xf32>
    %403 = arith.truncf %401 : vector<2x32xf32> to vector<2x32xbf16>
    %cst_111 = arith.constant dense<0.000000e+00> : vector<2x128xf32>
    %404 = tpu.matmul %403, %372, %cst_111 {dimension_numbers = #tpu.dot_dimension_numbers<[1], [0], [0], [1], [0, 0, 1, 1], [], []>} : vector<2x32xbf16>, vector<32x128xbf16>, vector<2x128xf32> -> vector<2x128xf32>
    %405 = arith.addf %402, %404 : vector<2x128xf32>
    %406 = arith.negf %405 : vector<2x128xf32>
    %407 = math.exp %406 : vector<2x128xf32>
    %cst_112 = arith.constant 1.000000e+00 : f32
    %408 = vector.broadcast %cst_112 : f32 to vector<2x128xf32>
    %409 = arith.addf %408, %407 : vector<2x128xf32>
    %410 = arith.divf %408, %409 : vector<2x128xf32>
    %411 = vector.extract_strided_slice %410 {offsets = [0, 0], sizes = [2, 32], strides = [1, 1]} : vector<2x128xf32> to vector<2x32xf32>
    %412 = vector.extract_strided_slice %410 {offsets = [0, 32], sizes = [2, 32], strides = [1, 1]} : vector<2x128xf32> to vector<2x32xf32>
    %413 = vector.extract_strided_slice %410 {offsets = [0, 96], sizes = [2, 32], strides = [1, 1]} : vector<2x128xf32> to vector<2x32xf32>
    %414 = vector.extract_strided_slice %405 {offsets = [0, 64], sizes = [2, 32], strides = [1, 1]} : vector<2x128xf32> to vector<2x32xf32>
    %415 = math.tanh %414 : vector<2x32xf32>
    %416 = arith.mulf %412, %399 : vector<2x32xf32>
    %417 = arith.mulf %411, %415 : vector<2x32xf32>
    %418 = arith.addf %416, %417 : vector<2x32xf32>
    %419 = math.tanh %418 : vector<2x32xf32>
    %420 = arith.mulf %413, %419 : vector<2x32xf32>
    %421 = vector.extract_strided_slice %380 {offsets = [4, 0], sizes = [2, 128], strides = [1, 1]} : vector<16x128xf32> to vector<2x128xf32>
    %422 = arith.truncf %420 : vector<2x32xf32> to vector<2x32xbf16>
    %cst_113 = arith.constant dense<0.000000e+00> : vector<2x128xf32>
    %423 = tpu.matmul %422, %372, %cst_113 {dimension_numbers = #tpu.dot_dimension_numbers<[1], [0], [0], [1], [0, 0, 1, 1], [], []>} : vector<2x32xbf16>, vector<32x128xbf16>, vector<2x128xf32> -> vector<2x128xf32>
    %424 = arith.addf %421, %423 : vector<2x128xf32>
    %425 = arith.negf %424 : vector<2x128xf32>
    %426 = math.exp %425 : vector<2x128xf32>
    %cst_114 = arith.constant 1.000000e+00 : f32
    %427 = vector.broadcast %cst_114 : f32 to vector<2x128xf32>
    %428 = arith.addf %427, %426 : vector<2x128xf32>
    %429 = arith.divf %427, %428 : vector<2x128xf32>
    %430 = vector.extract_strided_slice %429 {offsets = [0, 0], sizes = [2, 32], strides = [1, 1]} : vector<2x128xf32> to vector<2x32xf32>
    %431 = vector.extract_strided_slice %429 {offsets = [0, 32], sizes = [2, 32], strides = [1, 1]} : vector<2x128xf32> to vector<2x32xf32>
    %432 = vector.extract_strided_slice %429 {offsets = [0, 96], sizes = [2, 32], strides = [1, 1]} : vector<2x128xf32> to vector<2x32xf32>
    %433 = vector.extract_strided_slice %424 {offsets = [0, 64], sizes = [2, 32], strides = [1, 1]} : vector<2x128xf32> to vector<2x32xf32>
    %434 = math.tanh %433 : vector<2x32xf32>
    %435 = arith.mulf %431, %418 : vector<2x32xf32>
    %436 = arith.mulf %430, %434 : vector<2x32xf32>
    %437 = arith.addf %435, %436 : vector<2x32xf32>
    %438 = math.tanh %437 : vector<2x32xf32>
    %439 = arith.mulf %432, %438 : vector<2x32xf32>
    %440 = vector.extract_strided_slice %380 {offsets = [6, 0], sizes = [2, 128], strides = [1, 1]} : vector<16x128xf32> to vector<2x128xf32>
    %441 = arith.truncf %439 : vector<2x32xf32> to vector<2x32xbf16>
    %cst_115 = arith.constant dense<0.000000e+00> : vector<2x128xf32>
    %442 = tpu.matmul %441, %372, %cst_115 {dimension_numbers = #tpu.dot_dimension_numbers<[1], [0], [0], [1], [0, 0, 1, 1], [], []>} : vector<2x32xbf16>, vector<32x128xbf16>, vector<2x128xf32> -> vector<2x128xf32>
    %443 = arith.addf %440, %442 : vector<2x128xf32>
    %444 = arith.negf %443 : vector<2x128xf32>
    %445 = math.exp %444 : vector<2x128xf32>
    %cst_116 = arith.constant 1.000000e+00 : f32
    %446 = vector.broadcast %cst_116 : f32 to vector<2x128xf32>
    %447 = arith.addf %446, %445 : vector<2x128xf32>
    %448 = arith.divf %446, %447 : vector<2x128xf32>
    %449 = vector.extract_strided_slice %448 {offsets = [0, 0], sizes = [2, 32], strides = [1, 1]} : vector<2x128xf32> to vector<2x32xf32>
    %450 = vector.extract_strided_slice %448 {offsets = [0, 32], sizes = [2, 32], strides = [1, 1]} : vector<2x128xf32> to vector<2x32xf32>
    %451 = vector.extract_strided_slice %448 {offsets = [0, 96], sizes = [2, 32], strides = [1, 1]} : vector<2x128xf32> to vector<2x32xf32>
    %452 = vector.extract_strided_slice %443 {offsets = [0, 64], sizes = [2, 32], strides = [1, 1]} : vector<2x128xf32> to vector<2x32xf32>
    %453 = math.tanh %452 : vector<2x32xf32>
    %454 = arith.mulf %450, %437 : vector<2x32xf32>
    %455 = arith.mulf %449, %453 : vector<2x32xf32>
    %456 = arith.addf %454, %455 : vector<2x32xf32>
    %457 = math.tanh %456 : vector<2x32xf32>
    %458 = arith.mulf %451, %457 : vector<2x32xf32>
    %459 = vector.extract_strided_slice %380 {offsets = [8, 0], sizes = [2, 128], strides = [1, 1]} : vector<16x128xf32> to vector<2x128xf32>
    %460 = arith.truncf %458 : vector<2x32xf32> to vector<2x32xbf16>
    %cst_117 = arith.constant dense<0.000000e+00> : vector<2x128xf32>
    %461 = tpu.matmul %460, %372, %cst_117 {dimension_numbers = #tpu.dot_dimension_numbers<[1], [0], [0], [1], [0, 0, 1, 1], [], []>} : vector<2x32xbf16>, vector<32x128xbf16>, vector<2x128xf32> -> vector<2x128xf32>
    %462 = arith.addf %459, %461 : vector<2x128xf32>
    %463 = arith.negf %462 : vector<2x128xf32>
    %464 = math.exp %463 : vector<2x128xf32>
    %cst_118 = arith.constant 1.000000e+00 : f32
    %465 = vector.broadcast %cst_118 : f32 to vector<2x128xf32>
    %466 = arith.addf %465, %464 : vector<2x128xf32>
    %467 = arith.divf %465, %466 : vector<2x128xf32>
    %468 = vector.extract_strided_slice %467 {offsets = [0, 0], sizes = [2, 32], strides = [1, 1]} : vector<2x128xf32> to vector<2x32xf32>
    %469 = vector.extract_strided_slice %467 {offsets = [0, 32], sizes = [2, 32], strides = [1, 1]} : vector<2x128xf32> to vector<2x32xf32>
    %470 = vector.extract_strided_slice %467 {offsets = [0, 96], sizes = [2, 32], strides = [1, 1]} : vector<2x128xf32> to vector<2x32xf32>
    %471 = vector.extract_strided_slice %462 {offsets = [0, 64], sizes = [2, 32], strides = [1, 1]} : vector<2x128xf32> to vector<2x32xf32>
    %472 = math.tanh %471 : vector<2x32xf32>
    %473 = arith.mulf %469, %456 : vector<2x32xf32>
    %474 = arith.mulf %468, %472 : vector<2x32xf32>
    %475 = arith.addf %473, %474 : vector<2x32xf32>
    %476 = math.tanh %475 : vector<2x32xf32>
    %477 = arith.mulf %470, %476 : vector<2x32xf32>
    %478 = vector.extract_strided_slice %380 {offsets = [10, 0], sizes = [2, 128], strides = [1, 1]} : vector<16x128xf32> to vector<2x128xf32>
    %479 = arith.truncf %477 : vector<2x32xf32> to vector<2x32xbf16>
    %cst_119 = arith.constant dense<0.000000e+00> : vector<2x128xf32>
    %480 = tpu.matmul %479, %372, %cst_119 {dimension_numbers = #tpu.dot_dimension_numbers<[1], [0], [0], [1], [0, 0, 1, 1], [], []>} : vector<2x32xbf16>, vector<32x128xbf16>, vector<2x128xf32> -> vector<2x128xf32>
    %481 = arith.addf %478, %480 : vector<2x128xf32>
    %482 = arith.negf %481 : vector<2x128xf32>
    %483 = math.exp %482 : vector<2x128xf32>
    %cst_120 = arith.constant 1.000000e+00 : f32
    %484 = vector.broadcast %cst_120 : f32 to vector<2x128xf32>
    %485 = arith.addf %484, %483 : vector<2x128xf32>
    %486 = arith.divf %484, %485 : vector<2x128xf32>
    %487 = vector.extract_strided_slice %486 {offsets = [0, 0], sizes = [2, 32], strides = [1, 1]} : vector<2x128xf32> to vector<2x32xf32>
    %488 = vector.extract_strided_slice %486 {offsets = [0, 32], sizes = [2, 32], strides = [1, 1]} : vector<2x128xf32> to vector<2x32xf32>
    %489 = vector.extract_strided_slice %486 {offsets = [0, 96], sizes = [2, 32], strides = [1, 1]} : vector<2x128xf32> to vector<2x32xf32>
    %490 = vector.extract_strided_slice %481 {offsets = [0, 64], sizes = [2, 32], strides = [1, 1]} : vector<2x128xf32> to vector<2x32xf32>
    %491 = math.tanh %490 : vector<2x32xf32>
    %492 = arith.mulf %488, %475 : vector<2x32xf32>
    %493 = arith.mulf %487, %491 : vector<2x32xf32>
    %494 = arith.addf %492, %493 : vector<2x32xf32>
    %495 = math.tanh %494 : vector<2x32xf32>
    %496 = arith.mulf %489, %495 : vector<2x32xf32>
    %497 = vector.extract_strided_slice %380 {offsets = [12, 0], sizes = [2, 128], strides = [1, 1]} : vector<16x128xf32> to vector<2x128xf32>
    %498 = arith.truncf %496 : vector<2x32xf32> to vector<2x32xbf16>
    %cst_121 = arith.constant dense<0.000000e+00> : vector<2x128xf32>
    %499 = tpu.matmul %498, %372, %cst_121 {dimension_numbers = #tpu.dot_dimension_numbers<[1], [0], [0], [1], [0, 0, 1, 1], [], []>} : vector<2x32xbf16>, vector<32x128xbf16>, vector<2x128xf32> -> vector<2x128xf32>
    %500 = arith.addf %497, %499 : vector<2x128xf32>
    %501 = arith.negf %500 : vector<2x128xf32>
    %502 = math.exp %501 : vector<2x128xf32>
    %cst_122 = arith.constant 1.000000e+00 : f32
    %503 = vector.broadcast %cst_122 : f32 to vector<2x128xf32>
    %504 = arith.addf %503, %502 : vector<2x128xf32>
    %505 = arith.divf %503, %504 : vector<2x128xf32>
    %506 = vector.extract_strided_slice %505 {offsets = [0, 0], sizes = [2, 32], strides = [1, 1]} : vector<2x128xf32> to vector<2x32xf32>
    %507 = vector.extract_strided_slice %505 {offsets = [0, 32], sizes = [2, 32], strides = [1, 1]} : vector<2x128xf32> to vector<2x32xf32>
    %508 = vector.extract_strided_slice %505 {offsets = [0, 96], sizes = [2, 32], strides = [1, 1]} : vector<2x128xf32> to vector<2x32xf32>
    %509 = vector.extract_strided_slice %500 {offsets = [0, 64], sizes = [2, 32], strides = [1, 1]} : vector<2x128xf32> to vector<2x32xf32>
    %510 = math.tanh %509 : vector<2x32xf32>
    %511 = arith.mulf %507, %494 : vector<2x32xf32>
    %512 = arith.mulf %506, %510 : vector<2x32xf32>
    %513 = arith.addf %511, %512 : vector<2x32xf32>
    %514 = math.tanh %513 : vector<2x32xf32>
    %515 = arith.mulf %508, %514 : vector<2x32xf32>
    %516 = vector.extract_strided_slice %380 {offsets = [14, 0], sizes = [2, 128], strides = [1, 1]} : vector<16x128xf32> to vector<2x128xf32>
    %517 = arith.truncf %515 : vector<2x32xf32> to vector<2x32xbf16>
    %cst_123 = arith.constant dense<0.000000e+00> : vector<2x128xf32>
    %518 = tpu.matmul %517, %372, %cst_123 {dimension_numbers = #tpu.dot_dimension_numbers<[1], [0], [0], [1], [0, 0, 1, 1], [], []>} : vector<2x32xbf16>, vector<32x128xbf16>, vector<2x128xf32> -> vector<2x128xf32>
    %519 = arith.addf %516, %518 : vector<2x128xf32>
    %520 = arith.negf %519 : vector<2x128xf32>
    %521 = math.exp %520 : vector<2x128xf32>
    %cst_124 = arith.constant 1.000000e+00 : f32
    %522 = vector.broadcast %cst_124 : f32 to vector<2x128xf32>
    %523 = arith.addf %522, %521 : vector<2x128xf32>
    %524 = arith.divf %522, %523 : vector<2x128xf32>
    %525 = vector.extract_strided_slice %524 {offsets = [0, 0], sizes = [2, 32], strides = [1, 1]} : vector<2x128xf32> to vector<2x32xf32>
    %526 = vector.extract_strided_slice %524 {offsets = [0, 32], sizes = [2, 32], strides = [1, 1]} : vector<2x128xf32> to vector<2x32xf32>
    %527 = vector.extract_strided_slice %524 {offsets = [0, 96], sizes = [2, 32], strides = [1, 1]} : vector<2x128xf32> to vector<2x32xf32>
    %528 = vector.extract_strided_slice %519 {offsets = [0, 64], sizes = [2, 32], strides = [1, 1]} : vector<2x128xf32> to vector<2x32xf32>
    %529 = math.tanh %528 : vector<2x32xf32>
    %530 = arith.mulf %526, %513 : vector<2x32xf32>
    %531 = arith.mulf %525, %529 : vector<2x32xf32>
    %532 = arith.addf %530, %531 : vector<2x32xf32>
    %533 = math.tanh %532 : vector<2x32xf32>
    %534 = arith.mulf %527, %533 : vector<2x32xf32>
    %c0_125 = arith.constant 0 : index
    %c0_126 = arith.constant 0 : index
    %535 = vector.load %arg9[%c0_125, %c0_126] : memref<1x32xf32, #tpu.memory_space<vmem>>, vector<1x32xf32>
    %536 = vector.broadcast %535 : vector<1x32xf32> to vector<2x32xf32>
    %537 = arith.mulf %401, %536 : vector<2x32xf32>
    %cst_127 = arith.constant dense<0.000000e+00> : vector<2xf32>
    %538 = vector.multi_reduction <add>, %537, %cst_127 [1] : vector<2x32xf32> to vector<2xf32>
    %539 = vector.shape_cast %538 : vector<2xf32> to vector<2x1xf32>
    %c0_128 = arith.constant 0 : index
    %c0_129 = arith.constant 0 : index
    %540 = vector.load %arg10[%c0_128, %c0_129] : memref<1x1xf32, #tpu.memory_space<vmem>>, vector<1x1xf32>
    %541 = vector.broadcast %540 : vector<1x1xf32> to vector<2x1xf32>
    %542 = arith.addf %539, %541 : vector<2x1xf32>
    %543 = vector.broadcast %535 : vector<1x32xf32> to vector<2x32xf32>
    %544 = arith.mulf %420, %543 : vector<2x32xf32>
    %cst_130 = arith.constant dense<0.000000e+00> : vector<2xf32>
    %545 = vector.multi_reduction <add>, %544, %cst_130 [1] : vector<2x32xf32> to vector<2xf32>
    %546 = vector.shape_cast %545 : vector<2xf32> to vector<2x1xf32>
    %c0_131 = arith.constant 0 : index
    %c0_132 = arith.constant 0 : index
    %547 = vector.load %arg10[%c0_131, %c0_132] : memref<1x1xf32, #tpu.memory_space<vmem>>, vector<1x1xf32>
    %548 = vector.broadcast %547 : vector<1x1xf32> to vector<2x1xf32>
    %549 = arith.addf %546, %548 : vector<2x1xf32>
    %550 = vector.broadcast %535 : vector<1x32xf32> to vector<2x32xf32>
    %551 = arith.mulf %439, %550 : vector<2x32xf32>
    %cst_133 = arith.constant dense<0.000000e+00> : vector<2xf32>
    %552 = vector.multi_reduction <add>, %551, %cst_133 [1] : vector<2x32xf32> to vector<2xf32>
    %553 = vector.shape_cast %552 : vector<2xf32> to vector<2x1xf32>
    %c0_134 = arith.constant 0 : index
    %c0_135 = arith.constant 0 : index
    %554 = vector.load %arg10[%c0_134, %c0_135] : memref<1x1xf32, #tpu.memory_space<vmem>>, vector<1x1xf32>
    %555 = vector.broadcast %554 : vector<1x1xf32> to vector<2x1xf32>
    %556 = arith.addf %553, %555 : vector<2x1xf32>
    %557 = vector.broadcast %535 : vector<1x32xf32> to vector<2x32xf32>
    %558 = arith.mulf %458, %557 : vector<2x32xf32>
    %cst_136 = arith.constant dense<0.000000e+00> : vector<2xf32>
    %559 = vector.multi_reduction <add>, %558, %cst_136 [1] : vector<2x32xf32> to vector<2xf32>
    %560 = vector.shape_cast %559 : vector<2xf32> to vector<2x1xf32>
    %c0_137 = arith.constant 0 : index
    %c0_138 = arith.constant 0 : index
    %561 = vector.load %arg10[%c0_137, %c0_138] : memref<1x1xf32, #tpu.memory_space<vmem>>, vector<1x1xf32>
    %562 = vector.broadcast %561 : vector<1x1xf32> to vector<2x1xf32>
    %563 = arith.addf %560, %562 : vector<2x1xf32>
    %564 = vector.broadcast %535 : vector<1x32xf32> to vector<2x32xf32>
    %565 = arith.mulf %477, %564 : vector<2x32xf32>
    %cst_139 = arith.constant dense<0.000000e+00> : vector<2xf32>
    %566 = vector.multi_reduction <add>, %565, %cst_139 [1] : vector<2x32xf32> to vector<2xf32>
    %567 = vector.shape_cast %566 : vector<2xf32> to vector<2x1xf32>
    %c0_140 = arith.constant 0 : index
    %c0_141 = arith.constant 0 : index
    %568 = vector.load %arg10[%c0_140, %c0_141] : memref<1x1xf32, #tpu.memory_space<vmem>>, vector<1x1xf32>
    %569 = vector.broadcast %568 : vector<1x1xf32> to vector<2x1xf32>
    %570 = arith.addf %567, %569 : vector<2x1xf32>
    %571 = vector.broadcast %535 : vector<1x32xf32> to vector<2x32xf32>
    %572 = arith.mulf %496, %571 : vector<2x32xf32>
    %cst_142 = arith.constant dense<0.000000e+00> : vector<2xf32>
    %573 = vector.multi_reduction <add>, %572, %cst_142 [1] : vector<2x32xf32> to vector<2xf32>
    %574 = vector.shape_cast %573 : vector<2xf32> to vector<2x1xf32>
    %c0_143 = arith.constant 0 : index
    %c0_144 = arith.constant 0 : index
    %575 = vector.load %arg10[%c0_143, %c0_144] : memref<1x1xf32, #tpu.memory_space<vmem>>, vector<1x1xf32>
    %576 = vector.broadcast %575 : vector<1x1xf32> to vector<2x1xf32>
    %577 = arith.addf %574, %576 : vector<2x1xf32>
    %578 = vector.broadcast %535 : vector<1x32xf32> to vector<2x32xf32>
    %579 = arith.mulf %515, %578 : vector<2x32xf32>
    %cst_145 = arith.constant dense<0.000000e+00> : vector<2xf32>
    %580 = vector.multi_reduction <add>, %579, %cst_145 [1] : vector<2x32xf32> to vector<2xf32>
    %581 = vector.shape_cast %580 : vector<2xf32> to vector<2x1xf32>
    %c0_146 = arith.constant 0 : index
    %c0_147 = arith.constant 0 : index
    %582 = vector.load %arg10[%c0_146, %c0_147] : memref<1x1xf32, #tpu.memory_space<vmem>>, vector<1x1xf32>
    %583 = vector.broadcast %582 : vector<1x1xf32> to vector<2x1xf32>
    %584 = arith.addf %581, %583 : vector<2x1xf32>
    %585 = vector.broadcast %535 : vector<1x32xf32> to vector<2x32xf32>
    %586 = arith.mulf %534, %585 : vector<2x32xf32>
    %cst_148 = arith.constant dense<0.000000e+00> : vector<2xf32>
    %587 = vector.multi_reduction <add>, %586, %cst_148 [1] : vector<2x32xf32> to vector<2xf32>
    %588 = vector.shape_cast %587 : vector<2xf32> to vector<2x1xf32>
    %c0_149 = arith.constant 0 : index
    %c0_150 = arith.constant 0 : index
    %589 = vector.load %arg10[%c0_149, %c0_150] : memref<1x1xf32, #tpu.memory_space<vmem>>, vector<1x1xf32>
    %590 = vector.broadcast %589 : vector<1x1xf32> to vector<2x1xf32>
    %591 = arith.addf %588, %590 : vector<2x1xf32>
    %cst_151 = arith.constant 0.000000e+00 : f32
    %592 = vector.broadcast %cst_151 : f32 to vector<2x1xf32>
    %593 = arith.cmpf ogt, %17, %592 : vector<2x1xf32>
    %cst_152 = arith.constant -1.000000e+30 : f32
    %594 = vector.broadcast %cst_152 : f32 to vector<2x1xf32>
    %595 = arith.select %593, %542, %594 : vector<2x1xi1>, vector<2x1xf32>
    %cst_153 = arith.constant 0.000000e+00 : f32
    %596 = vector.broadcast %cst_153 : f32 to vector<2x1xf32>
    %597 = arith.cmpf ogt, %18, %596 : vector<2x1xf32>
    %cst_154 = arith.constant -1.000000e+30 : f32
    %598 = vector.broadcast %cst_154 : f32 to vector<2x1xf32>
    %599 = arith.select %597, %549, %598 : vector<2x1xi1>, vector<2x1xf32>
    %cst_155 = arith.constant 0.000000e+00 : f32
    %600 = vector.broadcast %cst_155 : f32 to vector<2x1xf32>
    %601 = arith.cmpf ogt, %19, %600 : vector<2x1xf32>
    %cst_156 = arith.constant -1.000000e+30 : f32
    %602 = vector.broadcast %cst_156 : f32 to vector<2x1xf32>
    %603 = arith.select %601, %556, %602 : vector<2x1xi1>, vector<2x1xf32>
    %cst_157 = arith.constant 0.000000e+00 : f32
    %604 = vector.broadcast %cst_157 : f32 to vector<2x1xf32>
    %605 = arith.cmpf ogt, %20, %604 : vector<2x1xf32>
    %cst_158 = arith.constant -1.000000e+30 : f32
    %606 = vector.broadcast %cst_158 : f32 to vector<2x1xf32>
    %607 = arith.select %605, %563, %606 : vector<2x1xi1>, vector<2x1xf32>
    %cst_159 = arith.constant 0.000000e+00 : f32
    %608 = vector.broadcast %cst_159 : f32 to vector<2x1xf32>
    %609 = arith.cmpf ogt, %21, %608 : vector<2x1xf32>
    %cst_160 = arith.constant -1.000000e+30 : f32
    %610 = vector.broadcast %cst_160 : f32 to vector<2x1xf32>
    %611 = arith.select %609, %570, %610 : vector<2x1xi1>, vector<2x1xf32>
    %cst_161 = arith.constant 0.000000e+00 : f32
    %612 = vector.broadcast %cst_161 : f32 to vector<2x1xf32>
    %613 = arith.cmpf ogt, %22, %612 : vector<2x1xf32>
    %cst_162 = arith.constant -1.000000e+30 : f32
    %614 = vector.broadcast %cst_162 : f32 to vector<2x1xf32>
    %615 = arith.select %613, %577, %614 : vector<2x1xi1>, vector<2x1xf32>
    %cst_163 = arith.constant 0.000000e+00 : f32
    %616 = vector.broadcast %cst_163 : f32 to vector<2x1xf32>
    %617 = arith.cmpf ogt, %23, %616 : vector<2x1xf32>
    %cst_164 = arith.constant -1.000000e+30 : f32
    %618 = vector.broadcast %cst_164 : f32 to vector<2x1xf32>
    %619 = arith.select %617, %584, %618 : vector<2x1xi1>, vector<2x1xf32>
    %cst_165 = arith.constant 0.000000e+00 : f32
    %620 = vector.broadcast %cst_165 : f32 to vector<2x1xf32>
    %621 = arith.cmpf ogt, %24, %620 : vector<2x1xf32>
    %cst_166 = arith.constant -1.000000e+30 : f32
    %622 = vector.broadcast %cst_166 : f32 to vector<2x1xf32>
    %623 = arith.select %621, %591, %622 : vector<2x1xi1>, vector<2x1xf32>
    %624 = arith.maximumf %595, %599 : vector<2x1xf32>
    %625 = arith.maximumf %624, %603 : vector<2x1xf32>
    %626 = arith.maximumf %625, %607 : vector<2x1xf32>
    %627 = arith.maximumf %626, %611 : vector<2x1xf32>
    %628 = arith.maximumf %627, %615 : vector<2x1xf32>
    %629 = arith.maximumf %628, %619 : vector<2x1xf32>
    %630 = arith.maximumf %629, %623 : vector<2x1xf32>
    %cst_167 = arith.constant 0.000000e+00 : f32
    %631 = vector.broadcast %cst_167 : f32 to vector<2x1xf32>
    %cst_168 = arith.constant 0.000000e+00 : f32
    %632 = vector.broadcast %cst_168 : f32 to vector<2x32xf32>
    %633 = arith.subf %595, %630 : vector<2x1xf32>
    %634 = math.exp %633 : vector<2x1xf32>
    %635 = arith.addf %631, %634 : vector<2x1xf32>
    %636 = vector.broadcast %634 : vector<2x1xf32> to vector<2x32xf32>
    %637 = arith.mulf %636, %401 : vector<2x32xf32>
    %638 = arith.addf %632, %637 : vector<2x32xf32>
    %639 = arith.subf %599, %630 : vector<2x1xf32>
    %640 = math.exp %639 : vector<2x1xf32>
    %641 = arith.addf %635, %640 : vector<2x1xf32>
    %642 = vector.broadcast %640 : vector<2x1xf32> to vector<2x32xf32>
    %643 = arith.mulf %642, %420 : vector<2x32xf32>
    %644 = arith.addf %638, %643 : vector<2x32xf32>
    %645 = arith.subf %603, %630 : vector<2x1xf32>
    %646 = math.exp %645 : vector<2x1xf32>
    %647 = arith.addf %641, %646 : vector<2x1xf32>
    %648 = vector.broadcast %646 : vector<2x1xf32> to vector<2x32xf32>
    %649 = arith.mulf %648, %439 : vector<2x32xf32>
    %650 = arith.addf %644, %649 : vector<2x32xf32>
    %651 = arith.subf %607, %630 : vector<2x1xf32>
    %652 = math.exp %651 : vector<2x1xf32>
    %653 = arith.addf %647, %652 : vector<2x1xf32>
    %654 = vector.broadcast %652 : vector<2x1xf32> to vector<2x32xf32>
    %655 = arith.mulf %654, %458 : vector<2x32xf32>
    %656 = arith.addf %650, %655 : vector<2x32xf32>
    %657 = arith.subf %611, %630 : vector<2x1xf32>
    %658 = math.exp %657 : vector<2x1xf32>
    %659 = arith.addf %653, %658 : vector<2x1xf32>
    %660 = vector.broadcast %658 : vector<2x1xf32> to vector<2x32xf32>
    %661 = arith.mulf %660, %477 : vector<2x32xf32>
    %662 = arith.addf %656, %661 : vector<2x32xf32>
    %663 = arith.subf %615, %630 : vector<2x1xf32>
    %664 = math.exp %663 : vector<2x1xf32>
    %665 = arith.addf %659, %664 : vector<2x1xf32>
    %666 = vector.broadcast %664 : vector<2x1xf32> to vector<2x32xf32>
    %667 = arith.mulf %666, %496 : vector<2x32xf32>
    %668 = arith.addf %662, %667 : vector<2x32xf32>
    %669 = arith.subf %619, %630 : vector<2x1xf32>
    %670 = math.exp %669 : vector<2x1xf32>
    %671 = arith.addf %665, %670 : vector<2x1xf32>
    %672 = vector.broadcast %670 : vector<2x1xf32> to vector<2x32xf32>
    %673 = arith.mulf %672, %515 : vector<2x32xf32>
    %674 = arith.addf %668, %673 : vector<2x32xf32>
    %675 = arith.subf %623, %630 : vector<2x1xf32>
    %676 = math.exp %675 : vector<2x1xf32>
    %677 = arith.addf %671, %676 : vector<2x1xf32>
    %678 = vector.broadcast %676 : vector<2x1xf32> to vector<2x32xf32>
    %679 = arith.mulf %678, %534 : vector<2x32xf32>
    %680 = arith.addf %674, %679 : vector<2x32xf32>
    %681 = tpu.reciprocal %677 {approx = true} : vector<2x1xf32> -> vector<2x1xf32>
    %682 = vector.broadcast %681 : vector<2x1xf32> to vector<2x32xf32>
    %683 = arith.mulf %680, %682 : vector<2x32xf32>
    %c0_169 = arith.constant 0 : index
    %c0_170 = arith.constant 0 : index
    %684 = vector.load %arg13[%c0_169, %c0_170] : memref<2x32xf32, #tpu.memory_space<vmem>>, vector<2x32xf32>
    tpu.vector_store %arg13[%c0_169, %c0_170], %683 {strides = array<i32>} : memref<2x32xf32, #tpu.memory_space<vmem>>, vector<2x32xf32>,
    %685 = arith.truncf %683 : vector<2x32xf32> to vector<2x32xbf16>
    %c0_171 = arith.constant 0 : index
    %c0_172 = arith.constant 0 : index
    %686 = vector.load %arg11[%c0_171, %c0_172] : memref<32x4xbf16, #tpu.memory_space<vmem>>, vector<32x4xbf16>
    %cst_173 = arith.constant dense<0.000000e+00> : vector<2x4xf32>
    %687 = tpu.matmul %685, %686, %cst_173 {dimension_numbers = #tpu.dot_dimension_numbers<[1], [0], [0], [1], [0, 0, 1, 1], [], []>} : vector<2x32xbf16>, vector<32x4xbf16>, vector<2x4xf32> -> vector<2x4xf32>
    %c0_174 = arith.constant 0 : index
    %c0_175 = arith.constant 0 : index
    %688 = vector.load %arg12[%c0_174, %c0_175] : memref<1x4xf32, #tpu.memory_space<vmem>>, vector<1x4xf32>
    %689 = vector.broadcast %688 : vector<1x4xf32> to vector<2x4xf32>
    %690 = arith.addf %687, %689 : vector<2x4xf32>
    %c0_176 = arith.constant 0 : index
    %c0_177 = arith.constant 0 : index
    %691 = vector.load %arg14[%c0_176, %c0_177] : memref<2x4xf32, #tpu.memory_space<vmem>>, vector<2x4xf32>
    tpu.vector_store %arg14[%c0_176, %c0_177], %690 {strides = array<i32>} : memref<2x4xf32, #tpu.memory_space<vmem>>, vector<2x4xf32>,
    return
  }
}

</mosaic_0001>

<bundles_post_ra>
// kernel: forward.1
= control target key start
LH: loop header
LB: loop body
LE: loop exit
PB: predicated region body
PF: predicated region fallthrough
CT: control target
= control target key end

     0   :  { %s3279_s0 = inlined_call_operand.vmem [shape: bf16[16,128], index: 0, kind: input, shape index: {}]   ;;  %s3280_s1 = inlined_call_operand.vmem [shape: f32[16,1], index: 1, kind: input, shape index: {}]   ;;  %s3281_s2 = inlined_call_operand.vmem [shape: bf16[128,16], index: 2, kind: input, shape index: {}]   ;;  %s3282_s3 = inlined_call_operand.vmem [shape: f32[1,16], index: 3, kind: input, shape index: {}]   ;;  %s3283_s4 = inlined_call_operand.vmem [shape: bf16[16,32], index: 4, kind: input, shape index: {}]   ;;  %s3284_s5 = inlined_call_operand.vmem [shape: f32[1,32], index: 5, kind: input, shape index: {}]   ;;  %s3285_s6 = inlined_call_operand.vmem [shape: bf16[3,32,128], index: 6, kind: input, shape index: {}]   ;;  %s3286_s7 = inlined_call_operand.vmem [shape: bf16[3,32,128], index: 7, kind: input, shape index: {}]   ;;  %s3287_s8 = inlined_call_operand.vmem [shape: f32[3,1,128], index: 8, kind: input, shape index: {}]   ;;  %s3288_s9 = inlined_call_operand.vmem [shape: f32[1,32], index: 9, kind: input, shape index: {}]   ;;  %s3289_s10 = inlined_call_operand.<no memory space> [shape: f32[1,1], index: 10, kind: input, shape index: {}]   ;;  %s3290_s11 = inlined_call_operand.vmem [shape: bf16[32,4], index: 11, kind: input, shape index: {}]   ;;  %s3291_s12 = inlined_call_operand.vmem [shape: f32[1,4], index: 12, kind: input, shape index: {}]   ;;  %s3292_s13 = inlined_call_operand.hbm [shape: f32[2,32], index: 13, kind: output, shape index: {0}]   ;;  %s3293_s14 = inlined_call_operand.hbm [shape: f32[2,4], index: 14, kind: output, shape index: {1}]  }
   0x1   :  { %v20_v0 = vstv %s3289_s10 }
   0x2   :  { %21 = vst [vmem:[#allocation3] sm:$0x1] %v20_v0 }
   0x3   :  { %22 = vsyncpa [#allocation5], 0  ;;  %v2451_v1 = vld [vmem:[%s3281_s2 + $0x38] sm:$0xff]  ;;  %v2450_v2 = vld [vmem:[%s3281_s2 + $0x30] sm:$0xff] }
   0x4   :  { %127 = vmatpush.bf16.msra.mxu0 %v2451_v1  ;;  %v2449_v3 = vld [vmem:[%s3281_s2 + $0x28] sm:$0xff] }
   0x8   :  { %128 = vmatpush.bf16.msra.mxu0 %v2450_v2 }
   0x9   :  { %23 = vsyncpa [#allocation7], 0  ;;  %v2448_v4 = vld [vmem:[%s3281_s2 + $0x20] sm:$0xff]  ;;  %v2447_v5 = vld [vmem:[%s3281_s2 + $0x18] sm:$0xff]  ;;  %v2748_v12 = vmov 0   ;;  %vm156_vm0 = vcmask 130048  }
   0xa   :  { %v2446_v6 = vld [vmem:[%s3281_s2 + $0x10] sm:$0xff]  ;;  %v2445_v7 = vld [vmem:[%s3281_s2 + $0x8] sm:$0xff]  ;;  %v2444_v8 = vld [vmem:[%s3281_s2] sm:$0xff]  ;;  %2473 = vset.pattern.permute.xlu0 %v2748_v12  ;;  %2474 = vset.pattern.permute.xlu2 %v2748_v12  ;;  %vm213_vm1 = vcmask 261120   ;;  %s2750_s15 = smov 32   ;;  %s2751_s30 = smov 96  }
   0xb   :  { %v2443_v9 = vld [vmem:[%s3279_s0] sm:$0xff]  ;;  %2475 = vset.pattern.permute.xlu1 %v2748_v12  ;;  %v175_v13 = vld [vmem:[%s3280_s1 + $0x8] sm:$0xff]  ;;  %s2752_s20 = smov [#allocation4]   ;;  %s2265_s25 = sshll.u32 %s3293_s14, 4  ;;  %s2266_s25 = int_to_ptr.hbm [resolvable:$true] %s2265_s25 }
   0xc   :  { %129 = vmatpush.bf16.msra.mxu0 %v2449_v3  ;;  %v2452_v10 = vld [vmem:[%s3283_s4] sm:$0xff]  ;;  %v2454_v22 = vld [vmem:[%s3286_s7 + $0x8] sm:$0xff]  ;;  %s2254_s4 = sshll.u32 %s3292_s13, 4  ;;  %s2252_s21 = sshll.u32 %s2752_s20, 4  ;;  %s2255_s4 = int_to_ptr.hbm [resolvable:$true] %s2254_s4  ;;  %s2253_s21 = int_to_ptr.vmem [resolvable:$true] %s2252_s21 }
   0xd   :  { %167 = vmatpush.bf16.msra.mxu1 %v2452_v10  ;;  %v174_v11 = vld [vmem:[%s3280_s1] sm:$0xff]  ;;  %252 = vmatpush.bf16.msra.mxu3 %v2454_v22  ;;  %v2456_v24 = vld [vmem:[%s3285_s6 + $0x8] sm:$0xff] }
   0xe   :  { %178 = vperm.xlu0 %2473, %v174_v11   ;;  %v2476_v15 = vld [vmem:[%s3282_s3] ss:$0 sm:$0xff]  ;;  %223 = vmatpush.bf16.msra.mxu2 %v2456_v24 }
   0xf   :  { %v2453_v23 = vld [vmem:[%s3286_s7] sm:$0xff] }
  0x10   :  { %130 = vmatpush.bf16.msra.mxu0 %v2448_v4  ;;  %v2455_v25 = vld [vmem:[%s3285_s6] sm:$0xff] }
  0x11   :  { %310 = vmatpush.bf16.msrb.mxu1 %v2454_v22  ;;  %253 = vmatpush.bf16.msra.mxu3 %v2453_v23  ;;  %v2477_v28 = vld [vmem:[%s3284_s5] ss:$0 sm:$0xff]  ;;  %s2749_s5 = smov 64  }
  0x12   :  { %224 = vmatpush.bf16.msra.mxu2 %v2455_v25  ;;  %v2894_v38 = vld [vmem:[%s3287_s8] ss:$0 sm:$0xff] }
  0x14   :  { %131 = vmatpush.bf16.msra.mxu0 %v2447_v5  ;;  %254 = vmatmul.bf16.vlgmr.msra.gmra.mxu3 %v2748_v12 }
  0x15   :  { %311 = vmatpush.bf16.msrb.mxu1 %v2453_v23  ;;  %440 = vmatpush.bf16.msrb.mxu3 %v2454_v22 }
  0x16   :  { %183 = vperm.xlu0 %2473, %v175_v13   ;;  %375 = vmatpush.bf16.msrb.mxu2 %v2454_v22 }
  0x18   :  { %132 = vmatpush.bf16.msra.mxu0 %v2446_v6 }
  0x19   :  { %441 = vmatpush.bf16.msrb.mxu3 %v2453_v23 }
  0x1a   :  { %376 = vmatpush.bf16.msrb.mxu2 %v2453_v23 }
  0x1c   :  { %133 = vmatpush.bf16.msra.mxu0 %v2445_v7 }
  0x1d   :  { %631 = vmatpush.bf16.msra.mxu3 %v2454_v22 }
  0x20   :  { %134 = vmatpush.bf16.msra.mxu0 %v2444_v8 }
  0x21   :  { %632 = vmatpush.bf16.msra.mxu3 %v2453_v23 }
  0x23   :  { %135 = vmatmul.bf16.vlgmr.msra.gmra.mxu0 %v2443_v9 }
  0x24   :  { %696 = vmatpush.bf16.msrb.mxu0 %v2454_v22 }
  0x28   :  { %697 = vmatpush.bf16.msrb.mxu0 %v2453_v23 }
  0x80   :  { %v179_v26 = vpop.permute.xlu0 %178 }
  0x88   :  { %v184_v32 = vpop.permute.xlu0 %183 }
  0x97   :  { %v255_v36 = vpop.f32.mrf.mxu3 }
  0x9f   :  { %v257_v37 = vpop.f32.mrf.mxu3 }
  0xa0   :  { %v136_v14 = vpop.f32.mrf.mxu0 }
  0xa1   :  { %v137_v16 = vadd.f32 %v2476_v15, %v136_v14 }
  0xa3   :  { %v141_v19 = vmax.f32 %v137_v16, 0.0 }
  0xa8   :  { %v138_v17 = vpop.f32.mrf.mxu0 }
  0xa9   :  { %v139_v18 = vadd.f32 %v2476_v15, %v138_v17 }
  0xab   :  { %v142_v20 = vmax.f32 %v139_v18, 0.0 }
  0xad   :  { %v143_v21 = vpack.c.bf16 %v142_v20, %v141_v19 }
  0xaf   :  { %2319 = vmatmul.msk.bf16.vlgmr.msra.gmra.mxu1 %vm156_vm0, %v143_v21 }
  0xb0   :  { %505 = vmatpush.bf16.msra.mxu1 %v2454_v22 }
  0xb4   :  { %506 = vmatpush.bf16.msra.mxu1 %v2453_v23 }
 0x12c   :  { %v169_v27 = vpop.f32.mrf.mxu1 }
 0x12d   :  { %v170_v29 = vadd.f32 %v2477_v28, %v169_v27 }
 0x12f   :  { %v186_v33 = vmul.f32 %v179_v26, %v170_v29 }
 0x134   :  { %v171_v30 = vpop.f32.mrf.mxu1 }
 0x135   :  { %v172_v31 = vadd.f32 %v2477_v28, %v171_v30 }
 0x137   :  { %v187_v34 = vmul.f32 %v184_v32, %v172_v31 }
 0x139   :  { %v192_v35 = vpack.c.bf16 %v187_v34, %v186_v33 }
 0x13b   :  { %2328 = vmatmul.msk.bf16.vlgmr.msra.gmra.mxu2 %vm213_vm1, %v192_v35 }
 0x13c   :  { %566 = vmatpush.bf16.msra.mxu2 %v2454_v22 }
 0x140   :  { %567 = vmatpush.bf16.msra.mxu2 %v2453_v23 }
 0x1be   :  { %v226_v39 = vpop.f32.mrf.mxu2 }
 0x1bf   :  { %v2897_v40 = vadd.f32 %v2894_v38, %v226_v39 }
 0x1c1   :  { %v259_v41 = vadd.f32 %v255_v36, %v2897_v40 }
 0x1c3   :  { %2484 = vtanh.f32 %v259_v41  ;;  %v2337_v43 = vmul.f32 -1.442695, %v259_v41 }
 0x1c5   :  { %2486 = vpow2.f32 %v2337_v43 }
 0x1c6   :  { %v2919_v33 = vpop.f32.mrf.mxu2 }
 0x1c9   :  { %v2485_v42 = vpop.eup %2484 }
 0x1ca   :  { %282 = vrot.lane.b32.xlu1 %v2485_v42, %s2749_s5 }
 0x1cb   :  { %v2487_v44 = vpop.eup %2486 }
 0x1cc   :  { %v263_v45 = vadd.f32 1.0, %v2487_v44 }
 0x1ce   :  { %2488 = vrcp.f32 %v263_v45  ;;  %v275_v51 = vand.u32 2147483648, %v263_v45  ;;  %vm269_vm3 = vweird.f32 %v263_v45  ;;  %v273_v52 = vand.u32 2147483647, %v263_v45 }
 0x1d0   :  { %v276_v54 = vor.u32 1.1754944e-38, %v275_v51  ;;  %vm274_vm5 = vcmp.eq.f32.partialorder %v273_v52, 8.507059e+37 }
 0x1d4   :  { %v2489_v46 = vpop.eup %2488 }
 0x1d5   :  { %v265_v47 = vmul.f32 %v2489_v46, %v263_v45  ;;  %vm270_vm2 = vweird.f32 %v2489_v46 }
 0x1d6   :  { %vm271_vm4 = vmor %vm269_vm3, %vm270_vm2 }
 0x1d7   :  { %v266_v48 = vsub.f32 1.0, %v265_v47 }
 0x1d9   :  { %v267_v49 = vmul.f32 %v2489_v46, %v266_v48 }
 0x1db   :  { %v268_v50 = vadd.f32 %v2489_v46, %v267_v49 }
 0x1dd   :  { %v272_v53 = vsel %vm271_vm4, %v2489_v46, %v268_v50 }
 0x1de   :  { %v277_v56 = vsel %vm274_vm5, %v276_v54, %v272_v53 }
 0x1df   :  { %v280_v58 = vmul.f32 0.0, %v277_v56 }
 0x23c   :  { %v283_v55 = vpop.permute.xlu1 %282 }
 0x23d   :  { %v285_v57 = vmul.f32 %v283_v55, %v277_v56 }
 0x23f   :  { %287 = vrot.lane.b32.xlu1 %v285_v57, %s2750_s15 }
 0x2b1   :  { %v288_v59 = vpop.permute.xlu1 %287 }
 0x2b2   :  { %v290_v60 = vadd.f32 %v288_v59, %v280_v58 }
 0x2b4   :  { %2490 = vtanh.f32 %v290_v60  ;;  %v342_v23 = vrot.slane %v290_v60, 6 }
 0x2ba   :  { %v2491_v61 = vpop.eup %2490 }
 0x2bb   :  { %293 = vrot.lane.b32.xlu2 %v2491_v61, %s2749_s5 }
 0x315   :  { %v294_v62 = vpop.permute.xlu2 %293 }
 0x316   :  { %v2903_v63 = vmul.f32 %v294_v62, %v277_v56 }
 0x318   :  { %v297_v0 = vpack.c.bf16 %v2903_v63, %v2903_v63 }
 0x31a   :  { %299 = vrot.lane.b32.xlu2 %v297_v0, %s2750_s15 }
 0x374   :  { %v300_v1 = vpop.permute.xlu2 %299 }
 0x375   :  { %2338 = vmatmul.msk.bf16.vlgmr.msrb.gmra.mxu1 %vm213_vm1, %v300_v1 }
 0x3f2   :  { %v313_v2 = vpop.f32.mrf.mxu1 }
 0x3f3   :  { %v318_v3 = vrot.slane %v313_v2, 6 }
 0x3f5   :  { %v320_v4 = vadd.f32 %v318_v3, %v2897_v40 }
 0x3f7   :  { %2492 = vtanh.f32 %v320_v4  ;;  %v2339_v7 = vmul.f32 -1.442695, %v320_v4 }
 0x3f9   :  { %2494 = vpow2.f32 %v2339_v7 }
 0x3fa   :  { %v315_v5 = vpop.f32.mrf.mxu1 }
 0x3fd   :  { %v2493_v6 = vpop.eup %2492 }
 0x3fe   :  { %346 = vrot.lane.b32.xlu0 %v2493_v6, %s2749_s5 }
 0x3ff   :  { %v2495_v8 = vpop.eup %2494 }
 0x400   :  { %v324_v9 = vadd.f32 1.0, %v2495_v8 }
 0x402   :  { %2496 = vrcp.f32 %v324_v9  ;;  %v336_v16 = vand.u32 2147483648, %v324_v9  ;;  %vm330_vm7 = vweird.f32 %v324_v9  ;;  %v334_v17 = vand.u32 2147483647, %v324_v9 }
 0x404   :  { %v337_v19 = vor.u32 1.1754944e-38, %v336_v16  ;;  %vm335_vm9 = vcmp.eq.f32.partialorder %v334_v17, 8.507059e+37 }
 0x408   :  { %v2497_v10 = vpop.eup %2496 }
 0x409   :  { %v326_v11 = vmul.f32 %v2497_v10, %v324_v9  ;;  %vm331_vm6 = vweird.f32 %v2497_v10 }
 0x40a   :  { %vm332_vm8 = vmor %vm330_vm7, %vm331_vm6 }
 0x40b   :  { %v327_v13 = vsub.f32 1.0, %v326_v11 }
 0x40d   :  { %v328_v14 = vmul.f32 %v2497_v10, %v327_v13 }
 0x40f   :  { %v329_v15 = vadd.f32 %v2497_v10, %v328_v14 }
 0x411   :  { %v333_v18 = vsel %vm332_vm8, %v2497_v10, %v329_v15 }
 0x412   :  { %v338_v21 = vsel %vm335_vm9, %v337_v19, %v333_v18 }
 0x413   :  { %v344_v24 = vmul.f32 %v342_v23, %v338_v21 }
 0x470   :  { %v347_v20 = vpop.permute.xlu0 %346 }
 0x471   :  { %v349_v22 = vmul.f32 %v347_v20, %v338_v21 }
 0x473   :  { %351 = vrot.lane.b32.xlu1 %v349_v22, %s2750_s15 }
 0x4e5   :  { %v352_v25 = vpop.permute.xlu1 %351 }
 0x4e6   :  { %v354_v26 = vadd.f32 %v352_v25, %v344_v24 }
 0x4e8   :  { %2498 = vtanh.f32 %v354_v26  ;;  %v407_v56 = vrot.slane %v354_v26, 6 }
 0x4ee   :  { %v2499_v27 = vpop.eup %2498 }
 0x4ef   :  { %357 = vrot.lane.b32.xlu2 %v2499_v27, %s2749_s5 }
 0x549   :  { %v358_v28 = vpop.permute.xlu2 %357 }
 0x54a   :  { %v2913_v29 = vmul.f32 %v358_v28, %v338_v21 }
 0x54c   :  { %v361_v30 = vpack.c.bf16 %v2913_v29, %v2913_v29 }
 0x54e   :  { %v363_v31 = vrot.slane %v361_v30, 1 }
 0x550   :  { %364 = vrot.lane.b32.xlu0 %v363_v31, %s2750_s15 }
 0x5c2   :  { %v365_v32 = vpop.permute.xlu0 %364 }
 0x5c3   :  { %2340 = vmatmul.msk.bf16.vlgmr.msrb.gmra.mxu2 %vm213_vm1, %v365_v32 }
 0x646   :  { %v378_v34 = vpop.f32.mrf.mxu2 }
 0x647   :  { %v383_v35 = vrot.slane %v378_v34, 4 }
 0x649   :  { %v385_v36 = vadd.f32 %v383_v35, %v2897_v40  ;;  %v2943_v35 = vadd.f32 %v2894_v38, %v2919_v33 }
 0x64b   :  { %2500 = vtanh.f32 %v385_v36  ;;  %v2341_v41 = vmul.f32 -1.442695, %v385_v36 }
 0x64d   :  { %2502 = vpow2.f32 %v2341_v41 }
 0x64e   :  { %v380_v37 = vpop.f32.mrf.mxu2 }
 0x651   :  { %v2501_v39 = vpop.eup %2500 }
 0x652   :  { %411 = vrot.lane.b32.xlu1 %v2501_v39, %s2749_s5 }
 0x653   :  { %v2503_v42 = vpop.eup %2502 }
 0x654   :  { %v389_v43 = vadd.f32 1.0, %v2503_v42 }
 0x656   :  { %2504 = vrcp.f32 %v389_v43  ;;  %v401_v49 = vand.u32 2147483648, %v389_v43  ;;  %vm395_vm11 = vweird.f32 %v389_v43  ;;  %v399_v50 = vand.u32 2147483647, %v389_v43 }
 0x658   :  { %v402_v52 = vor.u32 1.1754944e-38, %v401_v49  ;;  %vm400_vm13 = vcmp.eq.f32.partialorder %v399_v50, 8.507059e+37 }
 0x65c   :  { %v2505_v44 = vpop.eup %2504 }
 0x65d   :  { %v391_v45 = vmul.f32 %v2505_v44, %v389_v43  ;;  %vm396_vm10 = vweird.f32 %v2505_v44 }
 0x65e   :  { %vm397_vm12 = vmor %vm395_vm11, %vm396_vm10 }
 0x65f   :  { %v392_v46 = vsub.f32 1.0, %v391_v45 }
 0x661   :  { %v393_v47 = vmul.f32 %v2505_v44, %v392_v46 }
 0x663   :  { %v394_v48 = vadd.f32 %v2505_v44, %v393_v47 }
 0x665   :  { %v398_v51 = vsel %vm397_vm12, %v2505_v44, %v394_v48 }
 0x666   :  { %v403_v54 = vsel %vm400_vm13, %v402_v52, %v398_v51 }
 0x667   :  { %v409_v57 = vmul.f32 %v407_v56, %v403_v54 }
 0x6c4   :  { %v412_v53 = vpop.permute.xlu1 %411 }
 0x6c5   :  { %v414_v55 = vmul.f32 %v412_v53, %v403_v54 }
 0x6c7   :  { %416 = vrot.lane.b32.xlu2 %v414_v55, %s2750_s15 }
 0x721   :  { %v417_v58 = vpop.permute.xlu2 %416 }
 0x722   :  { %v419_v59 = vadd.f32 %v417_v58, %v409_v57 }
 0x724   :  { %2506 = vtanh.f32 %v419_v59  ;;  %v472_v23 = vrot.slane %v419_v59, 6 }
 0x72a   :  { %v2507_v60 = vpop.eup %2506 }
 0x72b   :  { %422 = vrot.lane.b32.xlu0 %v2507_v60, %s2749_s5 }
 0x79d   :  { %v423_v61 = vpop.permute.xlu0 %422 }
 0x79e   :  { %v2925_v62 = vmul.f32 %v423_v61, %v403_v54 }
 0x7a0   :  { %v426_v0 = vpack.c.bf16 %v2925_v62, %v2925_v62 }
 0x7a2   :  { %v428_v1 = vrot.slane %v426_v0, 2 }
 0x7a4   :  { %429 = vrot.lane.b32.xlu1 %v428_v1, %s2750_s15 }
 0x816   :  { %v430_v2 = vpop.permute.xlu1 %429 }
 0x817   :  { %2342 = vmatmul.msk.bf16.vlgmr.msrb.gmra.mxu3 %vm213_vm1, %v430_v2 }
 0x89a   :  { %v443_v3 = vpop.f32.mrf.mxu3 }
 0x89b   :  { %v448_v4 = vrot.slane %v443_v3, 2 }
 0x89d   :  { %v450_v5 = vadd.f32 %v448_v4, %v2897_v40 }
 0x89f   :  { %2508 = vtanh.f32 %v450_v5  ;;  %v2343_v8 = vmul.f32 -1.442695, %v450_v5 }
 0x8a1   :  { %2510 = vpow2.f32 %v2343_v8 }
 0x8a2   :  { %v445_v6 = vpop.f32.mrf.mxu3 }
 0x8a5   :  { %v2509_v7 = vpop.eup %2508 }
 0x8a6   :  { %476 = vrot.lane.b32.xlu2 %v2509_v7, %s2749_s5 }
 0x8a7   :  { %v2511_v9 = vpop.eup %2510 }
 0x8a8   :  { %v454_v10 = vadd.f32 1.0, %v2511_v9 }
 0x8aa   :  { %2512 = vrcp.f32 %v454_v10  ;;  %v466_v17 = vand.u32 2147483648, %v454_v10  ;;  %vm460_vm15 = vweird.f32 %v454_v10  ;;  %v464_v18 = vand.u32 2147483647, %v454_v10 }
 0x8ac   :  { %v467_v19 = vor.u32 1.1754944e-38, %v466_v17  ;;  %vm465_vm2 = vcmp.eq.f32.partialorder %v464_v18, 8.507059e+37 }
 0x8b0   :  { %v2513_v11 = vpop.eup %2512 }
 0x8b1   :  { %v456_v13 = vmul.f32 %v2513_v11, %v454_v10  ;;  %vm461_vm14 = vweird.f32 %v2513_v11 }
 0x8b2   :  { %vm462_vm0 = vmor %vm460_vm15, %vm461_vm14 }
 0x8b3   :  { %v457_v14 = vsub.f32 1.0, %v456_v13 }
 0x8b5   :  { %v458_v15 = vmul.f32 %v2513_v11, %v457_v14 }
 0x8b7   :  { %v459_v16 = vadd.f32 %v2513_v11, %v458_v15 }
 0x8b9   :  { %v463_v40 = vsel %vm462_vm0, %v2513_v11, %v459_v16 }
 0x8ba   :  { %v468_v21 = vsel %vm465_vm2, %v467_v19, %v463_v40 }
 0x8bb   :  { %v474_v24 = vmul.f32 %v472_v23, %v468_v21 }
 0x900   :  { %v477_v20 = vpop.permute.xlu2 %476 }
 0x901   :  { %v479_v22 = vmul.f32 %v477_v20, %v468_v21 }
 0x903   :  { %481 = vrot.lane.b32.xlu0 %v479_v22, %s2750_s15 }
 0x975   :  { %v482_v25 = vpop.permute.xlu0 %481 }
 0x976   :  { %v484_v26 = vadd.f32 %v482_v25, %v474_v24 }
 0x978   :  { %2514 = vtanh.f32 %v484_v26  ;;  %v534_v55 = vrot.slane %v484_v26, 6 }
 0x97e   :  { %v2515_v27 = vpop.eup %2514 }
 0x97f   :  { %487 = vrot.lane.b32.xlu1 %v2515_v27, %s2749_s5 }
 0x9f1   :  { %v488_v28 = vpop.permute.xlu1 %487 }
 0x9f2   :  { %v2935_v30 = vmul.f32 %v488_v28, %v468_v21 }
 0x9f4   :  { %v491_v31 = vpack.c.bf16 %v2935_v30, %v2935_v30 }
 0x9f6   :  { %v493_v32 = vrot.slane %v491_v31, 3 }
 0x9f8   :  { %494 = vrot.lane.b32.xlu2 %v493_v32, %s2750_s15 }
 0xa52   :  { %v495_v34 = vpop.permute.xlu2 %494 }
 0xa53   :  { %2344 = vmatmul.msk.bf16.vlgmr.msra.gmra.mxu1 %vm213_vm1, %v495_v34 }
 0xad0   :  { %v508_v36 = vpop.f32.mrf.mxu1 }
 0xad1   :  { %v512_v37 = vadd.f32 %v508_v36, %v2943_v35 }
 0xad3   :  { %2516 = vtanh.f32 %v512_v37  ;;  %v2345_v42 = vmul.f32 -1.442695, %v512_v37 }
 0xad5   :  { %2518 = vpow2.f32 %v2345_v42 }
 0xad8   :  { %v510_v39 = vpop.f32.mrf.mxu1 }
 0xad9   :  { %v2517_v41 = vpop.eup %2516 }
 0xada   :  { %538 = vrot.lane.b32.xlu0 %v2517_v41, %s2749_s5 }
 0xadb   :  { %v2519_v43 = vpop.eup %2518 }
 0xadc   :  { %v516_v44 = vadd.f32 1.0, %v2519_v43 }
 0xade   :  { %2520 = vrcp.f32 %v516_v44  ;;  %v528_v38 = vand.u32 2147483648, %v516_v44  ;;  %vm522_vm4 = vweird.f32 %v516_v44  ;;  %v526_v33 = vand.u32 2147483647, %v516_v44 }
 0xae0   :  { %v529_v51 = vor.u32 1.1754944e-38, %v528_v38  ;;  %vm527_vm6 = vcmp.eq.f32.partialorder %v526_v33, 8.507059e+37 }
 0xae4   :  { %v2521_v45 = vpop.eup %2520 }
 0xae5   :  { %v518_v46 = vmul.f32 %v2521_v45, %v516_v44  ;;  %vm523_vm3 = vweird.f32 %v2521_v45 }
 0xae6   :  { %vm524_vm5 = vmor %vm522_vm4, %vm523_vm3  ;;  %vm751_vm4 = vcmask 254976  }
 0xae7   :  { %v519_v47 = vsub.f32 1.0, %v518_v46 }
 0xae9   :  { %v520_v48 = vmul.f32 %v2521_v45, %v519_v47 }
 0xaeb   :  { %v521_v49 = vadd.f32 %v2521_v45, %v520_v48 }
 0xaed   :  { %v525_v50 = vsel %vm524_vm5, %v2521_v45, %v521_v49  ;;  %vm769_vm5 = vcmask 261126  }
 0xaee   :  { %v530_v53 = vsel %vm527_vm6, %v529_v51, %v525_v50  ;;  %vm763_vm6 = vcmask 259076  }
 0xaef   :  { %v536_v56 = vmul.f32 %v534_v55, %v530_v53 }
 0xb4c   :  { %v539_v52 = vpop.permute.xlu0 %538 }
 0xb4d   :  { %v541_v54 = vmul.f32 %v539_v52, %v530_v53 }
 0xb4f   :  { %543 = vrot.lane.b32.xlu1 %v541_v54, %s2750_s15 }
 0xbc1   :  { %v544_v57 = vpop.permute.xlu1 %543 }
 0xbc2   :  { %v546_v58 = vadd.f32 %v544_v57, %v536_v56 }
 0xbc4   :  { %2522 = vtanh.f32 %v546_v58  ;;  %v598_v22 = vrot.slane %v546_v58, 6 }
 0xbca   :  { %v2523_v59 = vpop.eup %2522 }
 0xbcb   :  { %549 = vrot.lane.b32.xlu2 %v2523_v59, %s2749_s5 }
 0xc25   :  { %v550_v60 = vpop.permute.xlu2 %549 }
 0xc26   :  { %v2949_v61 = vmul.f32 %v550_v60, %v530_v53 }
 0xc28   :  { %v553_v0 = vpack.c.bf16 %v2949_v61, %v2949_v61 }
 0xc2a   :  { %555 = vrot.lane.b32.xlu0 %v553_v0, %s2750_s15 }
 0xc9c   :  { %v556_v1 = vpop.permute.xlu0 %555 }
 0xc9d   :  { %2346 = vmatmul.msk.bf16.vlgmr.msra.gmra.mxu2 %vm213_vm1, %v556_v1 }
 0xd20   :  { %v569_v2 = vpop.f32.mrf.mxu2 }
 0xd21   :  { %v574_v3 = vrot.slane %v569_v2, 6 }
 0xd23   :  { %v576_v4 = vadd.f32 %v574_v3, %v2943_v35 }
 0xd25   :  { %2524 = vtanh.f32 %v576_v4  ;;  %v2347_v7 = vmul.f32 -1.442695, %v576_v4 }
 0xd27   :  { %2526 = vpow2.f32 %v2347_v7 }
 0xd28   :  { %v571_v5 = vpop.f32.mrf.mxu2 }
 0xd2b   :  { %v2525_v6 = vpop.eup %2524 }
 0xd2c   :  { %602 = vrot.lane.b32.xlu1 %v2525_v6, %s2749_s5 }
 0xd2d   :  { %v2527_v8 = vpop.eup %2526 }
 0xd2e   :  { %v580_v9 = vadd.f32 1.0, %v2527_v8 }
 0xd30   :  { %2528 = vrcp.f32 %v580_v9  ;;  %v592_v16 = vand.u32 2147483648, %v580_v9  ;;  %vm586_vm8 = vweird.f32 %v580_v9  ;;  %v590_v17 = vand.u32 2147483647, %v580_v9 }
 0xd32   :  { %v593_v40 = vor.u32 1.1754944e-38, %v592_v16  ;;  %vm591_vm10 = vcmp.eq.f32.partialorder %v590_v17, 8.507059e+37 }
 0xd36   :  { %v2529_v10 = vpop.eup %2528 }
 0xd37   :  { %v582_v11 = vmul.f32 %v2529_v10, %v580_v9  ;;  %vm587_vm7 = vweird.f32 %v2529_v10 }
 0xd38   :  { %vm588_vm9 = vmor %vm586_vm8, %vm587_vm7  ;;  %vm757_vm7 = vcmask 257026  }
 0xd39   :  { %v583_v13 = vsub.f32 1.0, %v582_v11 }
 0xd3b   :  { %v584_v14 = vmul.f32 %v2529_v10, %v583_v13 }
 0xd3d   :  { %v585_v15 = vadd.f32 %v2529_v10, %v584_v14 }
 0xd3f   :  { %v589_v18 = vsel %vm588_vm9, %v2529_v10, %v585_v15 }
 0xd40   :  { %v594_v20 = vsel %vm591_vm10, %v593_v40, %v589_v18 }
 0xd41   :  { %v600_v23 = vmul.f32 %v598_v22, %v594_v20 }
 0xd9e   :  { %v603_v19 = vpop.permute.xlu1 %602 }
 0xd9f   :  { %v605_v21 = vmul.f32 %v603_v19, %v594_v20 }
 0xda1   :  { %607 = vrot.lane.b32.xlu2 %v605_v21, %s2750_s15 }
 0xdfb   :  { %v608_v24 = vpop.permute.xlu2 %607 }
 0xdfc   :  { %v610_v25 = vadd.f32 %v608_v24, %v600_v23 }
 0xdfe   :  { %2530 = vtanh.f32 %v610_v25  ;;  %v663_v56 = vrot.slane %v610_v25, 6 }
 0xe04   :  { %v2531_v26 = vpop.eup %2530 }
 0xe05   :  { %613 = vrot.lane.b32.xlu0 %v2531_v26, %s2749_s5 }
 0xe77   :  { %v614_v27 = vpop.permute.xlu0 %613 }
 0xe78   :  { %v2959_v28 = vmul.f32 %v614_v27, %v594_v20 }
 0xe7a   :  { %v617_v31 = vpack.c.bf16 %v2959_v28, %v2959_v28 }
 0xe7c   :  { %v619_v32 = vrot.slane %v617_v31, 1 }
 0xe7e   :  { %620 = vrot.lane.b32.xlu1 %v619_v32, %s2750_s15 }
 0xef0   :  { %v621_v34 = vpop.permute.xlu1 %620 }
 0xef1   :  { %2348 = vmatmul.msk.bf16.vlgmr.msra.gmra.mxu3 %vm213_vm1, %v621_v34 }
 0xf74   :  { %v634_v36 = vpop.f32.mrf.mxu3 }
 0xf75   :  { %v639_v37 = vrot.slane %v634_v36, 4  ;;  %v2460_v36 = vld [vmem:[%s3285_s6 + $0x18] sm:$0xff] }
 0xf76   :  { %830 = vmatpush.bf16.msrb.mxu1 %v2460_v36 }
 0xf77   :  { %v641_v39 = vadd.f32 %v639_v37, %v2943_v35  ;;  %v2457_v37 = vld [vmem:[%s3286_s7 + $0x10] sm:$0xff] }
 0xf79   :  { %2532 = vtanh.f32 %v641_v39  ;;  %v2349_v43 = vmul.f32 -1.442695, %v641_v39 }
 0xf7b   :  { %2534 = vpow2.f32 %v2349_v43 }
 0xf7c   :  { %v636_v41 = vpop.f32.mrf.mxu3 }
 0xf7f   :  { %v2533_v42 = vpop.eup %2532 }
 0xf80   :  { %667 = vrot.lane.b32.xlu2 %v2533_v42, %s2749_s5  ;;  %v2459_v42 = vld [vmem:[%s3285_s6 + $0x10] sm:$0xff] }
 0xf81   :  { %v2535_v44 = vpop.eup %2534  ;;  %831 = vmatpush.bf16.msrb.mxu1 %v2459_v42 }
 0xf82   :  { %v645_v45 = vadd.f32 1.0, %v2535_v44 }
 0xf84   :  { %2536 = vrcp.f32 %v645_v45  ;;  %v657_v33 = vand.u32 2147483648, %v645_v45  ;;  %vm651_vm12 = vweird.f32 %v645_v45  ;;  %v655_v50 = vand.u32 2147483647, %v645_v45 }
 0xf86   :  { %v658_v52 = vor.u32 1.1754944e-38, %v657_v33  ;;  %vm656_vm14 = vcmp.eq.f32.partialorder %v655_v50, 8.507059e+37 }
 0xf8a   :  { %v2537_v46 = vpop.eup %2536 }
 0xf8b   :  { %v647_v47 = vmul.f32 %v2537_v46, %v645_v45  ;;  %vm652_vm11 = vweird.f32 %v2537_v46 }
 0xf8c   :  { %vm653_vm13 = vmor %vm651_vm12, %vm652_vm11 }
 0xf8d   :  { %v648_v48 = vsub.f32 1.0, %v647_v47 }
 0xf8f   :  { %v649_v49 = vmul.f32 %v2537_v46, %v648_v48 }
 0xf91   :  { %v650_v38 = vadd.f32 %v2537_v46, %v649_v49  ;;  %v3014_v49 = vld [vmem:[%s3287_s8 + $0x1] ss:$0 sm:$0xff] }
 0xf93   :  { %v654_v51 = vsel %vm653_vm13, %v2537_v46, %v650_v38 }
 0xf94   :  { %v659_v54 = vsel %vm656_vm14, %v658_v52, %v654_v51 }
 0xf95   :  { %v665_v57 = vmul.f32 %v663_v56, %v659_v54 }
 0xfda   :  { %v668_v53 = vpop.permute.xlu2 %667 }
 0xfdb   :  { %v670_v55 = vmul.f32 %v668_v53, %v659_v54 }
 0xfdd   :  { %672 = vrot.lane.b32.xlu0 %v670_v55, %s2750_s15 }
0x104f   :  { %v673_v58 = vpop.permute.xlu0 %672 }
0x1050   :  { %v675_v59 = vadd.f32 %v673_v58, %v665_v57 }
0x1052   :  { %2538 = vtanh.f32 %v675_v59  ;;  %v728_v25 = vrot.slane %v675_v59, 6 }
0x1058   :  { %v2539_v60 = vpop.eup %2538 }
0x1059   :  { %678 = vrot.lane.b32.xlu1 %v2539_v60, %s2749_s5 }
0x10cb   :  { %v679_v0 = vpop.permute.xlu1 %678 }
0x10cc   :  { %v681_v1 = vmul.f32 %v679_v0, %v659_v54 }
0x10ce   :  { %v682_v2 = vpack.c.bf16 %v681_v1, %v681_v1 }
0x10d0   :  { %v684_v3 = vrot.slane %v682_v2, 2 }
0x10d2   :  { %685 = vrot.lane.b32.xlu2 %v684_v3, %s2750_s15 }
0x112c   :  { %v686_v4 = vpop.permute.xlu2 %685 }
0x112d   :  { %2350 = vmatmul.msk.bf16.vlgmr.msrb.gmra.mxu0 %vm213_vm1, %v686_v4 }
0x11aa   :  { %v699_v5 = vpop.f32.mrf.mxu0 }
0x11ab   :  { %v704_v6 = vrot.slane %v699_v5, 2 }
0x11ad   :  { %v706_v7 = vadd.f32 %v704_v6, %v2943_v35 }
0x11af   :  { %2540 = vtanh.f32 %v706_v7  ;;  %v2351_v10 = vmul.f32 -1.442695, %v706_v7 }
0x11b1   :  { %2542 = vpow2.f32 %v2351_v10 }
0x11b2   :  { %v701_v8 = vpop.f32.mrf.mxu0 }
0x11b5   :  { %v2541_v9 = vpop.eup %2540 }
0x11b6   :  { %732 = vrot.lane.b32.xlu0 %v2541_v9, %s2749_s5 }
0x11b7   :  { %v2543_v11 = vpop.eup %2542 }
0x11b8   :  { %v710_v13 = vadd.f32 1.0, %v2543_v11 }
0x11ba   :  { %2544 = vrcp.f32 %v710_v13  ;;  %v722_v18 = vand.u32 2147483648, %v710_v13  ;;  %vm716_vm0 = vweird.f32 %v710_v13  ;;  %v720_v40 = vand.u32 2147483647, %v710_v13 }
0x11bc   :  { %v723_v19 = vor.u32 1.1754944e-38, %v722_v18  ;;  %vm721_vm3 = vcmp.eq.f32.partialorder %v720_v40, 8.507059e+37 }
0x11be   :  { %748 = vrot.lane.b32.xlu0 %v2903_v63, %s2750_s15 }
0x11c0   :  { %v2545_v14 = vpop.eup %2544 }
0x11c1   :  { %v712_v35 = vmul.f32 %v2545_v14, %v710_v13  ;;  %vm717_vm15 = vweird.f32 %v2545_v14 }
0x11c2   :  { %vm718_vm2 = vmor %vm716_vm0, %vm717_vm15 }
0x11c3   :  { %v713_v15 = vsub.f32 1.0, %v712_v35 }
0x11c5   :  { %v714_v16 = vmul.f32 %v2545_v14, %v713_v15 }
0x11c6   :  { %766 = vrot.lane.b32.xlu0 %v2935_v30, %s2750_s15 }
0x11c7   :  { %v715_v17 = vadd.f32 %v2545_v14, %v714_v16 }
0x11c9   :  { %v719_v63 = vsel %vm718_vm2, %v2545_v14, %v715_v17 }
0x11ca   :  { %v724_v20 = vsel %vm721_vm3, %v723_v19, %v719_v63 }
0x11cb   :  { %v730_v26 = vmul.f32 %v728_v25, %v724_v20 }
0x11ce   :  { %782 = vrot.lane.b32.xlu0 %v681_v1, %s2750_s15 }
0x1228   :  { %v733_v30 = vpop.permute.xlu0 %732 }
0x1229   :  { %v735_v21 = vmul.f32 %v733_v30, %v724_v20 }
0x122b   :  { %737 = vrot.lane.b32.xlu1 %v735_v21, %s2750_s15 }
0x1230   :  { %v749_v22 = vpop.permute.xlu0 %748 }
0x1231   :  { %752 = vst.msk [vmem:[#allocation2] sm:$0x3] %vm751_vm4, %v749_v22 }
0x1233   :  { %754 = vrot.lane.b32.xlu1 %v2913_v29, %s2750_s15 }
0x1238   :  { %v767_v23 = vpop.permute.xlu0 %766 }
0x1239   :  { %770 = vst.msk [vmem:[#allocation2] sm:$0xc0] %vm769_vm5, %v767_v23 }
0x123b   :  { %772 = vrot.lane.b32.xlu1 %v2949_v61, %s2750_s15  ;;  %v2458_v61 = vld [vmem:[%s3286_s7 + $0x18] sm:$0xff] }
0x123c   :  { %856 = vmatpush.bf16.msrb.mxu2 %v2458_v61  ;;  %914 = vmatpush.bf16.msrb.mxu3 %v2458_v61 }
0x123d   :  { %979 = vmatpush.bf16.msra.mxu0 %v2458_v61  ;;  %1044 = vmatpush.bf16.msra.mxu1 %v2458_v61 }
0x1240   :  { %v783_v24 = vpop.permute.xlu0 %782  ;;  %857 = vmatpush.bf16.msrb.mxu2 %v2457_v37  ;;  %915 = vmatpush.bf16.msrb.mxu3 %v2457_v37 }
0x1241   :  { %785 = vst.msk [vmem:[#allocation2 + $0x8] sm:$0x30] %vm763_vm6, %v783_v24  ;;  %980 = vmatpush.bf16.msra.mxu0 %v2457_v37  ;;  %1045 = vmatpush.bf16.msra.mxu1 %v2457_v37 }
0x1243   :  { %858 = vmatmul.bf16.vlgmr.msrb.gmra.mxu2 %v2748_v12 }
0x1244   :  { %1109 = vmatpush.bf16.msra.mxu2 %v2458_v61  ;;  %1170 = vmatpush.bf16.msra.mxu3 %v2458_v61 }
0x1245   :  { %1235 = vmatpush.bf16.msrb.mxu0 %v2458_v61 }
0x1248   :  { %1110 = vmatpush.bf16.msra.mxu2 %v2457_v37  ;;  %1171 = vmatpush.bf16.msra.mxu3 %v2457_v37 }
0x1249   :  { %1236 = vmatpush.bf16.msrb.mxu0 %v2457_v37 }
0x129d   :  { %v738_v27 = vpop.permute.xlu1 %737 }
0x129e   :  { %v740_v31 = vadd.f32 %v738_v27, %v730_v26 }
0x12a0   :  { %2546 = vtanh.f32 %v740_v31 }
0x12a5   :  { %v755_v32 = vpop.permute.xlu1 %754 }
0x12a6   :  { %v2547_v34 = vpop.eup %2546  ;;  %758 = vst.msk [vmem:[#allocation2] sm:$0xc] %vm757_vm7, %v755_v32 }
0x12a7   :  { %743 = vrot.lane.b32.xlu2 %v2547_v34, %s2749_s5 }
0x12ad   :  { %v773_v29 = vpop.permute.xlu1 %772 }
0x12ae   :  { %775 = vst.msk [vmem:[#allocation2 + $0x8] sm:$0x3] %vm751_vm4, %v773_v29 }
0x12af   :  { %760 = vrot.lane.b32.xlu2 %v2925_v62, %s2750_s15 }
0x12b7   :  { %777 = vrot.lane.b32.xlu2 %v2959_v28, %s2750_s15 }
0x12c6   :  { %v859_v46 = vpop.f32.mrf.mxu2 }
0x12ce   :  { %v861_v48 = vpop.f32.mrf.mxu2 }
0x1301   :  { %v744_v62 = vpop.permute.xlu2 %743 }
0x1302   :  { %v746_v28 = vmul.f32 %v744_v62, %v724_v20 }
0x1304   :  { %787 = vrot.lane.b32.xlu1 %v746_v28, %s2750_s15 }
0x1309   :  { %v761_v39 = vpop.permute.xlu2 %760 }
0x130a   :  { %764 = vst.msk [vmem:[#allocation2] sm:$0x30] %vm763_vm6, %v761_v39 }
0x1311   :  { %v778_v41 = vpop.permute.xlu2 %777  ;;  %v791_v44 = vld [vmem:[#allocation2] sm:$0xff] }
0x1312   :  { %780 = vst.msk [vmem:[#allocation2 + $0x8] sm:$0xc] %vm757_vm7, %v778_v41 }
0x1376   :  { %v788_v43 = vpop.permute.xlu1 %787 }
0x1377   :  { %790 = vst.msk [vmem:[#allocation2 + $0x8] sm:$0xc0] %vm769_vm5, %v788_v43 }
0x137e   :  { %v792_v45 = vld [vmem:[#allocation2 + $0x8] sm:$0xff] }
0x137f   :  { %v798_v47 = vpack.c.bf16 %v792_v45, %v791_v44 }
0x1381   :  { %2369 = vmatmul.msk.bf16.vlgmr.msrb.gmra.mxu1 %vm213_vm1, %v798_v47 }
0x1382   :  { %1300 = vmatpush.bf16.msrb.mxu1 %v2458_v61 }
0x1386   :  { %1301 = vmatpush.bf16.msrb.mxu1 %v2457_v37 }
0x13fe   :  { %v833_v38 = vpop.f32.mrf.mxu1 }
0x13ff   :  { %v3017_v33 = vadd.f32 %v3014_v49, %v833_v38 }
0x1401   :  { %v863_v50 = vadd.f32 %v859_v46, %v3017_v33 }
0x1403   :  { %2548 = vtanh.f32 %v863_v50  ;;  %v2378_v52 = vmul.f32 -1.442695, %v863_v50 }
0x1405   :  { %2550 = vpow2.f32 %v2378_v52 }
0x1409   :  { %v2549_v51 = vpop.eup %2548 }
0x140a   :  { %886 = vrot.lane.b32.xlu2 %v2549_v51, %s2749_s5 }
0x140b   :  { %v2551_v53 = vpop.eup %2550 }
0x140c   :  { %v867_v54 = vadd.f32 1.0, %v2551_v53 }
0x140e   :  { %2552 = vrcp.f32 %v867_v54  ;;  %v879_v60 = vand.u32 2147483648, %v867_v54  ;;  %vm873_vm9 = vweird.f32 %v867_v54  ;;  %v877_v0 = vand.u32 2147483647, %v867_v54 }
0x1410   :  { %v880_v2 = vor.u32 1.1754944e-38, %v879_v60  ;;  %vm878_vm11 = vcmp.eq.f32.partialorder %v877_v0, 8.507059e+37 }
0x1414   :  { %v2553_v55 = vpop.eup %2552 }
0x1415   :  { %v869_v56 = vmul.f32 %v2553_v55, %v867_v54  ;;  %vm874_vm8 = vweird.f32 %v2553_v55 }
0x1416   :  { %vm875_vm10 = vmor %vm873_vm9, %vm874_vm8 }
0x1417   :  { %v870_v57 = vsub.f32 1.0, %v869_v56 }
0x1419   :  { %v871_v58 = vmul.f32 %v2553_v55, %v870_v57 }
0x141b   :  { %v872_v59 = vadd.f32 %v2553_v55, %v871_v58 }
0x141d   :  { %v876_v1 = vsel %vm875_vm10, %v2553_v55, %v872_v59 }
0x141e   :  { %v881_v4 = vsel %vm878_vm11, %v880_v2, %v876_v1 }
0x141f   :  { %v884_v6 = vmul.f32 0.0, %v881_v4 }
0x1464   :  { %v887_v3 = vpop.permute.xlu2 %886 }
0x1465   :  { %v889_v5 = vmul.f32 %v887_v3, %v881_v4 }
0x1467   :  { %891 = vrot.lane.b32.xlu0 %v889_v5, %s2750_s15 }
0x14d9   :  { %v892_v7 = vpop.permute.xlu0 %891 }
0x14da   :  { %v894_v8 = vadd.f32 %v892_v7, %v884_v6 }
0x14dc   :  { %2554 = vtanh.f32 %v894_v8  ;;  %v946_v29 = vrot.slane %v894_v8, 6 }
0x14e2   :  { %v2555_v9 = vpop.eup %2554 }
0x14e3   :  { %897 = vrot.lane.b32.xlu1 %v2555_v9, %s2749_s5 }
0x1555   :  { %v898_v10 = vpop.permute.xlu1 %897 }
0x1556   :  { %v3023_v11 = vmul.f32 %v898_v10, %v881_v4 }
0x1558   :  { %v901_v13 = vpack.c.bf16 %v3023_v11, %v3023_v11 }
0x155a   :  { %903 = vrot.lane.b32.xlu2 %v901_v13, %s2750_s15 }
0x15b4   :  { %v904_v14 = vpop.permute.xlu2 %903 }
0x15b5   :  { %2379 = vmatmul.msk.bf16.vlgmr.msrb.gmra.mxu3 %vm213_vm1, %v904_v14 }
0x1638   :  { %v917_v35 = vpop.f32.mrf.mxu3 }
0x1639   :  { %v922_v15 = vrot.slane %v917_v35, 6  ;;  %v835_v35 = vpop.f32.mrf.mxu1 }
0x163b   :  { %v924_v16 = vadd.f32 %v922_v15, %v3017_v33 }
0x163d   :  { %2556 = vtanh.f32 %v924_v16  ;;  %v2380_v40 = vmul.f32 -1.442695, %v924_v16 }
0x163f   :  { %2558 = vpow2.f32 %v2380_v40 }
0x1640   :  { %v919_v17 = vpop.f32.mrf.mxu3 }
0x1643   :  { %v2557_v18 = vpop.eup %2556 }
0x1644   :  { %950 = vrot.lane.b32.xlu0 %v2557_v18, %s2749_s5 }
0x1645   :  { %v2559_v63 = vpop.eup %2558 }
0x1646   :  { %v928_v19 = vadd.f32 1.0, %v2559_v63 }
0x1648   :  { %2560 = vrcp.f32 %v928_v19  ;;  %v940_v24 = vand.u32 2147483648, %v928_v19  ;;  %vm934_vm13 = vweird.f32 %v928_v19  ;;  %v938_v25 = vand.u32 2147483647, %v928_v19 }
0x164a   :  { %v941_v27 = vor.u32 1.1754944e-38, %v940_v24  ;;  %vm939_vm15 = vcmp.eq.f32.partialorder %v938_v25, 8.507059e+37 }
0x164e   :  { %v2561_v30 = vpop.eup %2560 }
0x164f   :  { %v930_v20 = vmul.f32 %v2561_v30, %v928_v19  ;;  %vm935_vm12 = vweird.f32 %v2561_v30 }
0x1650   :  { %vm936_vm14 = vmor %vm934_vm13, %vm935_vm12 }
0x1651   :  { %v931_v21 = vsub.f32 1.0, %v930_v20 }
0x1653   :  { %v932_v22 = vmul.f32 %v2561_v30, %v931_v21 }
0x1655   :  { %v933_v23 = vadd.f32 %v2561_v30, %v932_v22 }
0x1657   :  { %v937_v26 = vsel %vm936_vm14, %v2561_v30, %v933_v23 }
0x1658   :  { %v942_v32 = vsel %vm939_vm15, %v941_v27, %v937_v26 }
0x1659   :  { %v948_v61 = vmul.f32 %v946_v29, %v942_v32 }
0x16b6   :  { %v951_v31 = vpop.permute.xlu0 %950 }
0x16b7   :  { %v953_v34 = vmul.f32 %v951_v31, %v942_v32 }
0x16b9   :  { %955 = vrot.lane.b32.xlu1 %v953_v34, %s2750_s15 }
0x172b   :  { %v956_v36 = vpop.permute.xlu1 %955 }
0x172c   :  { %v958_v37 = vadd.f32 %v956_v36, %v948_v61 }
0x172e   :  { %2562 = vtanh.f32 %v958_v37  ;;  %v1011_v3 = vrot.slane %v958_v37, 6 }
0x1734   :  { %v2563_v62 = vpop.eup %2562 }
0x1735   :  { %961 = vrot.lane.b32.xlu2 %v2563_v62, %s2749_s5 }
0x178f   :  { %v962_v28 = vpop.permute.xlu2 %961 }
0x1790   :  { %v3033_v39 = vmul.f32 %v962_v28, %v942_v32 }
0x1792   :  { %v965_v41 = vpack.c.bf16 %v3033_v39, %v3033_v39 }
0x1794   :  { %v967_v42 = vrot.slane %v965_v41, 1 }
0x1796   :  { %968 = vrot.lane.b32.xlu0 %v967_v42, %s2750_s15 }
0x1808   :  { %v969_v43 = vpop.permute.xlu0 %968 }
0x1809   :  { %2381 = vmatmul.msk.bf16.vlgmr.msra.gmra.mxu0 %vm213_vm1, %v969_v43 }
0x1886   :  { %v982_v44 = vpop.f32.mrf.mxu0 }
0x1887   :  { %v987_v45 = vrot.slane %v982_v44, 4 }
0x1889   :  { %v989_v46 = vadd.f32 %v987_v45, %v3017_v33  ;;  %v3060_v45 = vadd.f32 %v3014_v49, %v835_v35 }
0x188b   :  { %2564 = vtanh.f32 %v989_v46  ;;  %v2382_v38 = vmul.f32 -1.442695, %v989_v46 }
0x188d   :  { %2566 = vpow2.f32 %v2382_v38 }
0x188e   :  { %v984_v47 = vpop.f32.mrf.mxu0 }
0x1891   :  { %v2565_v48 = vpop.eup %2564 }
0x1892   :  { %1015 = vrot.lane.b32.xlu1 %v2565_v48, %s2749_s5 }
0x1893   :  { %v2567_v50 = vpop.eup %2566 }
0x1894   :  { %v993_v51 = vadd.f32 1.0, %v2567_v50 }
0x1896   :  { %2568 = vrcp.f32 %v993_v51  ;;  %v1005_v57 = vand.u32 2147483648, %v993_v51  ;;  %vm999_vm2 = vweird.f32 %v993_v51  ;;  %v1003_v58 = vand.u32 2147483647, %v993_v51 }
0x1898   :  { %v1006_v60 = vor.u32 1.1754944e-38, %v1005_v57  ;;  %vm1004_vm8 = vcmp.eq.f32.partialorder %v1003_v58, 8.507059e+37 }
0x189c   :  { %v2569_v52 = vpop.eup %2568 }
0x189d   :  { %v995_v53 = vmul.f32 %v2569_v52, %v993_v51  ;;  %vm1000_vm0 = vweird.f32 %v2569_v52 }
0x189e   :  { %vm1001_vm3 = vmor %vm999_vm2, %vm1000_vm0 }
0x189f   :  { %v996_v54 = vsub.f32 1.0, %v995_v53 }
0x18a1   :  { %v997_v55 = vmul.f32 %v2569_v52, %v996_v54 }
0x18a3   :  { %v998_v56 = vadd.f32 %v2569_v52, %v997_v55 }
0x18a5   :  { %v1002_v59 = vsel %vm1001_vm3, %v2569_v52, %v998_v56 }
0x18a6   :  { %v1007_v1 = vsel %vm1004_vm8, %v1006_v60, %v1002_v59 }
0x18a7   :  { %v1013_v4 = vmul.f32 %v1011_v3, %v1007_v1 }
0x1904   :  { %v1016_v0 = vpop.permute.xlu1 %1015 }
0x1905   :  { %v1018_v2 = vmul.f32 %v1016_v0, %v1007_v1 }
0x1907   :  { %1020 = vrot.lane.b32.xlu2 %v1018_v2, %s2750_s15 }
0x1961   :  { %v1021_v5 = vpop.permute.xlu2 %1020 }
0x1962   :  { %v1023_v6 = vadd.f32 %v1021_v5, %v1013_v4 }
0x1964   :  { %2570 = vtanh.f32 %v1023_v6  ;;  %v1076_v29 = vrot.slane %v1023_v6, 6 }
0x196a   :  { %v2571_v7 = vpop.eup %2570 }
0x196b   :  { %1026 = vrot.lane.b32.xlu0 %v2571_v7, %s2749_s5 }
0x19dd   :  { %v1027_v8 = vpop.permute.xlu0 %1026 }
0x19de   :  { %v3043_v9 = vmul.f32 %v1027_v8, %v1007_v1 }
0x19e0   :  { %v1030_v10 = vpack.c.bf16 %v3043_v9, %v3043_v9 }
0x19e2   :  { %v1032_v13 = vrot.slane %v1030_v10, 2 }
0x19e4   :  { %1033 = vrot.lane.b32.xlu1 %v1032_v13, %s2750_s15 }
0x1a56   :  { %v1034_v14 = vpop.permute.xlu1 %1033 }
0x1a57   :  { %2383 = vmatmul.msk.bf16.vlgmr.msra.gmra.mxu1 %vm213_vm1, %v1034_v14 }
0x1ad4   :  { %v1047_v15 = vpop.f32.mrf.mxu1 }
0x1ad5   :  { %v1052_v16 = vrot.slane %v1047_v15, 2 }
0x1ad7   :  { %v1054_v17 = vadd.f32 %v1052_v16, %v3017_v33 }
0x1ad9   :  { %2572 = vtanh.f32 %v1054_v17  ;;  %v2384_v63 = vmul.f32 -1.442695, %v1054_v17 }
0x1adb   :  { %2574 = vpow2.f32 %v2384_v63 }
0x1adc   :  { %v1049_v18 = vpop.f32.mrf.mxu1 }
0x1adf   :  { %v2573_v40 = vpop.eup %2572 }
0x1ae0   :  { %1080 = vrot.lane.b32.xlu2 %v2573_v40, %s2749_s5 }
0x1ae1   :  { %v2575_v19 = vpop.eup %2574 }
0x1ae2   :  { %v1058_v30 = vadd.f32 1.0, %v2575_v19 }
0x1ae4   :  { %2576 = vrcp.f32 %v1058_v30  ;;  %v1070_v25 = vand.u32 2147483648, %v1058_v30  ;;  %vm1064_vm10 = vweird.f32 %v1058_v30  ;;  %v1068_v26 = vand.u32 2147483647, %v1058_v30 }
0x1ae6   :  { %v1071_v27 = vor.u32 1.1754944e-38, %v1070_v25  ;;  %vm1069_vm12 = vcmp.eq.f32.partialorder %v1068_v26, 8.507059e+37 }
0x1aea   :  { %v2577_v20 = vpop.eup %2576 }
0x1aeb   :  { %v1060_v21 = vmul.f32 %v2577_v20, %v1058_v30  ;;  %vm1065_vm9 = vweird.f32 %v2577_v20 }
0x1aec   :  { %vm1066_vm11 = vmor %vm1064_vm10, %vm1065_vm9 }
0x1aed   :  { %v1061_v22 = vsub.f32 1.0, %v1060_v21 }
0x1aef   :  { %v1062_v23 = vmul.f32 %v2577_v20, %v1061_v22 }
0x1af1   :  { %v1063_v24 = vadd.f32 %v2577_v20, %v1062_v23 }
0x1af3   :  { %v1067_v33 = vsel %vm1066_vm11, %v2577_v20, %v1063_v24 }
0x1af4   :  { %v1072_v32 = vsel %vm1069_vm12, %v1071_v27, %v1067_v33 }
0x1af5   :  { %v1078_v61 = vmul.f32 %v1076_v29, %v1072_v32 }
0x1b3a   :  { %v1081_v31 = vpop.permute.xlu2 %1080 }
0x1b3b   :  { %v1083_v34 = vmul.f32 %v1081_v31, %v1072_v32 }
0x1b3d   :  { %1085 = vrot.lane.b32.xlu0 %v1083_v34, %s2750_s15 }
0x1baf   :  { %v1086_v36 = vpop.permute.xlu0 %1085 }
0x1bb0   :  { %v1088_v37 = vadd.f32 %v1086_v36, %v1078_v61 }
0x1bb2   :  { %2578 = vtanh.f32 %v1088_v37  ;;  %v1138_v3 = vrot.slane %v1088_v37, 6 }
0x1bb8   :  { %v2579_v62 = vpop.eup %2578 }
0x1bb9   :  { %1091 = vrot.lane.b32.xlu1 %v2579_v62, %s2749_s5 }
0x1c2b   :  { %v1092_v28 = vpop.permute.xlu1 %1091 }
0x1c2c   :  { %v3053_v41 = vmul.f32 %v1092_v28, %v1072_v32 }
0x1c2e   :  { %v1095_v42 = vpack.c.bf16 %v3053_v41, %v3053_v41 }
0x1c30   :  { %v1097_v43 = vrot.slane %v1095_v42, 3 }
0x1c32   :  { %1098 = vrot.lane.b32.xlu2 %v1097_v43, %s2750_s15 }
0x1c8c   :  { %v1099_v44 = vpop.permute.xlu2 %1098 }
0x1c8d   :  { %2385 = vmatmul.msk.bf16.vlgmr.msra.gmra.mxu2 %vm213_vm1, %v1099_v44 }
0x1d10   :  { %v1112_v46 = vpop.f32.mrf.mxu2 }
0x1d11   :  { %v1116_v47 = vadd.f32 %v1112_v46, %v3060_v45 }
0x1d13   :  { %2580 = vtanh.f32 %v1116_v47  ;;  %v2386_v50 = vmul.f32 -1.442695, %v1116_v47 }
0x1d15   :  { %2582 = vpow2.f32 %v2386_v50 }
0x1d18   :  { %v1114_v48 = vpop.f32.mrf.mxu2 }
0x1d19   :  { %v2581_v38 = vpop.eup %2580 }
0x1d1a   :  { %1142 = vrot.lane.b32.xlu0 %v2581_v38, %s2749_s5 }
0x1d1b   :  { %v2583_v51 = vpop.eup %2582 }
0x1d1c   :  { %v1120_v52 = vadd.f32 1.0, %v2583_v51 }
0x1d1e   :  { %2584 = vrcp.f32 %v1120_v52  ;;  %v1132_v49 = vand.u32 2147483648, %v1120_v52  ;;  %vm1126_vm14 = vweird.f32 %v1120_v52  ;;  %v1130_v58 = vand.u32 2147483647, %v1120_v52 }
0x1d20   :  { %v1133_v60 = vor.u32 1.1754944e-38, %v1132_v49  ;;  %vm1131_vm0 = vcmp.eq.f32.partialorder %v1130_v58, 8.507059e+37 }
0x1d24   :  { %v2585_v53 = vpop.eup %2584 }
0x1d25   :  { %v1122_v54 = vmul.f32 %v2585_v53, %v1120_v52  ;;  %vm1127_vm13 = vweird.f32 %v2585_v53 }
0x1d26   :  { %vm1128_vm15 = vmor %vm1126_vm14, %vm1127_vm13 }
0x1d27   :  { %v1123_v55 = vsub.f32 1.0, %v1122_v54 }
0x1d29   :  { %v1124_v56 = vmul.f32 %v2585_v53, %v1123_v55 }
0x1d2b   :  { %v1125_v57 = vadd.f32 %v2585_v53, %v1124_v56 }
0x1d2d   :  { %v1129_v59 = vsel %vm1128_vm15, %v2585_v53, %v1125_v57 }
0x1d2e   :  { %v1134_v1 = vsel %vm1131_vm0, %v1133_v60, %v1129_v59 }
0x1d2f   :  { %v1140_v4 = vmul.f32 %v1138_v3, %v1134_v1 }
0x1d8c   :  { %v1143_v0 = vpop.permute.xlu0 %1142 }
0x1d8d   :  { %v1145_v2 = vmul.f32 %v1143_v0, %v1134_v1 }
0x1d8f   :  { %1147 = vrot.lane.b32.xlu1 %v1145_v2, %s2750_s15 }
0x1e01   :  { %v1148_v5 = vpop.permute.xlu1 %1147 }
0x1e02   :  { %v1150_v6 = vadd.f32 %v1148_v5, %v1140_v4 }
0x1e04   :  { %2586 = vtanh.f32 %v1150_v6  ;;  %v1202_v34 = vrot.slane %v1150_v6, 6 }
0x1e0a   :  { %v2587_v7 = vpop.eup %2586 }
0x1e0b   :  { %1153 = vrot.lane.b32.xlu2 %v2587_v7, %s2749_s5 }
0x1e65   :  { %v1154_v8 = vpop.permute.xlu2 %1153 }
0x1e66   :  { %v3066_v10 = vmul.f32 %v1154_v8, %v1134_v1 }
0x1e68   :  { %v1157_v13 = vpack.c.bf16 %v3066_v10, %v3066_v10 }
0x1e6a   :  { %1159 = vrot.lane.b32.xlu0 %v1157_v13, %s2750_s15 }
0x1edc   :  { %v1160_v14 = vpop.permute.xlu0 %1159 }
0x1edd   :  { %2387 = vmatmul.msk.bf16.vlgmr.msra.gmra.mxu3 %vm213_vm1, %v1160_v14 }
0x1f60   :  { %v1173_v35 = vpop.f32.mrf.mxu3 }
0x1f61   :  { %v1178_v15 = vrot.slane %v1173_v35, 6 }
0x1f63   :  { %v1180_v16 = vadd.f32 %v1178_v15, %v3060_v45 }
0x1f65   :  { %2588 = vtanh.f32 %v1180_v16  ;;  %v2388_v40 = vmul.f32 -1.442695, %v1180_v16 }
0x1f67   :  { %2590 = vpow2.f32 %v2388_v40 }
0x1f68   :  { %v1175_v17 = vpop.f32.mrf.mxu3 }
0x1f6b   :  { %v2589_v18 = vpop.eup %2588 }
0x1f6c   :  { %1206 = vrot.lane.b32.xlu1 %v2589_v18, %s2749_s5 }
0x1f6d   :  { %v2591_v63 = vpop.eup %2590 }
0x1f6e   :  { %v1184_v19 = vadd.f32 1.0, %v2591_v63 }
0x1f70   :  { %2592 = vrcp.f32 %v1184_v19  ;;  %v1196_v24 = vand.u32 2147483648, %v1184_v19  ;;  %vm1190_vm3 = vweird.f32 %v1184_v19  ;;  %v1194_v25 = vand.u32 2147483647, %v1184_v19 }
0x1f72   :  { %v1197_v33 = vor.u32 1.1754944e-38, %v1196_v24  ;;  %vm1195_vm9 = vcmp.eq.f32.partialorder %v1194_v25, 8.507059e+37 }
0x1f76   :  { %v2593_v30 = vpop.eup %2592 }
0x1f77   :  { %v1186_v20 = vmul.f32 %v2593_v30, %v1184_v19  ;;  %vm1191_vm2 = vweird.f32 %v2593_v30 }
0x1f78   :  { %vm1192_vm8 = vmor %vm1190_vm3, %vm1191_vm2 }
0x1f79   :  { %v1187_v21 = vsub.f32 1.0, %v1186_v20 }
0x1f7b   :  { %v1188_v22 = vmul.f32 %v2593_v30, %v1187_v21 }
0x1f7d   :  { %v1189_v23 = vadd.f32 %v2593_v30, %v1188_v22 }
0x1f7f   :  { %v1193_v26 = vsel %vm1192_vm8, %v2593_v30, %v1189_v23 }
0x1f80   :  { %v1198_v31 = vsel %vm1195_vm9, %v1197_v33, %v1193_v26 }
0x1f81   :  { %v1204_v29 = vmul.f32 %v1202_v34, %v1198_v31 }
0x1fde   :  { %v1207_v27 = vpop.permute.xlu1 %1206 }
0x1fdf   :  { %v1209_v32 = vmul.f32 %v1207_v27, %v1198_v31 }
0x1fe1   :  { %1211 = vrot.lane.b32.xlu2 %v1209_v32, %s2750_s15 }
0x203b   :  { %v1212_v61 = vpop.permute.xlu2 %1211 }
0x203c   :  { %v1214_v36 = vadd.f32 %v1212_v61, %v1204_v29 }
0x203e   :  { %2594 = vtanh.f32 %v1214_v36  ;;  %v1267_v4 = vrot.slane %v1214_v36, 6 }
0x2044   :  { %v2595_v37 = vpop.eup %2594 }
0x2045   :  { %1217 = vrot.lane.b32.xlu0 %v2595_v37, %s2749_s5 }
0x20b7   :  { %v1218_v62 = vpop.permute.xlu0 %1217 }
0x20b8   :  { %v3076_v28 = vmul.f32 %v1218_v62, %v1198_v31 }
0x20ba   :  { %v1221_v42 = vpack.c.bf16 %v3076_v28, %v3076_v28 }
0x20bc   :  { %v1223_v43 = vrot.slane %v1221_v42, 1 }
0x20be   :  { %1224 = vrot.lane.b32.xlu1 %v1223_v43, %s2750_s15 }
0x2130   :  { %v1225_v44 = vpop.permute.xlu1 %1224 }
0x2131   :  { %2389 = vmatmul.msk.bf16.vlgmr.msrb.gmra.mxu0 %vm213_vm1, %v1225_v44 }
0x21ae   :  { %v1238_v46 = vpop.f32.mrf.mxu0 }
0x21af   :  { %v1243_v47 = vrot.slane %v1238_v46, 4  ;;  %v2462_v46 = vld [vmem:[%s3286_s7 + $0x28] sm:$0xff] }
0x21b0   :  { %1456 = vmatpush.bf16.msrb.mxu3 %v2462_v46  ;;  %1514 = vmatpush.bf16.msra.mxu0 %v2462_v46 }
0x21b1   :  { %v1245_v48 = vadd.f32 %v1243_v47, %v3060_v45  ;;  %1579 = vmatpush.bf16.msra.mxu1 %v2462_v46 }
0x21b3   :  { %2596 = vtanh.f32 %v1245_v48  ;;  %v2390_v51 = vmul.f32 -1.442695, %v1245_v48 }
0x21b5   :  { %2598 = vpow2.f32 %v2390_v51 }
0x21b6   :  { %v1240_v38 = vpop.f32.mrf.mxu0 }
0x21b7   :  { %v2461_v38 = vld [vmem:[%s3286_s7 + $0x20] sm:$0xff] }
0x21b8   :  { %1457 = vmatpush.bf16.msrb.mxu3 %v2461_v38  ;;  %1515 = vmatpush.bf16.msra.mxu0 %v2461_v38 }
0x21b9   :  { %v2597_v50 = vpop.eup %2596  ;;  %1580 = vmatpush.bf16.msra.mxu1 %v2461_v38 }
0x21ba   :  { %1271 = vrot.lane.b32.xlu2 %v2597_v50, %s2749_s5  ;;  %v2463_v50 = vld [vmem:[%s3285_s6 + $0x20] sm:$0xff] }
0x21bb   :  { %v2599_v52 = vpop.eup %2598  ;;  %1458 = vmatmul.bf16.vlgmr.msrb.gmra.mxu3 %v2748_v12  ;;  %v3131_v12 = vld [vmem:[%s3287_s8 + $0x2] ss:$0 sm:$0xff] }
0x21bc   :  { %v1249_v53 = vadd.f32 1.0, %v2599_v52  ;;  %1709 = vmatpush.bf16.msra.mxu3 %v2462_v46  ;;  %1770 = vmatpush.bf16.msrb.mxu0 %v2462_v46 }
0x21be   :  { %2600 = vrcp.f32 %v1249_v53  ;;  %v1261_v58 = vand.u32 2147483648, %v1249_v53  ;;  %vm1255_vm11 = vweird.f32 %v1249_v53  ;;  %v1259_v59 = vand.u32 2147483647, %v1249_v53 }
0x21c0   :  { %v1262_v0 = vor.u32 1.1754944e-38, %v1261_v58  ;;  %vm1260_vm13 = vcmp.eq.f32.partialorder %v1259_v59, 8.507059e+37  ;;  %1710 = vmatpush.bf16.msra.mxu3 %v2461_v38  ;;  %1771 = vmatpush.bf16.msrb.mxu0 %v2461_v38 }
0x21c4   :  { %v2601_v54 = vpop.eup %2600 }
0x21c5   :  { %v1251_v55 = vmul.f32 %v2601_v54, %v1249_v53  ;;  %vm1256_vm10 = vweird.f32 %v2601_v54 }
0x21c6   :  { %vm1257_vm12 = vmor %vm1255_vm11, %vm1256_vm10 }
0x21c7   :  { %v1252_v56 = vsub.f32 1.0, %v1251_v55 }
0x21c9   :  { %v1253_v57 = vmul.f32 %v2601_v54, %v1252_v56 }
0x21cb   :  { %v1254_v49 = vadd.f32 %v2601_v54, %v1253_v57 }
0x21cd   :  { %v1258_v60 = vsel %vm1257_vm12, %v2601_v54, %v1254_v49 }
0x21ce   :  { %v1263_v2 = vsel %vm1260_vm13, %v1262_v0, %v1258_v60 }
0x21cf   :  { %v1269_v5 = vmul.f32 %v1267_v4, %v1263_v2 }
0x2214   :  { %v1272_v1 = vpop.permute.xlu2 %1271 }
0x2215   :  { %v1274_v3 = vmul.f32 %v1272_v1, %v1263_v2 }
0x2217   :  { %1276 = vrot.lane.b32.xlu0 %v1274_v3, %s2750_s15 }
0x223e   :  { %v1459_v55 = vpop.f32.mrf.mxu3 }
0x2246   :  { %v1461_v56 = vpop.f32.mrf.mxu3 }
0x2289   :  { %v1277_v6 = vpop.permute.xlu0 %1276 }
0x228a   :  { %v1279_v7 = vadd.f32 %v1277_v6, %v1269_v5 }
0x228c   :  { %2602 = vtanh.f32 %v1279_v7  ;;  %v1332_v36 = vrot.slane %v1279_v7, 6 }
0x2292   :  { %v2603_v8 = vpop.eup %2602 }
0x2293   :  { %1282 = vrot.lane.b32.xlu1 %v2603_v8, %s2749_s5 }
0x2305   :  { %v1283_v13 = vpop.permute.xlu1 %1282 }
0x2306   :  { %v1285_v14 = vmul.f32 %v1283_v13, %v1263_v2 }
0x2308   :  { %v1286_v35 = vpack.c.bf16 %v1285_v14, %v1285_v14 }
0x230a   :  { %v1288_v15 = vrot.slane %v1286_v35, 2 }
0x230c   :  { %1289 = vrot.lane.b32.xlu2 %v1288_v15, %s2750_s15 }
0x2366   :  { %v1290_v16 = vpop.permute.xlu2 %1289 }
0x2367   :  { %2391 = vmatmul.msk.bf16.vlgmr.msrb.gmra.mxu1 %vm213_vm1, %v1290_v16 }
0x2368   :  { %1835 = vmatpush.bf16.msrb.mxu1 %v2462_v46 }
0x236c   :  { %1836 = vmatpush.bf16.msrb.mxu1 %v2461_v38 }
0x23e4   :  { %v1303_v17 = vpop.f32.mrf.mxu1 }
0x23e5   :  { %v1308_v18 = vrot.slane %v1303_v17, 2 }
0x23e7   :  { %v1310_v40 = vadd.f32 %v1308_v18, %v3060_v45 }
0x23e9   :  { %2604 = vtanh.f32 %v1310_v40  ;;  %v2392_v30 = vmul.f32 -1.442695, %v1310_v40 }
0x23eb   :  { %2606 = vpow2.f32 %v2392_v30 }
0x23ec   :  { %v1305_v63 = vpop.f32.mrf.mxu1 }
0x23ef   :  { %v2605_v19 = vpop.eup %2604 }
0x23f0   :  { %1336 = vrot.lane.b32.xlu0 %v2605_v19, %s2749_s5 }
0x23f1   :  { %v2607_v20 = vpop.eup %2606 }
0x23f2   :  { %v1314_v21 = vadd.f32 1.0, %v2607_v20 }
0x23f4   :  { %2608 = vrcp.f32 %v1314_v21  ;;  %v1326_v26 = vand.u32 2147483648, %v1314_v21  ;;  %vm1320_vm15 = vweird.f32 %v1314_v21  ;;  %v1324_v33 = vand.u32 2147483647, %v1314_v21 }
0x23f6   :  { %v1327_v27 = vor.u32 1.1754944e-38, %v1326_v26  ;;  %vm1325_vm2 = vcmp.eq.f32.partialorder %v1324_v33, 8.507059e+37 }
0x23f8   :  { %1352 = vrot.lane.b32.xlu0 %v3023_v11, %s2750_s15 }
0x23fa   :  { %v2609_v22 = vpop.eup %2608 }
0x23fb   :  { %v1316_v45 = vmul.f32 %v2609_v22, %v1314_v21  ;;  %vm1321_vm14 = vweird.f32 %v2609_v22 }
0x23fc   :  { %vm1322_vm0 = vmor %vm1320_vm15, %vm1321_vm14 }
0x23fd   :  { %v1317_v23 = vsub.f32 1.0, %v1316_v45 }
0x23ff   :  { %v1318_v24 = vmul.f32 %v2609_v22, %v1317_v23 }
0x2400   :  { %1367 = vrot.lane.b32.xlu0 %v3053_v41, %s2750_s15 }
0x2401   :  { %v1319_v25 = vadd.f32 %v2609_v22, %v1318_v24 }
0x2403   :  { %v1323_v11 = vsel %vm1322_vm0, %v2609_v22, %v1319_v25 }
0x2404   :  { %v1328_v31 = vsel %vm1325_vm2, %v1327_v27, %v1323_v11 }
0x2405   :  { %v1334_v37 = vmul.f32 %v1332_v36, %v1328_v31 }
0x2408   :  { %1382 = vrot.lane.b32.xlu0 %v1285_v14, %s2750_s15 }
0x2462   :  { %v1337_v41 = vpop.permute.xlu0 %1336 }
0x2463   :  { %v1339_v32 = vmul.f32 %v1337_v41, %v1328_v31 }
0x2465   :  { %1341 = vrot.lane.b32.xlu1 %v1339_v32, %s2750_s15 }
0x246a   :  { %v1353_v34 = vpop.permute.xlu0 %1352 }
0x246b   :  { %1355 = vst.msk [vmem:[#allocation2] sm:$0x3] %vm751_vm4, %v1353_v34 }
0x246d   :  { %1357 = vrot.lane.b32.xlu1 %v3033_v39, %s2750_s15 }
0x2472   :  { %v1368_v29 = vpop.permute.xlu0 %1367 }
0x2473   :  { %1370 = vst.msk [vmem:[#allocation2] sm:$0xc0] %vm769_vm5, %v1368_v29 }
0x2475   :  { %1372 = vrot.lane.b32.xlu1 %v3066_v10, %s2750_s15  ;;  %v2464_v10 = vld [vmem:[%s3285_s6 + $0x28] sm:$0xff] }
0x2476   :  { %1430 = vmatpush.bf16.msrb.mxu2 %v2464_v10 }
0x247a   :  { %v1383_v61 = vpop.permute.xlu0 %1382  ;;  %1431 = vmatpush.bf16.msrb.mxu2 %v2463_v50 }
0x247b   :  { %1385 = vst.msk [vmem:[#allocation2 + $0x8] sm:$0x30] %vm763_vm6, %v1383_v61 }
0x247e   :  { %1644 = vmatpush.bf16.msra.mxu2 %v2462_v46 }
0x2482   :  { %1645 = vmatpush.bf16.msra.mxu2 %v2461_v38 }
0x24d7   :  { %v1342_v62 = vpop.permute.xlu1 %1341 }
0x24d8   :  { %v1344_v42 = vadd.f32 %v1342_v62, %v1334_v37 }
0x24da   :  { %2610 = vtanh.f32 %v1344_v42 }
0x24df   :  { %v1358_v43 = vpop.permute.xlu1 %1357 }
0x24e0   :  { %v2611_v44 = vpop.eup %2610  ;;  %1360 = vst.msk [vmem:[#allocation2] sm:$0xc] %vm757_vm7, %v1358_v43 }
0x24e1   :  { %1347 = vrot.lane.b32.xlu2 %v2611_v44, %s2749_s5 }
0x24e7   :  { %v1373_v39 = vpop.permute.xlu1 %1372 }
0x24e8   :  { %1375 = vst.msk [vmem:[#allocation2 + $0x8] sm:$0x3] %vm751_vm4, %v1373_v39 }
0x24e9   :  { %1362 = vrot.lane.b32.xlu2 %v3043_v9, %s2750_s15 }
0x24f1   :  { %1377 = vrot.lane.b32.xlu2 %v3076_v28, %s2750_s15 }
0x253b   :  { %v1348_v47 = vpop.permute.xlu2 %1347 }
0x253c   :  { %v1350_v48 = vmul.f32 %v1348_v47, %v1328_v31 }
0x253e   :  { %1387 = vrot.lane.b32.xlu1 %v1350_v48, %s2750_s15 }
0x2543   :  { %v1363_v9 = vpop.permute.xlu2 %1362 }
0x2544   :  { %1365 = vst.msk [vmem:[#allocation2] sm:$0x30] %vm763_vm6, %v1363_v9 }
0x254b   :  { %v1378_v28 = vpop.permute.xlu2 %1377  ;;  %v1391_v52 = vld [vmem:[#allocation2] sm:$0xff] }
0x254c   :  { %1380 = vst.msk [vmem:[#allocation2 + $0x8] sm:$0xc] %vm757_vm7, %v1378_v28 }
0x25b0   :  { %v1388_v51 = vpop.permute.xlu1 %1387 }
0x25b1   :  { %1390 = vst.msk [vmem:[#allocation2 + $0x8] sm:$0xc0] %vm769_vm5, %v1388_v51 }
0x25b8   :  { %v1392_v53 = vld [vmem:[#allocation2 + $0x8] sm:$0xff] }
0x25b9   :  { %v1398_v54 = vpack.c.bf16 %v1392_v53, %v1391_v52 }
0x25bb   :  { %2410 = vmatmul.msk.bf16.vlgmr.msrb.gmra.mxu2 %vm213_vm1, %v1398_v54 }
0x25bc   :  { %1900 = vmatpush.bf16.msrb.mxu2 %v2462_v46 }
0x25c0   :  { %1901 = vmatpush.bf16.msrb.mxu2 %v2461_v38 }
0x263e   :  { %v1433_v57 = vpop.f32.mrf.mxu2 }
0x263f   :  { %v3134_v49 = vadd.f32 %v3131_v12, %v1433_v57 }
0x2641   :  { %v1463_v58 = vadd.f32 %v1459_v55, %v3134_v49 }
0x2643   :  { %2612 = vtanh.f32 %v1463_v58  ;;  %v2419_v60 = vmul.f32 -1.442695, %v1463_v58 }
0x2645   :  { %2614 = vpow2.f32 %v2419_v60 }
0x2649   :  { %v2613_v59 = vpop.eup %2612 }
0x264a   :  { %1486 = vrot.lane.b32.xlu2 %v2613_v59, %s2749_s5 }
0x264b   :  { %v2615_v0 = vpop.eup %2614 }
0x264c   :  { %v1467_v1 = vadd.f32 1.0, %v2615_v0 }
0x264e   :  { %2616 = vrcp.f32 %v1467_v1  ;;  %v1479_v7 = vand.u32 2147483648, %v1467_v1  ;;  %vm1473_vm8 = vweird.f32 %v1467_v1  ;;  %v1477_v8 = vand.u32 2147483647, %v1467_v1 }
0x2650   :  { %v1480_v14 = vor.u32 1.1754944e-38, %v1479_v7  ;;  %vm1478_vm10 = vcmp.eq.f32.partialorder %v1477_v8, 8.507059e+37 }
0x2654   :  { %v2617_v2 = vpop.eup %2616 }
0x2655   :  { %v1469_v3 = vmul.f32 %v2617_v2, %v1467_v1  ;;  %vm1474_vm3 = vweird.f32 %v2617_v2 }
0x2656   :  { %vm1475_vm9 = vmor %vm1473_vm8, %vm1474_vm3 }
0x2657   :  { %v1470_v4 = vsub.f32 1.0, %v1469_v3 }
0x2659   :  { %v1471_v5 = vmul.f32 %v2617_v2, %v1470_v4 }
0x265b   :  { %v1472_v6 = vadd.f32 %v2617_v2, %v1471_v5 }
0x265d   :  { %v1476_v13 = vsel %vm1475_vm9, %v2617_v2, %v1472_v6 }
0x265e   :  { %v1481_v15 = vsel %vm1478_vm10, %v1480_v14, %v1476_v13 }
0x265f   :  { %v1484_v17 = vmul.f32 0.0, %v1481_v15 }
0x26a4   :  { %v1487_v35 = vpop.permute.xlu2 %1486 }
0x26a5   :  { %v1489_v16 = vmul.f32 %v1487_v35, %v1481_v15 }
0x26a7   :  { %1491 = vrot.lane.b32.xlu0 %v1489_v16, %s2750_s15 }
0x2719   :  { %v1492_v18 = vpop.permute.xlu0 %1491 }
0x271a   :  { %v1494_v40 = vadd.f32 %v1492_v18, %v1484_v17 }
0x271c   :  { %2618 = vtanh.f32 %v1494_v40  ;;  %v1546_v44 = vrot.slane %v1494_v40, 6 }
0x2722   :  { %v2619_v63 = vpop.eup %2618 }
0x2723   :  { %1497 = vrot.lane.b32.xlu1 %v2619_v63, %s2749_s5 }
0x2795   :  { %v1498_v19 = vpop.permute.xlu1 %1497 }
0x2796   :  { %v3140_v30 = vmul.f32 %v1498_v19, %v1481_v15 }
0x2798   :  { %v1501_v20 = vpack.c.bf16 %v3140_v30, %v3140_v30 }
0x279a   :  { %1503 = vrot.lane.b32.xlu2 %v1501_v20, %s2750_s15 }
0x27f4   :  { %v1504_v21 = vpop.permute.xlu2 %1503 }
0x27f5   :  { %2420 = vmatmul.msk.bf16.vlgmr.msra.gmra.mxu0 %vm213_vm1, %v1504_v21  ;;  %v1435_v21 = vpop.f32.mrf.mxu2 }
0x2872   :  { %v1517_v22 = vpop.f32.mrf.mxu0 }
0x2873   :  { %v1522_v45 = vrot.slane %v1517_v22, 6 }
0x2875   :  { %v1524_v23 = vadd.f32 %v1522_v45, %v3134_v49 }
0x2877   :  { %2620 = vtanh.f32 %v1524_v23  ;;  %v2421_v26 = vmul.f32 -1.442695, %v1524_v23 }
0x2879   :  { %2622 = vpow2.f32 %v2421_v26 }
0x287a   :  { %v1519_v24 = vpop.f32.mrf.mxu0 }
0x287d   :  { %v2621_v25 = vpop.eup %2620 }
0x287e   :  { %1550 = vrot.lane.b32.xlu0 %v2621_v25, %s2749_s5 }
0x287f   :  { %v2623_v33 = vpop.eup %2622 }
0x2880   :  { %v1528_v11 = vadd.f32 1.0, %v2623_v33 }
0x2882   :  { %2624 = vrcp.f32 %v1528_v11  ;;  %v1540_v29 = vand.u32 2147483648, %v1528_v11  ;;  %vm1534_vm12 = vweird.f32 %v1528_v11  ;;  %v1538_v61 = vand.u32 2147483647, %v1528_v11 }
0x2884   :  { %v1541_v37 = vor.u32 1.1754944e-38, %v1540_v29  ;;  %vm1539_vm14 = vcmp.eq.f32.partialorder %v1538_v61, 8.507059e+37 }
0x2888   :  { %v2625_v27 = vpop.eup %2624 }
0x2889   :  { %v1530_v41 = vmul.f32 %v2625_v27, %v1528_v11  ;;  %vm1535_vm11 = vweird.f32 %v2625_v27 }
0x288a   :  { %vm1536_vm13 = vmor %vm1534_vm12, %vm1535_vm11 }
0x288b   :  { %v1531_v31 = vsub.f32 1.0, %v1530_v41 }
0x288d   :  { %v1532_v32 = vmul.f32 %v2625_v27, %v1531_v31 }
0x288f   :  { %v1533_v34 = vadd.f32 %v2625_v27, %v1532_v32 }
0x2891   :  { %v1537_v36 = vsel %vm1536_vm13, %v2625_v27, %v1533_v34 }
0x2892   :  { %v1542_v42 = vsel %vm1539_vm14, %v1541_v37, %v1537_v36 }
0x2893   :  { %v1548_v39 = vmul.f32 %v1546_v44, %v1542_v42 }
0x28f0   :  { %v1551_v62 = vpop.permute.xlu0 %1550 }
0x28f1   :  { %v1553_v43 = vmul.f32 %v1551_v62, %v1542_v42 }
0x28f3   :  { %1555 = vrot.lane.b32.xlu1 %v1553_v43, %s2750_s15 }
0x2965   :  { %v1556_v10 = vpop.permute.xlu1 %1555 }
0x2966   :  { %v1558_v46 = vadd.f32 %v1556_v10, %v1548_v39 }
0x2968   :  { %2626 = vtanh.f32 %v1558_v46  ;;  %v1611_v14 = vrot.slane %v1558_v46, 6 }
0x296e   :  { %v2627_v47 = vpop.eup %2626 }
0x296f   :  { %1561 = vrot.lane.b32.xlu2 %v2627_v47, %s2749_s5 }
0x29c9   :  { %v1562_v48 = vpop.permute.xlu2 %1561 }
0x29ca   :  { %v3150_v9 = vmul.f32 %v1562_v48, %v1542_v42 }
0x29cc   :  { %v1565_v28 = vpack.c.bf16 %v3150_v9, %v3150_v9 }
0x29ce   :  { %v1567_v38 = vrot.slane %v1565_v28, 1 }
0x29d0   :  { %1568 = vrot.lane.b32.xlu0 %v1567_v38, %s2750_s15 }
0x2a42   :  { %v1569_v50 = vpop.permute.xlu0 %1568 }
0x2a43   :  { %2422 = vmatmul.msk.bf16.vlgmr.msra.gmra.mxu1 %vm213_vm1, %v1569_v50 }
0x2ac0   :  { %v1582_v51 = vpop.f32.mrf.mxu1 }
0x2ac1   :  { %v1587_v52 = vrot.slane %v1582_v51, 4  ;;  %v3177_v51 = vadd.f32 %v3131_v12, %v1435_v21 }
0x2ac3   :  { %v1589_v53 = vadd.f32 %v1587_v52, %v3134_v49 }
0x2ac5   :  { %2628 = vtanh.f32 %v1589_v53  ;;  %v2423_v56 = vmul.f32 -1.442695, %v1589_v53 }
0x2ac7   :  { %2630 = vpow2.f32 %v2423_v56 }
0x2ac8   :  { %v1584_v54 = vpop.f32.mrf.mxu1 }
0x2acb   :  { %v2629_v55 = vpop.eup %2628 }
0x2acc   :  { %1615 = vrot.lane.b32.xlu1 %v2629_v55, %s2749_s5 }
0x2acd   :  { %v2631_v57 = vpop.eup %2630 }
0x2ace   :  { %v1593_v58 = vadd.f32 1.0, %v2631_v57 }
0x2ad0   :  { %2632 = vrcp.f32 %v1593_v58  ;;  %v1605_v3 = vand.u32 2147483648, %v1593_v58  ;;  %vm1599_vm0 = vweird.f32 %v1593_v58  ;;  %v1603_v4 = vand.u32 2147483647, %v1593_v58 }
0x2ad2   :  { %v1606_v6 = vor.u32 1.1754944e-38, %v1605_v3  ;;  %vm1604_vm3 = vcmp.eq.f32.partialorder %v1603_v4, 8.507059e+37 }
0x2ad6   :  { %v2633_v59 = vpop.eup %2632 }
0x2ad7   :  { %v1595_v60 = vmul.f32 %v2633_v59, %v1593_v58  ;;  %vm1600_vm15 = vweird.f32 %v2633_v59 }
0x2ad8   :  { %vm1601_vm2 = vmor %vm1599_vm0, %vm1600_vm15 }
0x2ad9   :  { %v1596_v0 = vsub.f32 1.0, %v1595_v60 }
0x2adb   :  { %v1597_v1 = vmul.f32 %v2633_v59, %v1596_v0 }
0x2add   :  { %v1598_v2 = vadd.f32 %v2633_v59, %v1597_v1 }
0x2adf   :  { %v1602_v5 = vsel %vm1601_vm2, %v2633_v59, %v1598_v2 }
0x2ae0   :  { %v1607_v8 = vsel %vm1604_vm3, %v1606_v6, %v1602_v5 }
0x2ae1   :  { %v1613_v35 = vmul.f32 %v1611_v14, %v1607_v8 }
0x2b3e   :  { %v1616_v7 = vpop.permute.xlu1 %1615 }
0x2b3f   :  { %v1618_v13 = vmul.f32 %v1616_v7, %v1607_v8 }
0x2b41   :  { %1620 = vrot.lane.b32.xlu2 %v1618_v13, %s2750_s15 }
0x2b9b   :  { %v1621_v15 = vpop.permute.xlu2 %1620 }
0x2b9c   :  { %v1623_v16 = vadd.f32 %v1621_v15, %v1613_v35 }
0x2b9e   :  { %2634 = vtanh.f32 %v1623_v16  ;;  %v1676_v43 = vrot.slane %v1623_v16, 6 }
0x2ba4   :  { %v2635_v17 = vpop.eup %2634 }
0x2ba5   :  { %1626 = vrot.lane.b32.xlu0 %v2635_v17, %s2749_s5 }
0x2c17   :  { %v1627_v18 = vpop.permute.xlu0 %1626 }
0x2c18   :  { %v3160_v40 = vmul.f32 %v1627_v18, %v1607_v8 }
0x2c1a   :  { %v1630_v63 = vpack.c.bf16 %v3160_v40, %v3160_v40 }
0x2c1c   :  { %v1632_v19 = vrot.slane %v1630_v63, 2 }
0x2c1e   :  { %1633 = vrot.lane.b32.xlu1 %v1632_v19, %s2750_s15 }
0x2c90   :  { %v1634_v20 = vpop.permute.xlu1 %1633 }
0x2c91   :  { %2424 = vmatmul.msk.bf16.vlgmr.msra.gmra.mxu2 %vm213_vm1, %v1634_v20 }
0x2d14   :  { %v1647_v22 = vpop.f32.mrf.mxu2 }
0x2d15   :  { %v1652_v45 = vrot.slane %v1647_v22, 2 }
0x2d17   :  { %v1654_v23 = vadd.f32 %v1652_v45, %v3134_v49 }
0x2d19   :  { %2636 = vtanh.f32 %v1654_v23  ;;  %v2425_v26 = vmul.f32 -1.442695, %v1654_v23 }
0x2d1b   :  { %2638 = vpow2.f32 %v2425_v26 }
0x2d1c   :  { %v1649_v24 = vpop.f32.mrf.mxu2 }
0x2d1f   :  { %v2637_v25 = vpop.eup %2636 }
0x2d20   :  { %1680 = vrot.lane.b32.xlu2 %v2637_v25, %s2749_s5 }
0x2d21   :  { %v2639_v33 = vpop.eup %2638 }
0x2d22   :  { %v1658_v11 = vadd.f32 1.0, %v2639_v33 }
0x2d24   :  { %2640 = vrcp.f32 %v1658_v11  ;;  %v1670_v29 = vand.u32 2147483648, %v1658_v11  ;;  %vm1664_vm9 = vweird.f32 %v1658_v11  ;;  %v1668_v61 = vand.u32 2147483647, %v1658_v11 }
0x2d26   :  { %v1671_v36 = vor.u32 1.1754944e-38, %v1670_v29  ;;  %vm1669_vm11 = vcmp.eq.f32.partialorder %v1668_v61, 8.507059e+37 }
0x2d2a   :  { %v2641_v27 = vpop.eup %2640 }
0x2d2b   :  { %v1660_v41 = vmul.f32 %v2641_v27, %v1658_v11  ;;  %vm1665_vm8 = vweird.f32 %v2641_v27 }
0x2d2c   :  { %vm1666_vm10 = vmor %vm1664_vm9, %vm1665_vm8 }
0x2d2d   :  { %v1661_v31 = vsub.f32 1.0, %v1660_v41 }
0x2d2f   :  { %v1662_v32 = vmul.f32 %v2641_v27, %v1661_v31 }
0x2d31   :  { %v1663_v34 = vadd.f32 %v2641_v27, %v1662_v32 }
0x2d33   :  { %v1667_v49 = vsel %vm1666_vm10, %v2641_v27, %v1663_v34 }
0x2d34   :  { %v1672_v62 = vsel %vm1669_vm11, %v1671_v36, %v1667_v49 }
0x2d35   :  { %v1678_v44 = vmul.f32 %v1676_v43, %v1672_v62 }
0x2d7a   :  { %v1681_v37 = vpop.permute.xlu2 %1680 }
0x2d7b   :  { %v1683_v42 = vmul.f32 %v1681_v37, %v1672_v62 }
0x2d7d   :  { %1685 = vrot.lane.b32.xlu0 %v1683_v42, %s2750_s15 }
0x2def   :  { %v1686_v39 = vpop.permute.xlu0 %1685 }
0x2df0   :  { %v1688_v10 = vadd.f32 %v1686_v39, %v1678_v44 }
0x2df2   :  { %2642 = vtanh.f32 %v1688_v10  ;;  %v1738_v13 = vrot.slane %v1688_v10, 6 }
0x2df8   :  { %v2643_v46 = vpop.eup %2642 }
0x2df9   :  { %1691 = vrot.lane.b32.xlu1 %v2643_v46, %s2749_s5 }
0x2e6b   :  { %v1692_v47 = vpop.permute.xlu1 %1691 }
0x2e6c   :  { %v3170_v48 = vmul.f32 %v1692_v47, %v1672_v62 }
0x2e6e   :  { %v1695_v28 = vpack.c.bf16 %v3170_v48, %v3170_v48 }
0x2e70   :  { %v1697_v38 = vrot.slane %v1695_v28, 3 }
0x2e72   :  { %1698 = vrot.lane.b32.xlu2 %v1697_v38, %s2750_s15 }
0x2ecc   :  { %v1699_v50 = vpop.permute.xlu2 %1698 }
0x2ecd   :  { %2426 = vmatmul.msk.bf16.vlgmr.msra.gmra.mxu3 %vm213_vm1, %v1699_v50 }
0x2f50   :  { %v1712_v52 = vpop.f32.mrf.mxu3 }
0x2f51   :  { %v1716_v53 = vadd.f32 %v1712_v52, %v3177_v51 }
0x2f53   :  { %2644 = vtanh.f32 %v1716_v53  ;;  %v2427_v56 = vmul.f32 -1.442695, %v1716_v53 }
0x2f55   :  { %2646 = vpow2.f32 %v2427_v56 }
0x2f58   :  { %v1714_v54 = vpop.f32.mrf.mxu3 }
0x2f59   :  { %v2645_v55 = vpop.eup %2644 }
0x2f5a   :  { %1742 = vrot.lane.b32.xlu0 %v2645_v55, %s2749_s5 }
0x2f5b   :  { %v2647_v57 = vpop.eup %2646 }
0x2f5c   :  { %v1720_v58 = vadd.f32 1.0, %v2647_v57 }
0x2f5e   :  { %2648 = vrcp.f32 %v1720_v58  ;;  %v1732_v12 = vand.u32 2147483648, %v1720_v58  ;;  %vm1726_vm13 = vweird.f32 %v1720_v58  ;;  %v1730_v3 = vand.u32 2147483647, %v1720_v58 }
0x2f60   :  { %v1733_v5 = vor.u32 1.1754944e-38, %v1732_v12  ;;  %vm1731_vm15 = vcmp.eq.f32.partialorder %v1730_v3, 8.507059e+37 }
0x2f64   :  { %v2649_v59 = vpop.eup %2648 }
0x2f65   :  { %v1722_v60 = vmul.f32 %v2649_v59, %v1720_v58  ;;  %vm1727_vm12 = vweird.f32 %v2649_v59 }
0x2f66   :  { %vm1728_vm14 = vmor %vm1726_vm13, %vm1727_vm12 }
0x2f67   :  { %v1723_v0 = vsub.f32 1.0, %v1722_v60 }
0x2f69   :  { %v1724_v1 = vmul.f32 %v2649_v59, %v1723_v0 }
0x2f6b   :  { %v1725_v2 = vadd.f32 %v2649_v59, %v1724_v1 }
0x2f6d   :  { %v1729_v4 = vsel %vm1728_vm14, %v2649_v59, %v1725_v2 }
0x2f6e   :  { %v1734_v7 = vsel %vm1731_vm15, %v1733_v5, %v1729_v4 }
0x2f6f   :  { %v1740_v14 = vmul.f32 %v1738_v13, %v1734_v7 }
0x2fcc   :  { %v1743_v6 = vpop.permute.xlu0 %1742 }
0x2fcd   :  { %v1745_v8 = vmul.f32 %v1743_v6, %v1734_v7 }
0x2fcf   :  { %1747 = vrot.lane.b32.xlu1 %v1745_v8, %s2750_s15 }
0x3041   :  { %v1748_v35 = vpop.permute.xlu1 %1747 }
0x3042   :  { %v1750_v15 = vadd.f32 %v1748_v35, %v1740_v14 }
0x3044   :  { %2650 = vtanh.f32 %v1750_v15  ;;  %v1802_v62 = vrot.slane %v1750_v15, 6 }
0x304a   :  { %v2651_v16 = vpop.eup %2650 }
0x304b   :  { %1753 = vrot.lane.b32.xlu2 %v2651_v16, %s2749_s5 }
0x30a5   :  { %v1754_v17 = vpop.permute.xlu2 %1753 }
0x30a6   :  { %v3183_v18 = vmul.f32 %v1754_v17, %v1734_v7 }
0x30a8   :  { %v1757_v63 = vpack.c.bf16 %v3183_v18, %v3183_v18 }
0x30aa   :  { %1759 = vrot.lane.b32.xlu0 %v1757_v63, %s2750_s15 }
0x311c   :  { %v1760_v19 = vpop.permute.xlu0 %1759 }
0x311d   :  { %2428 = vmatmul.msk.bf16.vlgmr.msrb.gmra.mxu0 %vm213_vm1, %v1760_v19 }
0x319a   :  { %v1773_v20 = vpop.f32.mrf.mxu0 }
0x319b   :  { %v1778_v21 = vrot.slane %v1773_v20, 6 }
0x319d   :  { %v1780_v22 = vadd.f32 %v1778_v21, %v3177_v51  ;;  %v2481_v21 = vld [vmem:[%s3288_s9] ss:$0 sm:$0xff] }
0x319f   :  { %2652 = vtanh.f32 %v1780_v22  ;;  %v2429_v24 = vmul.f32 -1.442695, %v1780_v22 }
0x31a1   :  { %2654 = vpow2.f32 %v2429_v24 }
0x31a2   :  { %v1775_v45 = vpop.f32.mrf.mxu0 }
0x31a5   :  { %v2653_v23 = vpop.eup %2652 }
0x31a6   :  { %1806 = vrot.lane.b32.xlu1 %v2653_v23, %s2749_s5 }
0x31a7   :  { %v2655_v25 = vpop.eup %2654 }
0x31a8   :  { %v1784_v26 = vadd.f32 1.0, %v2655_v25 }
0x31aa   :  { %2656 = vrcp.f32 %v1784_v26  ;;  %v1796_v32 = vand.u32 2147483648, %v1784_v26  ;;  %vm1790_vm2 = vweird.f32 %v1784_v26  ;;  %v1794_v34 = vand.u32 2147483647, %v1784_v26 }
0x31ac   :  { %v1797_v61 = vor.u32 1.1754944e-38, %v1796_v32  ;;  %vm1795_vm8 = vcmp.eq.f32.partialorder %v1794_v34, 8.507059e+37 }
0x31b0   :  { %v2657_v33 = vpop.eup %2656 }
0x31b1   :  { %v1786_v11 = vmul.f32 %v2657_v33, %v1784_v26  ;;  %vm1791_vm0 = vweird.f32 %v2657_v33 }
0x31b2   :  { %vm1792_vm3 = vmor %vm1790_vm2, %vm1791_vm0 }
0x31b3   :  { %v1787_v27 = vsub.f32 1.0, %v1786_v11 }
0x31b5   :  { %v1788_v41 = vmul.f32 %v2657_v33, %v1787_v27 }
0x31b7   :  { %v1789_v31 = vadd.f32 %v2657_v33, %v1788_v41 }
0x31b9   :  { %v1793_v29 = vsel %vm1792_vm3, %v2657_v33, %v1789_v31 }
0x31ba   :  { %v1798_v36 = vsel %vm1795_vm8, %v1797_v61, %v1793_v29 }
0x31bb   :  { %v1804_v42 = vmul.f32 %v1802_v62, %v1798_v36 }
0x3218   :  { %v1807_v49 = vpop.permute.xlu1 %1806 }
0x3219   :  { %v1809_v37 = vmul.f32 %v1807_v49, %v1798_v36 }
0x321b   :  { %1811 = vrot.lane.b32.xlu2 %v1809_v37, %s2750_s15 }
0x3275   :  { %v1812_v43 = vpop.permute.xlu2 %1811 }
0x3276   :  { %v1814_v44 = vadd.f32 %v1812_v43, %v1804_v42 }
0x3278   :  { %2658 = vtanh.f32 %v1814_v44  ;;  %v1867_v13 = vrot.slane %v1814_v44, 6 }
0x327e   :  { %v2659_v39 = vpop.eup %2658 }
0x327f   :  { %1817 = vrot.lane.b32.xlu0 %v2659_v39, %s2749_s5 }
0x32f1   :  { %v1818_v10 = vpop.permute.xlu0 %1817 }
0x32f2   :  { %v3193_v46 = vmul.f32 %v1818_v10, %v1798_v36 }
0x32f4   :  { %v1821_v47 = vpack.c.bf16 %v3193_v46, %v3193_v46 }
0x32f6   :  { %v1823_v28 = vrot.slane %v1821_v47, 1 }
0x32f8   :  { %1824 = vrot.lane.b32.xlu1 %v1823_v28, %s2750_s15 }
0x336a   :  { %v1825_v38 = vpop.permute.xlu1 %1824 }
0x336b   :  { %2430 = vmatmul.msk.bf16.vlgmr.msrb.gmra.mxu1 %vm213_vm1, %v1825_v38 }
0x33e8   :  { %v1838_v50 = vpop.f32.mrf.mxu1 }
0x33e9   :  { %v1843_v52 = vrot.slane %v1838_v50, 4 }
0x33eb   :  { %v1845_v53 = vadd.f32 %v1843_v52, %v3177_v51 }
0x33ed   :  { %2660 = vtanh.f32 %v1845_v53  ;;  %v2431_v56 = vmul.f32 -1.442695, %v1845_v53 }
0x33ef   :  { %2662 = vpow2.f32 %v2431_v56 }
0x33f0   :  { %v1840_v54 = vpop.f32.mrf.mxu1 }
0x33f3   :  { %v2661_v55 = vpop.eup %2660 }
0x33f4   :  { %1871 = vrot.lane.b32.xlu2 %v2661_v55, %s2749_s5 }
0x33f5   :  { %v2663_v57 = vpop.eup %2662 }
0x33f6   :  { %v1849_v58 = vadd.f32 1.0, %v2663_v57 }
0x33f8   :  { %2664 = vrcp.f32 %v1849_v58  ;;  %v1861_v12 = vand.u32 2147483648, %v1849_v58  ;;  %vm1855_vm10 = vweird.f32 %v1849_v58  ;;  %v1859_v3 = vand.u32 2147483647, %v1849_v58 }
0x33fa   :  { %v1862_v5 = vor.u32 1.1754944e-38, %v1861_v12  ;;  %vm1860_vm12 = vcmp.eq.f32.partialorder %v1859_v3, 8.507059e+37 }
0x33fe   :  { %v2665_v59 = vpop.eup %2664 }
0x33ff   :  { %v1851_v60 = vmul.f32 %v2665_v59, %v1849_v58  ;;  %vm1856_vm9 = vweird.f32 %v2665_v59 }
0x3400   :  { %vm1857_vm11 = vmor %vm1855_vm10, %vm1856_vm9 }
0x3401   :  { %v1852_v0 = vsub.f32 1.0, %v1851_v60 }
0x3403   :  { %v1853_v1 = vmul.f32 %v2665_v59, %v1852_v0 }
0x3405   :  { %v1854_v2 = vadd.f32 %v2665_v59, %v1853_v1 }
0x3407   :  { %v1858_v4 = vsel %vm1857_vm11, %v2665_v59, %v1854_v2 }
0x3408   :  { %v1863_v7 = vsel %vm1860_vm12, %v1862_v5, %v1858_v4 }
0x3409   :  { %v1869_v14 = vmul.f32 %v1867_v13, %v1863_v7 }
0x344e   :  { %v1872_v6 = vpop.permute.xlu2 %1871 }
0x344f   :  { %v1874_v8 = vmul.f32 %v1872_v6, %v1863_v7 }
0x3451   :  { %1876 = vrot.lane.b32.xlu0 %v1874_v8, %s2750_s15 }
0x34c3   :  { %v1877_v35 = vpop.permute.xlu0 %1876 }
0x34c4   :  { %v1879_v15 = vadd.f32 %v1877_v35, %v1869_v14 }
0x34c6   :  { %2666 = vtanh.f32 %v1879_v15  ;;  %v1932_v52 = vrot.slane %v1879_v15, 6 }
0x34cc   :  { %v2667_v16 = vpop.eup %2666 }
0x34cd   :  { %1882 = vrot.lane.b32.xlu1 %v2667_v16, %s2749_s5 }
0x353f   :  { %v1883_v17 = vpop.permute.xlu1 %1882 }
0x3540   :  { %v3203_v63 = vmul.f32 %v1883_v17, %v1863_v7 }
0x3542   :  { %v1886_v19 = vpack.c.bf16 %v3203_v63, %v3203_v63 }
0x3544   :  { %v1888_v20 = vrot.slane %v1886_v19, 2  ;;  %v2482_v19 = vld [vmem:[#allocation3] ss:$0 sm:$0xff] }
0x3546   :  { %1889 = vrot.lane.b32.xlu2 %v1888_v20, %s2750_s15 }
0x354e   :  { %1954 = vrot.lane.b32.xlu2 %v2481_v21, %s2751_s30 }
0x35a0   :  { %v1890_v22 = vpop.permute.xlu2 %1889 }
0x35a1   :  { %2432 = vmatmul.msk.bf16.vlgmr.msrb.gmra.mxu2 %vm213_vm1, %v1890_v22 }
0x35a8   :  { %v1955_v45 = vpop.permute.xlu2 %1954 }
0x35a9   :  { %v1957_v23 = vmul.f32 %v1955_v45, %v3140_v30  ;;  %v1997_v24 = vmul.f32 %v1955_v45, %v3183_v18  ;;  %v1970_v10 = vmul.f32 %v1955_v45, %v3150_v9  ;;  %v1988_v47 = vmul.f32 %v1955_v45, %v3170_v48 }
0x35aa   :  { %v2015_v28 = vmul.f32 %v1955_v45, %v3203_v63  ;;  %v1979_v57 = vmul.f32 %v1955_v45, %v3160_v40  ;;  %v2006_v58 = vmul.f32 %v1955_v45, %v3193_v46 }
0x35ab   :  { %1959 = vrot.lane.b32.xlu2 %v1957_v23, %s2750_s15  ;;  %v2694_v23 = vld [vmem:[%s3280_s1] sm:$0xff] }
0x35b3   :  { %1999 = vrot.lane.b32.xlu2 %v1997_v24, %s2750_s15 }
0x3605   :  { %v1960_v38 = vpop.permute.xlu2 %1959 }
0x3606   :  { %v1962_v50 = vsel %vm751_vm4, %v1960_v38, 0.0 }
0x360d   :  { %v2000_v0 = vpop.permute.xlu2 %1999 }
0x360e   :  { %v2002_v1 = vsel %vm751_vm4, %v2000_v0, 0.0 }
0x3624   :  { %v1903_v25 = vpop.f32.mrf.mxu2 }
0x3625   :  { %v1908_v26 = vrot.slane %v1903_v25, 2 }
0x3627   :  { %v1910_v33 = vadd.f32 %v1908_v26, %v3177_v51 }
0x3629   :  { %2668 = vtanh.f32 %v1910_v33  ;;  %v2433_v41 = vmul.f32 -1.442695, %v1910_v33 }
0x362b   :  { %2670 = vpow2.f32 %v2433_v41 }
0x362c   :  { %v1905_v11 = vpop.f32.mrf.mxu2 }
0x362f   :  { %v2669_v27 = vpop.eup %2668 }
0x3630   :  { %1936 = vrot.lane.b32.xlu0 %v2669_v27, %s2749_s5 }
0x3631   :  { %v2671_v31 = vpop.eup %2670 }
0x3632   :  { %v1914_v32 = vadd.f32 1.0, %v2671_v31 }
0x3634   :  { %2672 = vrcp.f32 %v1914_v32  ;;  %v1926_v37 = vand.u32 2147483648, %v1914_v32  ;;  %vm1920_vm14 = vweird.f32 %v1914_v32  ;;  %v1924_v62 = vand.u32 2147483647, %v1914_v32 }
0x3636   :  { %v1927_v42 = vor.u32 1.1754944e-38, %v1926_v37  ;;  %vm1925_vm0 = vcmp.eq.f32.partialorder %v1924_v62, 8.507059e+37  ;;  %v2695_v37 = vld [vmem:[%s3280_s1 + $0x8] sm:$0xff] }
0x363a   :  { %v2673_v34 = vpop.eup %2672 }
0x363b   :  { %v1916_v29 = vmul.f32 %v2673_v34, %v1914_v32  ;;  %vm1921_vm13 = vweird.f32 %v2673_v34 }
0x363c   :  { %vm1922_vm15 = vmor %vm1920_vm14, %vm1921_vm13 }
0x363d   :  { %v1917_v61 = vsub.f32 1.0, %v1916_v29 }
0x363f   :  { %v1918_v49 = vmul.f32 %v2673_v34, %v1917_v61 }
0x3641   :  { %v1919_v36 = vadd.f32 %v2673_v34, %v1918_v49 }
0x3643   :  { %v1923_v51 = vsel %vm1922_vm15, %v2673_v34, %v1919_v36 }
0x3644   :  { %v1928_v44 = vsel %vm1925_vm0, %v1927_v42, %v1923_v51 }
0x3645   :  { %v1934_v53 = vmul.f32 %v1932_v52, %v1928_v44 }
0x36a2   :  { %v1937_v43 = vpop.permute.xlu0 %1936 }
0x36a3   :  { %v1939_v39 = vmul.f32 %v1937_v43, %v1928_v44 }
0x36a5   :  { %1941 = vrot.lane.b32.xlu1 %v1939_v39, %s2750_s15 }
0x36ad   :  { %1972 = vrot.lane.b32.xlu1 %v1970_v10, %s2750_s15 }
0x36b5   :  { %1990 = vrot.lane.b32.xlu1 %v1988_v47, %s2750_s15 }
0x36bd   :  { %2017 = vrot.lane.b32.xlu1 %v2015_v28, %s2750_s15 }
0x36e7   :  { %1963 = vadd.xlane.f32.xlu1 %v1962_v50 }
0x3717   :  { %v1942_v54 = vpop.permute.xlu1 %1941 }
0x3718   :  { %v1944_v55 = vadd.f32 %v1942_v54, %v1934_v53 }
0x371a   :  { %2674 = vtanh.f32 %v1944_v55 }
0x371f   :  { %v1973_v59 = vpop.permute.xlu1 %1972 }
0x3720   :  { %v2675_v56 = vpop.eup %2674  ;;  %v1975_v60 = vsel %vm757_vm7, %v1973_v59, 0.0 }
0x3721   :  { %1947 = vrot.lane.b32.xlu0 %v2675_v56, %s2749_s5 }
0x3727   :  { %v1991_v8 = vpop.permute.xlu1 %1990 }
0x3728   :  { %v1993_v13 = vsel %vm769_vm5, %v1991_v8, 0.0 }
0x3729   :  { %1981 = vrot.lane.b32.xlu0 %v1979_v57, %s2750_s15 }
0x372f   :  { %v2018_v14 = vpop.permute.xlu1 %2017 }
0x3730   :  { %v2020_v35 = vsel %vm763_vm6, %v2018_v14, 0.0 }
0x3731   :  { %2008 = vrot.lane.b32.xlu0 %v2006_v58, %s2750_s15 }
0x375a   :  { %v1964_v20 = vpop.xlane.xlu1 %1963 }
0x375b   :  { %1976 = vadd.xlane.f32.xlu0 %v1975_v60  ;;  %v1969_v25 = vadd.f32 %v2482_v19, %v1964_v20 }
0x3763   :  { %2003 = vadd.xlane.f32.xlu0 %v2002_v1 }
0x3793   :  { %v1948_v2 = vpop.permute.xlu0 %1947 }
0x3794   :  { %v3233_v12 = vmul.f32 %v1948_v2, %v1928_v44 }
0x3796   :  { %v2024_v3 = vmul.f32 %v1955_v45, %v3233_v12 }
0x3798   :  { %2026 = vrot.lane.b32.xlu2 %v2024_v3, %s2750_s15 }
0x379b   :  { %v1982_v4 = vpop.permute.xlu0 %1981 }
0x379c   :  { %v1984_v7 = vsel %vm763_vm6, %v1982_v4, 0.0 }
0x37a3   :  { %v2009_v5 = vpop.permute.xlu0 %2008 }
0x37a4   :  { %v2011_v6 = vsel %vm757_vm7, %v2009_v5, 0.0  ;;  %vm2033_vm7 = vcmp.gt.f32.partialorder %v2694_v23, 0.0 }
0x37a5   :  { %2012 = vadd.xlane.f32.xlu1 %v2011_v6  ;;  %v2034_v32 = vsel %vm2033_vm7, %v1969_v25, -1e+30 }
0x37c1   :  { %1985 = vadd.xlane.f32.xlu2 %v1984_v7 }
0x37c9   :  { %1994 = vadd.xlane.f32.xlu2 %v1993_v13 }
0x37ce   :  { %v1977_v17 = vpop.xlane.xlu0 %1976 }
0x37cf   :  { %v1978_v21 = vadd.f32 %v2482_v19, %v1977_v17 }
0x37d1   :  { %2021 = vadd.xlane.f32.xlu2 %v2020_v35  ;;  %v2035_v24 = vsel %vm2033_vm7, %v1978_v21, -1e+30 }
0x37d2   :  { %v2044_v33 = vrot.slane %v2035_v24, 2 }
0x37d4   :  { %v2046_v61 = vmax.f32 %v2034_v32, %v2044_v33 }
0x37d6   :  { %v2004_v27 = vpop.xlane.xlu0 %2003 }
0x37d7   :  { %v2005_v49 = vadd.f32 %v2482_v19, %v2004_v27 }
0x37f2   :  { %v2027_v15 = vpop.permute.xlu2 %2026 }
0x37f3   :  { %v2029_v16 = vsel %vm769_vm5, %v2027_v15, 0.0  ;;  %vm2038_vm5 = vcmp.gt.f32.partialorder %v2695_v37, 0.0 }
0x37f4   :  { %2030 = vadd.xlane.f32.xlu0 %v2029_v16  ;;  %v2039_v44 = vsel %vm2038_vm5, %v2005_v49, -1e+30 }
0x3818   :  { %v2013_v11 = vpop.xlane.xlu1 %2012 }
0x3819   :  { %v2014_v34 = vadd.f32 %v2482_v19, %v2013_v11 }
0x381b   :  { %v2040_v42 = vsel %vm2038_vm5, %v2014_v34, -1e+30 }
0x381c   :  { %v2057_v39 = vrot.slane %v2040_v42, 2 }
0x3834   :  { %v1986_v22 = vpop.xlane.xlu2 %1985 }
0x3835   :  { %v1987_v45 = vadd.f32 %v2482_v19, %v1986_v22 }
0x3837   :  { %v2036_v26 = vsel %vm2033_vm7, %v1987_v45, -1e+30 }
0x3838   :  { %v2048_v41 = vrot.slane %v2036_v26, 4 }
0x383a   :  { %v2050_v62 = vmax.f32 %v2046_v61, %v2048_v41 }
0x383c   :  { %v1995_v31 = vpop.xlane.xlu2 %1994 }
0x383d   :  { %v1996_v29 = vadd.f32 %v2482_v19, %v1995_v31 }
0x383f   :  { %v2037_v36 = vsel %vm2033_vm7, %v1996_v29, -1e+30 }
0x3840   :  { %v2052_v51 = vrot.slane %v2037_v36, 6 }
0x3842   :  { %v2054_v43 = vmax.f32 %v2050_v62, %v2052_v51 }
0x3844   :  { %v2055_v10 = vmax.f32 %v2054_v43, %v2039_v44  ;;  %v2022_v47 = vpop.xlane.xlu2 %2021  ;;  %v2466_v43 = vld [vmem:[%s3290_s11 + $0x8] sm:$0xff] }
0x3845   :  { %v2023_v28 = vadd.f32 %v2482_v19, %v2022_v47  ;;  %2238 = vmatpush.bf16.msrb.mxu3 %v2466_v43 }
0x3846   :  { %v2059_v38 = vmax.f32 %v2055_v10, %v2057_v39 }
0x3847   :  { %v2041_v50 = vsel %vm2038_vm5, %v2023_v28, -1e+30 }
0x3848   :  { %v2061_v52 = vrot.slane %v2041_v50, 4 }
0x384a   :  { %v2063_v53 = vmax.f32 %v2059_v38, %v2061_v52 }
0x3867   :  { %v2031_v54 = vpop.xlane.xlu0 %2030 }
0x3868   :  { %v2032_v55 = vadd.f32 %v2482_v19, %v2031_v54 }
0x386a   :  { %v2042_v56 = vsel %vm2038_vm5, %v2032_v55, -1e+30 }
0x386b   :  { %v2065_v57 = vrot.slane %v2042_v56, 6 }
0x386d   :  { %v2067_v58 = vmax.f32 %v2063_v53, %v2065_v57 }
0x386f   :  { %v2068_v59 = vsub.f32 %v2034_v32, %v2067_v58  ;;  %v2080_v60 = vrot.slane %v2067_v58, 6  ;;  %v2098_v0 = vrot.slane %v2067_v58, 4  ;;  %v2116_v1 = vrot.slane %v2067_v58, 2 }
0x3870   :  { %v2134_v2 = vsub.f32 %v2039_v44, %v2067_v58  ;;  %v2465_v44 = vld [vmem:[%s3290_s11] sm:$0xff] }
0x3871   :  { %v2069_v3 = vmul.f32 1.442695, %v2068_v59  ;;  %v2082_v4 = vsub.f32 %v2035_v24, %v2080_v60  ;;  %v2100_v5 = vsub.f32 %v2036_v26, %v2098_v0  ;;  %v2118_v6 = vsub.f32 %v2037_v36, %v2116_v1  ;;  %2239 = vmatpush.bf16.msrb.mxu3 %v2465_v44 }
0x3872   :  { %v2145_v7 = vsub.f32 %v2040_v42, %v2080_v60  ;;  %v2161_v8 = vsub.f32 %v2041_v50, %v2098_v0  ;;  %v2177_v13 = vsub.f32 %v2042_v56, %v2116_v1  ;;  %v2135_v17 = vmul.f32 1.442695, %v2134_v2 }
0x3873   :  { %2676 = vpow2.f32 %v2069_v3  ;;  %v2083_v14 = vmul.f32 1.442695, %v2082_v4  ;;  %v2101_v35 = vmul.f32 1.442695, %v2100_v5  ;;  %v2119_v15 = vmul.f32 1.442695, %v2118_v6 }
0x3874   :  { %v2146_v16 = vmul.f32 1.442695, %v2145_v7  ;;  %v2162_v20 = vmul.f32 1.442695, %v2161_v8  ;;  %v2178_v22 = vmul.f32 1.442695, %v2177_v13 }
0x3875   :  { %2678 = vpow2.f32 %v2083_v14 }
0x3876   :  { %2680 = vpow2.f32 %v2101_v35 }
0x3877   :  { %2682 = vpow2.f32 %v2119_v15 }
0x3878   :  { %2684 = vpow2.f32 %v2146_v16 }
0x3879   :  { %v2677_v19 = vpop.eup %2676  ;;  %2686 = vpow2.f32 %v2135_v17 }
0x387a   :  { %2074 = vperm.xlu2 %2474, %v2677_v19   ;;  %2688 = vpow2.f32 %v2162_v20 }
0x387b   :  { %v2679_v21 = vpop.eup %2678  ;;  %2690 = vpow2.f32 %v2178_v22 }
0x387c   :  { %v2681_v45 = vpop.eup %2680  ;;  %v2086_v23 = vrot.slane %v2679_v21, 2  ;;  %2090 = vperm.xlu1 %2475, %v2679_v21  }
0x387d   :  { %v2683_v24 = vpop.eup %2682  ;;  %2108 = vperm.xlu0 %2473, %v2681_v45   ;;  %v2104_v26 = vrot.slane %v2681_v45, 4 }
0x387e   :  { %v2088_v25 = vadd.f32 %v2677_v19, %v2086_v23  ;;  %v2122_v11 = vrot.slane %v2683_v24, 6  ;;  %v2685_v27 = vpop.eup %2684 }
0x387f   :  { %v2687_v41 = vpop.eup %2686  ;;  %v2149_v29 = vrot.slane %v2685_v27, 2 }
0x3880   :  { %v2106_v33 = vadd.f32 %v2104_v26, %v2088_v25  ;;  %v2689_v32 = vpop.eup %2688 }
0x3881   :  { %v2691_v61 = vpop.eup %2690  ;;  %v2165_v36 = vrot.slane %v2689_v32, 4 }
0x3882   :  { %v2124_v31 = vadd.f32 %v2122_v11, %v2106_v33  ;;  %2153 = vperm.xlu2 %2474, %v2685_v27   ;;  %v2181_v62 = vrot.slane %v2691_v61, 6 }
0x3884   :  { %v2137_v34 = vadd.f32 %v2687_v41, %v2124_v31  ;;  %2126 = vperm.xlu1 %2475, %v2683_v24  }
0x3885   :  { %2140 = vperm.xlu0 %2473, %v2687_v41  }
0x3886   :  { %v2151_v49 = vadd.f32 %v2149_v29, %v2137_v34 }
0x3888   :  { %v2167_v37 = vadd.f32 %v2165_v36, %v2151_v49 }
0x388a   :  { %v2183_v51 = vadd.f32 %v2181_v62, %v2167_v37 }
0x388c   :  { %2692 = vrcp.f32 %v2183_v51  ;;  %2169 = vperm.xlu1 %2475, %v2689_v32  }
0x388d   :  { %2185 = vperm.xlu0 %2473, %v2691_v61  }
0x3892   :  { %v2693_v42 = vpop.eup %2692 }
0x3893   :  { %2196 = vperm.xlu2 %2474, %v2693_v42  }
0x38d4   :  { %v2075_v39 = vpop.permute.xlu2 %2074 }
0x38d5   :  { %v2077_v50 = vmul.f32 %v2075_v39, %v3140_v30 }
0x38dc   :  { %v2154_v58 = vpop.permute.xlu2 %2153 }
0x38dd   :  { %v2156_v0 = vmul.f32 %v2154_v58, %v3193_v46 }
0x38df   :  { %v2158_v4 = vrot.slane %v2156_v0, 2 }
0x38ed   :  { %v2197_v14 = vpop.permute.xlu2 %2196 }
0x38ee   :  { %v2091_v10 = vpop.permute.xlu1 %2090 }
0x38ef   :  { %v2109_v47 = vpop.permute.xlu0 %2108  ;;  %v2093_v28 = vmul.f32 %v2091_v10, %v3150_v9 }
0x38f0   :  { %v2111_v52 = vmul.f32 %v2109_v47, %v3160_v40 }
0x38f1   :  { %v2095_v38 = vrot.slane %v2093_v28, 2 }
0x38f2   :  { %v2113_v55 = vrot.slane %v2111_v52, 4 }
0x38f3   :  { %v2097_v53 = vadd.f32 %v2095_v38, %v2077_v50 }
0x38f5   :  { %v2115_v59 = vadd.f32 %v2113_v55, %v2097_v53 }
0x38f6   :  { %v2127_v54 = vpop.permute.xlu1 %2126 }
0x38f7   :  { %v2141_v56 = vpop.permute.xlu0 %2140  ;;  %v2129_v57 = vmul.f32 %v2127_v54, %v3170_v48 }
0x38f8   :  { %v2143_v1 = vmul.f32 %v2141_v56, %v3183_v18 }
0x38f9   :  { %v2131_v60 = vrot.slane %v2129_v57, 6 }
0x38fb   :  { %v2133_v9 = vadd.f32 %v2131_v60, %v2115_v59 }
0x38fd   :  { %v2144_v2 = vadd.f32 %v2143_v1, %v2133_v9 }
0x38fe   :  { %v2170_v3 = vpop.permute.xlu1 %2169 }
0x38ff   :  { %v2186_v30 = vpop.permute.xlu0 %2185  ;;  %v2172_v40 = vmul.f32 %v2170_v3, %v3203_v63  ;;  %v2160_v6 = vadd.f32 %v2158_v4, %v2144_v2  ;;  %v2483_v63 = vld [vmem:[%s3291_s12] ss:$0 sm:$0xff] }
0x3900   :  { %v2188_v5 = vmul.f32 %v2186_v30, %v3233_v12 }
0x3901   :  { %v2174_v7 = vrot.slane %v2172_v40, 4 }
0x3902   :  { %v2190_v8 = vrot.slane %v2188_v5, 6 }
0x3903   :  { %v2176_v48 = vadd.f32 %v2174_v7, %v2160_v6 }
0x3905   :  { %v2192_v13 = vadd.f32 %v2190_v8, %v2176_v48 }
0x3907   :  { %v2199_v35 = vmul.f32 %v2197_v14, %v2192_v13 }
0x3909   :  { %2201 = vrot.lane.b32.xlu0 %v2199_v35, %s2750_s15  ;;  %v2205_v46 = vpack.c.bf16 %v2199_v35, %v2199_v35 }
0x390b   :  { %2215 = vrot.lane.b32.xlu1 %v2205_v46, %s2750_s15  ;;  %s2753_s15 = smov [#allocation6]  }
0x390c   :  { %s2263_s23 = sshll.u32 %s2753_s15, 4  ;;  %s2264_s23 = int_to_ptr.vmem [resolvable:$true] %s2263_s23 }
0x397b   :  { %v2202_v18 = vpop.permute.xlu0 %2201 }
0x397c   :  { %2204 = vst.msk [vmem:[#allocation4] sm:$0x3] %vm751_vm4, %v2202_v18 }
0x397d   :  { %v2216_v15 = vpop.permute.xlu1 %2215  ;;  %2257 = dma.vmem_to_hbm [thread:$0]  %s2253_s21, 32, %s2255_s4, [#allocation5]  }
0x397e   :  { %2442 = vmatmul.msk.bf16.vlgmr.msrb.gmra.mxu3 %vm213_vm1, %v2216_v15  ;;  %vm2245_vm1 = vcmask 25600  }
0x3a01   :  { %v2241_v12 = vpop.f32.mrf.mxu3 }
0x3a02   :  { %v2242_v16 = vadd.f32 %v2483_v63, %v2241_v12 }
0x3a04   :  { %2246 = vst.msk [vmem:[#allocation6] sm:$0x3] %vm2245_vm1, %v2242_v16 }
0x3a05   :  { %2268 = dma.vmem_to_hbm [thread:$0]  %s2264_s23, 32, %s2266_s25, [#allocation7]  }
0x3a09   :  { %v2243_v17 = vpop.f32.mrf.mxu3 }
0x3a0a   :  { %2744 = dma.done.wait [#allocation5], 32  }
0x3a0b   :  { %2745 = vsyncadd [#allocation5], 4294967264 }
0x3a0c   :  { %2746 = dma.done.wait [#allocation7], 32  }
0x3a0d   :  { %2747 = vsyncadd [#allocation7], 4294967264 }
0x3a0e   :  { %2277 = vsyncpa [#allocation5], 1 }
0x3a0f   :  { %2278 = vsyncpa [#allocation7], 1 }

</bundles_post_ra>
